<compile_context>
chip_gen: v6e
topology: v6e:2x2x1
jax: 0.10.0
libtpu: 0.0.40
codegen_flags: <defaults>
</compile_context>

<pallas_src>
import jax
import jax.numpy as jnp
from jax import lax
from jax.experimental import pallas as pl
from jax.experimental.pallas import tpu as pltpu


def hgblock(x_nchw, params, *, shortcut=False, matmul_dtype=jnp.float32):
    """HGBlock forward.  x_nchw: (N, C1, H, W) float32 -> (N, C2, H, W)."""
    m_w, m_b, sc_w, sc_b, ec_w, ec_b = params
    N, C1, H, W = x_nchw.shape
    n = len(m_w)
    cm = m_w[0].shape[0]
    k = m_w[0].shape[2]
    Ch = sc_w.shape[0]
    C2 = ec_w.shape[0]
    HW = H * W
    khalf = k // 2
    add = bool(shortcut) and (C1 == C2)

    assert n >= 2 and k % 2 == 1 and k >= 3
    assert sc_w.shape[1] == C1 + n * cm and ec_w.shape[1] == Ch

    # ---- pack parameters into the kernel (channels-first) layout -----------
    def taps(w):  # (Cout, Cin, k, k) -> (k*k, Cout, Cin)
        return jnp.transpose(w, (2, 3, 0, 1)).reshape(k * k, w.shape[0], w.shape[1])

    w0 = taps(m_w[0]).astype(matmul_dtype)                          # (k*k, cm, C1)
    b0 = m_b[0].reshape(cm, 1).astype(jnp.float32)
    wm = jnp.stack([taps(w) for w in m_w[1:]]).astype(matmul_dtype)  # (n-1,k*k,cm,cm)
    bm = jnp.stack([b.reshape(cm, 1) for b in m_b[1:]]).astype(jnp.float32)
    wsc0 = sc_w[:, :C1].astype(matmul_dtype)                        # (Ch, C1)
    wscm = jnp.stack([sc_w[:, C1 + i * cm: C1 + (i + 1) * cm]
                      for i in range(n)]).astype(matmul_dtype)      # (n, Ch, cm)
    bsc = sc_b.reshape(Ch, 1).astype(jnp.float32)
    wec = ec_w.astype(matmul_dtype)                                 # (C2, Ch)
    bec = ec_b.reshape(C2, 1).astype(jnp.float32)

    x_flat = x_nchw.reshape(N, C1, HW)

    # flat spatial zero-padding width, rounded up so the concat is lane-aligned
    pad_lanes = ((khalf * (W + 1) + 127) // 128) * 128

    def kernel(x_ref, w0_ref, b0_ref, wm_ref, bm_ref,
               wsc0_ref, wscm_ref, bsc_ref, wec_ref, bec_ref, o_ref):
        xt = x_ref[0]                                    # (C1, HW), lane-dense

        # column validity masks per horizontal tap offset dj; vertical
        # out-of-range taps read zeros from the flat spatial padding below.
        col = lax.broadcasted_iota(jnp.int32, (1, HW), 1) % W
        col_mask = {}
        for dj in range(-khalf, khalf + 1):
            if dj == 0:
                col_mask[dj] = None
            else:
                ok = jnp.logical_and(col + dj >= 0, col + dj <= W - 1)
                col_mask[dj] = jnp.where(ok, 1.0, 0.0).astype(jnp.float32)

        def conv_k_relu(a, w_get, b):
            # a: (Cin, HW) f32; w_get(t) -> (Cout, Cin); b: (Cout, 1)
            # Full kxk conv (stride 1, pad k//2) as k*k shifted matmuls on the
            # flattened spatial axis, all value-level (no VMEM scratch).
            cin = a.shape[0]
            cout = b.shape[0]
            zp = jnp.zeros((cin, pad_lanes), jnp.float32)
            ap = jnp.concatenate([zp, a, zp], axis=1)
            acc = jnp.zeros((cout, HW), jnp.float32)
            for di in range(-khalf, khalf + 1):
                for dj in range(-khalf, khalf + 1):
                    t = (di + khalf) * k + (dj + khalf)
                    s = pad_lanes + di * W + dj
                    tap = ap[:, s:s + HW]
                    m = col_mask[dj]
                    if m is not None:
                        tap = tap * m
                    acc = acc + jnp.dot(w_get(t), tap.astype(matmul_dtype),
                                        preferred_element_type=jnp.float32)
            return jnp.maximum(acc + b, 0.0)

        # sc (1x1 conv over channel-concat([x, y1..yn])) accumulated as split
        # matmuls while the conv chain runs (no concat, minimal live values).
        acc_sc = jnp.dot(wsc0_ref[...], xt.astype(matmul_dtype),
                         preferred_element_type=jnp.float32)
        y = xt
        for li in range(n):
            if li == 0:
                y = conv_k_relu(y, lambda t: w0_ref[t], b0_ref[...])
            else:
                y = conv_k_relu(y, lambda t, _li=li - 1: wm_ref[_li, t],
                                bm_ref[li - 1])
            acc_sc = acc_sc + jnp.dot(wscm_ref[li], y.astype(matmul_dtype),
                                      preferred_element_type=jnp.float32)
        sc = jnp.maximum(acc_sc + bsc_ref[...], 0.0)     # (Ch, HW)

        # ec: 1x1 conv Ch -> C2, ReLU.
        ec = jnp.maximum(jnp.dot(wec_ref[...], sc.astype(matmul_dtype),
                                 preferred_element_type=jnp.float32)
                         + bec_ref[...], 0.0)            # (C2, HW), lane-dense

        if add:                                          # shortcut and c1 == c2
            ec = ec + xt
        o_ref[0] = ec                                    # single dense store

    def _const_spec(a):
        zeros = (0,) * a.ndim
        return pl.BlockSpec(a.shape, lambda b, _z=zeros: _z)

    out = pl.pallas_call(
        kernel,
        out_shape=jax.ShapeDtypeStruct((N, C2, HW), jnp.float32),
        grid=(N,),
        in_specs=[
            pl.BlockSpec((1, C1, HW), lambda b: (b, 0, 0)),
            _const_spec(w0), _const_spec(b0), _const_spec(wm), _const_spec(bm),
            _const_spec(wsc0), _const_spec(wscm), _const_spec(bsc),
            _const_spec(wec), _const_spec(bec),
        ],
        out_specs=pl.BlockSpec((1, C2, HW), lambda b: (b, 0, 0)),
        compiler_params=pltpu.CompilerParams(
            dimension_semantics=("parallel",),
            vmem_limit_bytes=32 * 1024 * 1024),
    )(x_flat, w0, b0, wm, bm, wsc0, wscm, bsc, wec, bec)

    # TODO(synk): lightconv=True (LightConv = 1x1 Conv + DWConv) variant and
    # spatial H-tiling with an n*(k//2)-row halo for large feature maps are not
    # implemented; the default HGBlock configuration is fully covered.
    return out.reshape(N, C2, H, W)


# ---------------- parameter construction (deterministic, BN folded) ----------

def init_params(key, c1, cm, c2, k=3, n=6):
    """Folded (eval-mode BN) parameters in PyTorch OIHW layout."""
    keys = jax.random.split(key, 2 * n + 4)

    def conv_w(k_, cout, cin, ksz):
        fan_in = cin * ksz * ksz
        return jax.random.normal(k_, (cout, cin, ksz, ksz),
                                 jnp.float32) / jnp.sqrt(float(fan_in))

    def bn_params(k_, c):
        k1, k2, k3, k4 = jax.random.split(k_, 4)
        gamma = 1.0 + 0.1 * jax.random.normal(k1, (c,), jnp.float32)
        beta = 0.1 * jax.random.normal(k2, (c,), jnp.float32)
        mean = 0.1 * jax.random.normal(k3, (c,), jnp.float32)
        var = 1.0 + 0.1 * jnp.abs(jax.random.normal(k4, (c,), jnp.float32))
        return gamma, beta, mean, var

    def fold(w, bnp, eps=1e-5):
        gamma, beta, mean, var = bnp
        scale = gamma / jnp.sqrt(var + eps)
        return (w * scale.reshape((-1,) + (1,) * (w.ndim - 1)),
                beta - mean * scale)

    m_w, m_b = [], []
    for i in range(n):
        cin = c1 if i == 0 else cm
        w, b = fold(conv_w(keys[2 * i], cm, cin, k), bn_params(keys[2 * i + 1], cm))
        m_w.append(w)
        m_b.append(b)

    ctot = c1 + n * cm
    ch = c2 // 2
    w, b = fold(conv_w(keys[2 * n], ch, ctot, 1), bn_params(keys[2 * n + 1], ch))
    sc_w, sc_b = w.reshape(ch, ctot), b
    w, b = fold(conv_w(keys[2 * n + 2], c2, ch, 1), bn_params(keys[2 * n + 3], c2))
    ec_w, ec_b = w.reshape(c2, ch), b
    return m_w, m_b, sc_w, sc_b, ec_w, ec_b


# ---------------- pure-JAX reference (for correctness check) -----------------

def ref_forward(x, params, *, shortcut=False):
    m_w, m_b, sc_w, sc_b, ec_w, ec_b = params
    k = m_w[0].shape[2]

    def conv_bn_relu(x, w, b, pad):
        y = lax.conv_general_dilated(
            x, w, (1, 1), ((pad, pad), (pad, pad)),
            dimension_numbers=('NCHW', 'OIHW', 'NCHW'),
            precision=lax.Precision.HIGHEST)
        return jax.nn.relu(y + b.reshape(1, -1, 1, 1))

    ys = [x]
    for w, b in zip(m_w, m_b):
        ys.append(conv_bn_relu(ys[-1], w, b, k // 2))
    cat = jnp.concatenate(ys, axis=1)
    sc = conv_bn_relu(cat, sc_w[:, :, None, None], sc_b, 0)
    ec = conv_bn_relu(sc, ec_w[:, :, None, None], ec_b, 0)
    add = shortcut and (x.shape[1] == ec.shape[1])
    return ec + x if add else ec


if __name__ == "__main__":
    key = jax.random.PRNGKey(0)
    kx, kp = jax.random.split(key)

    # HGBlock(c1=16, cm=16, c2=32, k=3, n=6, lightconv=False, shortcut=False)
    N, C1, CM, C2, H, W = 2, 16, 16, 32, 16, 16
    x = jax.random.normal(kx, (N, C1, H, W), jnp.float32)   # NCHW, like PyTorch
    params = init_params(kp, C1, CM, C2, k=3, n=6)

    out = jax.block_until_ready(hgblock(x, params))
    ref = ref_forward(x, params)

    assert out.shape == (N, C2, H, W), out.shape
    max_err = float(jnp.max(jnp.abs(out - ref)))
    assert jnp.allclose(out, ref, atol=5e-2, rtol=5e-2), max_err
    print("KERNEL_OK")
</pallas_src>

<mosaic_0001>
module attributes {stable_mosaic.version = 11 : i64} {
  func.func @kernel(%arg0: i32, %arg1: memref<1x16x256xf32, #tpu.memory_space<vmem>>, %arg2: memref<9x16x16xf32, #tpu.memory_space<vmem>>, %arg3: memref<16x1xf32, #tpu.memory_space<vmem>>, %arg4: memref<5x9x16x16xf32, #tpu.memory_space<vmem>>, %arg5: memref<5x16x1xf32, #tpu.memory_space<vmem>>, %arg6: memref<16x16xf32, #tpu.memory_space<vmem>>, %arg7: memref<6x16x16xf32, #tpu.memory_space<vmem>>, %arg8: memref<16x1xf32, #tpu.memory_space<vmem>>, %arg9: memref<32x16xf32, #tpu.memory_space<vmem>>, %arg10: memref<32x1xf32, #tpu.memory_space<vmem>>, %arg11: memref<1x32x256xf32, #tpu.memory_space<vmem>>) attributes {dimension_semantics = [#tpu.dimension_semantics<parallel>], iteration_bounds = array<i64: 2>, scalar_prefetch = 0 : i64, scratch_operands = 0 : i64, tpu.core_type = #tpu.core_type<tc>, window_params = [{transform_indices = @transform_0, window_bounds = array<i64: 1, 16, 256>}, {pipeline_mode = #tpu.pipeline_mode<synchronous>, transform_indices = @transform_1, window_bounds = array<i64: 9, 16, 16>}, {pipeline_mode = #tpu.pipeline_mode<synchronous>, transform_indices = @transform_2, window_bounds = array<i64: 16, 1>}, {pipeline_mode = #tpu.pipeline_mode<synchronous>, transform_indices = @transform_3, window_bounds = array<i64: 5, 9, 16, 16>}, {pipeline_mode = #tpu.pipeline_mode<synchronous>, transform_indices = @transform_4, window_bounds = array<i64: 5, 16, 1>}, {pipeline_mode = #tpu.pipeline_mode<synchronous>, transform_indices = @transform_5, window_bounds = array<i64: 16, 16>}, {pipeline_mode = #tpu.pipeline_mode<synchronous>, transform_indices = @transform_6, window_bounds = array<i64: 6, 16, 16>}, {pipeline_mode = #tpu.pipeline_mode<synchronous>, transform_indices = @transform_7, window_bounds = array<i64: 16, 1>}, {pipeline_mode = #tpu.pipeline_mode<synchronous>, transform_indices = @transform_8, window_bounds = array<i64: 32, 16>}, {pipeline_mode = #tpu.pipeline_mode<synchronous>, transform_indices = @transform_9, window_bounds = array<i64: 32, 1>}, {transform_indices = @transform_10, window_bounds = array<i64: 1, 32, 256>}]} {
    %c0 = arith.constant 0 : index
    %c0_0 = arith.constant 0 : index
    %c0_1 = arith.constant 0 : index
    %0 = vector.load %arg1[%c0, %c0_0, %c0_1] : memref<1x16x256xf32, #tpu.memory_space<vmem>>, vector<1x16x256xf32>
    %1 = vector.shape_cast %0 : vector<1x16x256xf32> to vector<16x256xf32>
    %2 = tpu.iota {dimensions = array<i32: 1>} : vector<1x256xi32>
    %c16_i32 = arith.constant 16 : i32
    %c0_i32 = arith.constant 0 : i32
    %3 = arith.cmpi eq, %c16_i32, %c0_i32 : i32
    %c1_i32 = arith.constant 1 : i32
    %4 = arith.select %3, %c1_i32, %c16_i32 : i32
    %5 = vector.broadcast %4 : i32 to vector<1x256xi32>
    %6 = arith.remsi %2, %5 : vector<1x256xi32>
    %c0_i32_2 = arith.constant 0 : i32
    %7 = vector.broadcast %c0_i32_2 : i32 to vector<1x256xi32>
    %8 = arith.cmpi ne, %6, %7 : vector<1x256xi32>
    %c0_i32_3 = arith.constant 0 : i32
    %9 = vector.broadcast %c0_i32_3 : i32 to vector<1x256xi32>
    %10 = arith.cmpi slt, %6, %9 : vector<1x256xi32>
    %c0_i32_4 = arith.constant 0 : i32
    %11 = arith.cmpi slt, %4, %c0_i32_4 : i32
    %12 = vector.broadcast %11 : i1 to vector<1x256xi1>
    %13 = vector.broadcast %12 : vector<1x256xi1> to vector<1x256xi1>
    %14 = arith.xori %10, %13 : vector<1x256xi1>
    %15 = arith.andi %14, %8 : vector<1x256xi1>
    %16 = vector.broadcast %4 : i32 to vector<1x256xi32>
    %17 = arith.addi %6, %16 : vector<1x256xi32>
    %18 = arith.select %15, %17, %6 : vector<1x256xi1>, vector<1x256xi32>
    %c-1_i32 = arith.constant -1 : i32
    %19 = vector.broadcast %c-1_i32 : i32 to vector<1x256xi32>
    %20 = arith.addi %18, %19 : vector<1x256xi32>
    %c0_i32_5 = arith.constant 0 : i32
    %21 = vector.broadcast %c0_i32_5 : i32 to vector<1x256xi32>
    %22 = arith.cmpi sge, %20, %21 : vector<1x256xi32>
    %c-1_i32_6 = arith.constant -1 : i32
    %23 = vector.broadcast %c-1_i32_6 : i32 to vector<1x256xi32>
    %24 = arith.addi %18, %23 : vector<1x256xi32>
    %c15_i32 = arith.constant 15 : i32
    %25 = vector.broadcast %c15_i32 : i32 to vector<1x256xi32>
    %26 = arith.cmpi sle, %24, %25 : vector<1x256xi32>
    %27 = arith.andi %22, %26 : vector<1x256xi1>
    %cst = arith.constant 1.000000e+00 : f32
    %cst_7 = arith.constant 0.000000e+00 : f32
    %28 = vector.broadcast %cst : f32 to vector<1x256xf32>
    %29 = vector.broadcast %cst_7 : f32 to vector<1x256xf32>
    %30 = arith.select %27, %28, %29 : vector<1x256xi1>, vector<1x256xf32>
    %c1_i32_8 = arith.constant 1 : i32
    %31 = vector.broadcast %c1_i32_8 : i32 to vector<1x256xi32>
    %32 = arith.addi %18, %31 : vector<1x256xi32>
    %c0_i32_9 = arith.constant 0 : i32
    %33 = vector.broadcast %c0_i32_9 : i32 to vector<1x256xi32>
    %34 = arith.cmpi sge, %32, %33 : vector<1x256xi32>
    %c1_i32_10 = arith.constant 1 : i32
    %35 = vector.broadcast %c1_i32_10 : i32 to vector<1x256xi32>
    %36 = arith.addi %18, %35 : vector<1x256xi32>
    %c15_i32_11 = arith.constant 15 : i32
    %37 = vector.broadcast %c15_i32_11 : i32 to vector<1x256xi32>
    %38 = arith.cmpi sle, %36, %37 : vector<1x256xi32>
    %39 = arith.andi %34, %38 : vector<1x256xi1>
    %cst_12 = arith.constant 1.000000e+00 : f32
    %cst_13 = arith.constant 0.000000e+00 : f32
    %40 = vector.broadcast %cst_12 : f32 to vector<1x256xf32>
    %41 = vector.broadcast %cst_13 : f32 to vector<1x256xf32>
    %42 = arith.select %39, %40, %41 : vector<1x256xi1>, vector<1x256xf32>
    %c0_14 = arith.constant 0 : index
    %c0_15 = arith.constant 0 : index
    %43 = vector.load %arg6[%c0_14, %c0_15] : memref<16x16xf32, #tpu.memory_space<vmem>>, vector<16x16xf32>
    %cst_16 = arith.constant dense<0.000000e+00> : vector<16x256xf32>
    %44 = tpu.matmul %43, %1, %cst_16 {dimension_numbers = #tpu.dot_dimension_numbers<[1], [0], [0], [1], [0, 0, 1, 1], [], []>} : vector<16x16xf32>, vector<16x256xf32>, vector<16x256xf32> -> vector<16x256xf32>
    %c0_17 = arith.constant 0 : index
    %c0_18 = arith.constant 0 : index
    %45 = vector.load %arg3[%c0_17, %c0_18] : memref<16x1xf32, #tpu.memory_space<vmem>>, vector<16x1xf32>
    %cst_19 = arith.constant 0.000000e+00 : f32
    %46 = vector.broadcast %cst_19 : f32 to vector<16x128xf32>
    %47 = tpu.concatenate %46, %1, %46 in 1 : vector<16x128xf32>, vector<16x256xf32>, vector<16x128xf32> -> vector<16x512xf32>
    %cst_20 = arith.constant 0.000000e+00 : f32
    %48 = vector.broadcast %cst_20 : f32 to vector<16x256xf32>
    %49 = vector.extract_strided_slice %47 {offsets = [0, 111], sizes = [16, 256], strides = [1, 1]} : vector<16x512xf32> to vector<16x256xf32>
    %50 = vector.broadcast %30 : vector<1x256xf32> to vector<16x256xf32>
    %51 = arith.mulf %49, %50 : vector<16x256xf32>
    %c0_21 = arith.constant 0 : index
    %c0_22 = arith.constant 0 : index
    %c0_23 = arith.constant 0 : index
    %52 = vector.load %arg2[%c0_21, %c0_22, %c0_23] : memref<9x16x16xf32, #tpu.memory_space<vmem>>, vector<1x16x16xf32>
    %53 = vector.shape_cast %52 : vector<1x16x16xf32> to vector<16x16xf32>
    %cst_24 = arith.constant dense<0.000000e+00> : vector<16x256xf32>
    %54 = tpu.matmul %53, %51, %cst_24 {dimension_numbers = #tpu.dot_dimension_numbers<[1], [0], [0], [1], [0, 0, 1, 1], [], []>} : vector<16x16xf32>, vector<16x256xf32>, vector<16x256xf32> -> vector<16x256xf32>
    %55 = arith.addf %48, %54 : vector<16x256xf32>
    %56 = vector.extract_strided_slice %47 {offsets = [0, 112], sizes = [16, 256], strides = [1, 1]} : vector<16x512xf32> to vector<16x256xf32>
    %c1 = arith.constant 1 : index
    %c0_25 = arith.constant 0 : index
    %c0_26 = arith.constant 0 : index
    %57 = vector.load %arg2[%c1, %c0_25, %c0_26] : memref<9x16x16xf32, #tpu.memory_space<vmem>>, vector<1x16x16xf32>
    %58 = vector.shape_cast %57 : vector<1x16x16xf32> to vector<16x16xf32>
    %cst_27 = arith.constant dense<0.000000e+00> : vector<16x256xf32>
    %59 = tpu.matmul %58, %56, %cst_27 {dimension_numbers = #tpu.dot_dimension_numbers<[1], [0], [0], [1], [0, 0, 1, 1], [], []>} : vector<16x16xf32>, vector<16x256xf32>, vector<16x256xf32> -> vector<16x256xf32>
    %60 = arith.addf %55, %59 : vector<16x256xf32>
    %61 = vector.extract_strided_slice %47 {offsets = [0, 113], sizes = [16, 256], strides = [1, 1]} : vector<16x512xf32> to vector<16x256xf32>
    %62 = vector.broadcast %42 : vector<1x256xf32> to vector<16x256xf32>
    %63 = arith.mulf %61, %62 : vector<16x256xf32>
    %c2 = arith.constant 2 : index
    %c0_28 = arith.constant 0 : index
    %c0_29 = arith.constant 0 : index
    %64 = vector.load %arg2[%c2, %c0_28, %c0_29] : memref<9x16x16xf32, #tpu.memory_space<vmem>>, vector<1x16x16xf32>
    %65 = vector.shape_cast %64 : vector<1x16x16xf32> to vector<16x16xf32>
    %cst_30 = arith.constant dense<0.000000e+00> : vector<16x256xf32>
    %66 = tpu.matmul %65, %63, %cst_30 {dimension_numbers = #tpu.dot_dimension_numbers<[1], [0], [0], [1], [0, 0, 1, 1], [], []>} : vector<16x16xf32>, vector<16x256xf32>, vector<16x256xf32> -> vector<16x256xf32>
    %67 = arith.addf %60, %66 : vector<16x256xf32>
    %68 = vector.extract_strided_slice %47 {offsets = [0, 127], sizes = [16, 256], strides = [1, 1]} : vector<16x512xf32> to vector<16x256xf32>
    %69 = vector.broadcast %30 : vector<1x256xf32> to vector<16x256xf32>
    %70 = arith.mulf %68, %69 : vector<16x256xf32>
    %c3 = arith.constant 3 : index
    %c0_31 = arith.constant 0 : index
    %c0_32 = arith.constant 0 : index
    %71 = vector.load %arg2[%c3, %c0_31, %c0_32] : memref<9x16x16xf32, #tpu.memory_space<vmem>>, vector<1x16x16xf32>
    %72 = vector.shape_cast %71 : vector<1x16x16xf32> to vector<16x16xf32>
    %cst_33 = arith.constant dense<0.000000e+00> : vector<16x256xf32>
    %73 = tpu.matmul %72, %70, %cst_33 {dimension_numbers = #tpu.dot_dimension_numbers<[1], [0], [0], [1], [0, 0, 1, 1], [], []>} : vector<16x16xf32>, vector<16x256xf32>, vector<16x256xf32> -> vector<16x256xf32>
    %74 = arith.addf %67, %73 : vector<16x256xf32>
    %75 = vector.extract_strided_slice %47 {offsets = [0, 128], sizes = [16, 256], strides = [1, 1]} : vector<16x512xf32> to vector<16x256xf32>
    %c4 = arith.constant 4 : index
    %c0_34 = arith.constant 0 : index
    %c0_35 = arith.constant 0 : index
    %76 = vector.load %arg2[%c4, %c0_34, %c0_35] : memref<9x16x16xf32, #tpu.memory_space<vmem>>, vector<1x16x16xf32>
    %77 = vector.shape_cast %76 : vector<1x16x16xf32> to vector<16x16xf32>
    %cst_36 = arith.constant dense<0.000000e+00> : vector<16x256xf32>
    %78 = tpu.matmul %77, %75, %cst_36 {dimension_numbers = #tpu.dot_dimension_numbers<[1], [0], [0], [1], [0, 0, 1, 1], [], []>} : vector<16x16xf32>, vector<16x256xf32>, vector<16x256xf32> -> vector<16x256xf32>
    %79 = arith.addf %74, %78 : vector<16x256xf32>
    %80 = vector.extract_strided_slice %47 {offsets = [0, 129], sizes = [16, 256], strides = [1, 1]} : vector<16x512xf32> to vector<16x256xf32>
    %81 = vector.broadcast %42 : vector<1x256xf32> to vector<16x256xf32>
    %82 = arith.mulf %80, %81 : vector<16x256xf32>
    %c5 = arith.constant 5 : index
    %c0_37 = arith.constant 0 : index
    %c0_38 = arith.constant 0 : index
    %83 = vector.load %arg2[%c5, %c0_37, %c0_38] : memref<9x16x16xf32, #tpu.memory_space<vmem>>, vector<1x16x16xf32>
    %84 = vector.shape_cast %83 : vector<1x16x16xf32> to vector<16x16xf32>
    %cst_39 = arith.constant dense<0.000000e+00> : vector<16x256xf32>
    %85 = tpu.matmul %84, %82, %cst_39 {dimension_numbers = #tpu.dot_dimension_numbers<[1], [0], [0], [1], [0, 0, 1, 1], [], []>} : vector<16x16xf32>, vector<16x256xf32>, vector<16x256xf32> -> vector<16x256xf32>
    %86 = arith.addf %79, %85 : vector<16x256xf32>
    %87 = vector.extract_strided_slice %47 {offsets = [0, 143], sizes = [16, 256], strides = [1, 1]} : vector<16x512xf32> to vector<16x256xf32>
    %88 = vector.broadcast %30 : vector<1x256xf32> to vector<16x256xf32>
    %89 = arith.mulf %87, %88 : vector<16x256xf32>
    %c6 = arith.constant 6 : index
    %c0_40 = arith.constant 0 : index
    %c0_41 = arith.constant 0 : index
    %90 = vector.load %arg2[%c6, %c0_40, %c0_41] : memref<9x16x16xf32, #tpu.memory_space<vmem>>, vector<1x16x16xf32>
    %91 = vector.shape_cast %90 : vector<1x16x16xf32> to vector<16x16xf32>
    %cst_42 = arith.constant dense<0.000000e+00> : vector<16x256xf32>
    %92 = tpu.matmul %91, %89, %cst_42 {dimension_numbers = #tpu.dot_dimension_numbers<[1], [0], [0], [1], [0, 0, 1, 1], [], []>} : vector<16x16xf32>, vector<16x256xf32>, vector<16x256xf32> -> vector<16x256xf32>
    %93 = arith.addf %86, %92 : vector<16x256xf32>
    %94 = vector.extract_strided_slice %47 {offsets = [0, 144], sizes = [16, 256], strides = [1, 1]} : vector<16x512xf32> to vector<16x256xf32>
    %c7 = arith.constant 7 : index
    %c0_43 = arith.constant 0 : index
    %c0_44 = arith.constant 0 : index
    %95 = vector.load %arg2[%c7, %c0_43, %c0_44] : memref<9x16x16xf32, #tpu.memory_space<vmem>>, vector<1x16x16xf32>
    %96 = vector.shape_cast %95 : vector<1x16x16xf32> to vector<16x16xf32>
    %cst_45 = arith.constant dense<0.000000e+00> : vector<16x256xf32>
    %97 = tpu.matmul %96, %94, %cst_45 {dimension_numbers = #tpu.dot_dimension_numbers<[1], [0], [0], [1], [0, 0, 1, 1], [], []>} : vector<16x16xf32>, vector<16x256xf32>, vector<16x256xf32> -> vector<16x256xf32>
    %98 = arith.addf %93, %97 : vector<16x256xf32>
    %99 = vector.extract_strided_slice %47 {offsets = [0, 145], sizes = [16, 256], strides = [1, 1]} : vector<16x512xf32> to vector<16x256xf32>
    %100 = vector.broadcast %42 : vector<1x256xf32> to vector<16x256xf32>
    %101 = arith.mulf %99, %100 : vector<16x256xf32>
    %c8 = arith.constant 8 : index
    %c0_46 = arith.constant 0 : index
    %c0_47 = arith.constant 0 : index
    %102 = vector.load %arg2[%c8, %c0_46, %c0_47] : memref<9x16x16xf32, #tpu.memory_space<vmem>>, vector<1x16x16xf32>
    %103 = vector.shape_cast %102 : vector<1x16x16xf32> to vector<16x16xf32>
    %cst_48 = arith.constant dense<0.000000e+00> : vector<16x256xf32>
    %104 = tpu.matmul %103, %101, %cst_48 {dimension_numbers = #tpu.dot_dimension_numbers<[1], [0], [0], [1], [0, 0, 1, 1], [], []>} : vector<16x16xf32>, vector<16x256xf32>, vector<16x256xf32> -> vector<16x256xf32>
    %105 = arith.addf %98, %104 : vector<16x256xf32>
    %106 = vector.broadcast %45 : vector<16x1xf32> to vector<16x256xf32>
    %107 = arith.addf %105, %106 : vector<16x256xf32>
    %cst_49 = arith.constant 0.000000e+00 : f32
    %108 = vector.broadcast %cst_49 : f32 to vector<16x256xf32>
    %109 = arith.maximumf %107, %108 : vector<16x256xf32>
    %c0_50 = arith.constant 0 : index
    %c0_51 = arith.constant 0 : index
    %c0_52 = arith.constant 0 : index
    %110 = vector.load %arg7[%c0_50, %c0_51, %c0_52] : memref<6x16x16xf32, #tpu.memory_space<vmem>>, vector<1x16x16xf32>
    %111 = vector.shape_cast %110 : vector<1x16x16xf32> to vector<16x16xf32>
    %cst_53 = arith.constant dense<0.000000e+00> : vector<16x256xf32>
    %112 = tpu.matmul %111, %109, %cst_53 {dimension_numbers = #tpu.dot_dimension_numbers<[1], [0], [0], [1], [0, 0, 1, 1], [], []>} : vector<16x16xf32>, vector<16x256xf32>, vector<16x256xf32> -> vector<16x256xf32>
    %113 = arith.addf %44, %112 : vector<16x256xf32>
    %c0_54 = arith.constant 0 : index
    %c0_55 = arith.constant 0 : index
    %c0_56 = arith.constant 0 : index
    %114 = vector.load %arg5[%c0_54, %c0_55, %c0_56] : memref<5x16x1xf32, #tpu.memory_space<vmem>>, vector<1x16x1xf32>
    %115 = vector.shape_cast %114 : vector<1x16x1xf32> to vector<16x1xf32>
    %cst_57 = arith.constant 0.000000e+00 : f32
    %116 = vector.broadcast %cst_57 : f32 to vector<16x128xf32>
    %117 = tpu.concatenate %116, %109, %116 in 1 : vector<16x128xf32>, vector<16x256xf32>, vector<16x128xf32> -> vector<16x512xf32>
    %cst_58 = arith.constant 0.000000e+00 : f32
    %118 = vector.broadcast %cst_58 : f32 to vector<16x256xf32>
    %119 = vector.extract_strided_slice %117 {offsets = [0, 111], sizes = [16, 256], strides = [1, 1]} : vector<16x512xf32> to vector<16x256xf32>
    %120 = vector.broadcast %30 : vector<1x256xf32> to vector<16x256xf32>
    %121 = arith.mulf %119, %120 : vector<16x256xf32>
    %c0_59 = arith.constant 0 : index
    %c0_60 = arith.constant 0 : index
    %c0_61 = arith.constant 0 : index
    %c0_62 = arith.constant 0 : index
    %122 = vector.load %arg4[%c0_59, %c0_60, %c0_61, %c0_62] : memref<5x9x16x16xf32, #tpu.memory_space<vmem>>, vector<1x1x16x16xf32>
    %123 = vector.shape_cast %122 : vector<1x1x16x16xf32> to vector<16x16xf32>
    %cst_63 = arith.constant dense<0.000000e+00> : vector<16x256xf32>
    %124 = tpu.matmul %123, %121, %cst_63 {dimension_numbers = #tpu.dot_dimension_numbers<[1], [0], [0], [1], [0, 0, 1, 1], [], []>} : vector<16x16xf32>, vector<16x256xf32>, vector<16x256xf32> -> vector<16x256xf32>
    %125 = arith.addf %118, %124 : vector<16x256xf32>
    %126 = vector.extract_strided_slice %117 {offsets = [0, 112], sizes = [16, 256], strides = [1, 1]} : vector<16x512xf32> to vector<16x256xf32>
    %c0_64 = arith.constant 0 : index
    %c1_65 = arith.constant 1 : index
    %c0_66 = arith.constant 0 : index
    %c0_67 = arith.constant 0 : index
    %127 = vector.load %arg4[%c0_64, %c1_65, %c0_66, %c0_67] : memref<5x9x16x16xf32, #tpu.memory_space<vmem>>, vector<1x1x16x16xf32>
    %128 = vector.shape_cast %127 : vector<1x1x16x16xf32> to vector<16x16xf32>
    %cst_68 = arith.constant dense<0.000000e+00> : vector<16x256xf32>
    %129 = tpu.matmul %128, %126, %cst_68 {dimension_numbers = #tpu.dot_dimension_numbers<[1], [0], [0], [1], [0, 0, 1, 1], [], []>} : vector<16x16xf32>, vector<16x256xf32>, vector<16x256xf32> -> vector<16x256xf32>
    %130 = arith.addf %125, %129 : vector<16x256xf32>
    %131 = vector.extract_strided_slice %117 {offsets = [0, 113], sizes = [16, 256], strides = [1, 1]} : vector<16x512xf32> to vector<16x256xf32>
    %132 = vector.broadcast %42 : vector<1x256xf32> to vector<16x256xf32>
    %133 = arith.mulf %131, %132 : vector<16x256xf32>
    %c0_69 = arith.constant 0 : index
    %c2_70 = arith.constant 2 : index
    %c0_71 = arith.constant 0 : index
    %c0_72 = arith.constant 0 : index
    %134 = vector.load %arg4[%c0_69, %c2_70, %c0_71, %c0_72] : memref<5x9x16x16xf32, #tpu.memory_space<vmem>>, vector<1x1x16x16xf32>
    %135 = vector.shape_cast %134 : vector<1x1x16x16xf32> to vector<16x16xf32>
    %cst_73 = arith.constant dense<0.000000e+00> : vector<16x256xf32>
    %136 = tpu.matmul %135, %133, %cst_73 {dimension_numbers = #tpu.dot_dimension_numbers<[1], [0], [0], [1], [0, 0, 1, 1], [], []>} : vector<16x16xf32>, vector<16x256xf32>, vector<16x256xf32> -> vector<16x256xf32>
    %137 = arith.addf %130, %136 : vector<16x256xf32>
    %138 = vector.extract_strided_slice %117 {offsets = [0, 127], sizes = [16, 256], strides = [1, 1]} : vector<16x512xf32> to vector<16x256xf32>
    %139 = vector.broadcast %30 : vector<1x256xf32> to vector<16x256xf32>
    %140 = arith.mulf %138, %139 : vector<16x256xf32>
    %c0_74 = arith.constant 0 : index
    %c3_75 = arith.constant 3 : index
    %c0_76 = arith.constant 0 : index
    %c0_77 = arith.constant 0 : index
    %141 = vector.load %arg4[%c0_74, %c3_75, %c0_76, %c0_77] : memref<5x9x16x16xf32, #tpu.memory_space<vmem>>, vector<1x1x16x16xf32>
    %142 = vector.shape_cast %141 : vector<1x1x16x16xf32> to vector<16x16xf32>
    %cst_78 = arith.constant dense<0.000000e+00> : vector<16x256xf32>
    %143 = tpu.matmul %142, %140, %cst_78 {dimension_numbers = #tpu.dot_dimension_numbers<[1], [0], [0], [1], [0, 0, 1, 1], [], []>} : vector<16x16xf32>, vector<16x256xf32>, vector<16x256xf32> -> vector<16x256xf32>
    %144 = arith.addf %137, %143 : vector<16x256xf32>
    %145 = vector.extract_strided_slice %117 {offsets = [0, 128], sizes = [16, 256], strides = [1, 1]} : vector<16x512xf32> to vector<16x256xf32>
    %c0_79 = arith.constant 0 : index
    %c4_80 = arith.constant 4 : index
    %c0_81 = arith.constant 0 : index
    %c0_82 = arith.constant 0 : index
    %146 = vector.load %arg4[%c0_79, %c4_80, %c0_81, %c0_82] : memref<5x9x16x16xf32, #tpu.memory_space<vmem>>, vector<1x1x16x16xf32>
    %147 = vector.shape_cast %146 : vector<1x1x16x16xf32> to vector<16x16xf32>
    %cst_83 = arith.constant dense<0.000000e+00> : vector<16x256xf32>
    %148 = tpu.matmul %147, %145, %cst_83 {dimension_numbers = #tpu.dot_dimension_numbers<[1], [0], [0], [1], [0, 0, 1, 1], [], []>} : vector<16x16xf32>, vector<16x256xf32>, vector<16x256xf32> -> vector<16x256xf32>
    %149 = arith.addf %144, %148 : vector<16x256xf32>
    %150 = vector.extract_strided_slice %117 {offsets = [0, 129], sizes = [16, 256], strides = [1, 1]} : vector<16x512xf32> to vector<16x256xf32>
    %151 = vector.broadcast %42 : vector<1x256xf32> to vector<16x256xf32>
    %152 = arith.mulf %150, %151 : vector<16x256xf32>
    %c0_84 = arith.constant 0 : index
    %c5_85 = arith.constant 5 : index
    %c0_86 = arith.constant 0 : index
    %c0_87 = arith.constant 0 : index
    %153 = vector.load %arg4[%c0_84, %c5_85, %c0_86, %c0_87] : memref<5x9x16x16xf32, #tpu.memory_space<vmem>>, vector<1x1x16x16xf32>
    %154 = vector.shape_cast %153 : vector<1x1x16x16xf32> to vector<16x16xf32>
    %cst_88 = arith.constant dense<0.000000e+00> : vector<16x256xf32>
    %155 = tpu.matmul %154, %152, %cst_88 {dimension_numbers = #tpu.dot_dimension_numbers<[1], [0], [0], [1], [0, 0, 1, 1], [], []>} : vector<16x16xf32>, vector<16x256xf32>, vector<16x256xf32> -> vector<16x256xf32>
    %156 = arith.addf %149, %155 : vector<16x256xf32>
    %157 = vector.extract_strided_slice %117 {offsets = [0, 143], sizes = [16, 256], strides = [1, 1]} : vector<16x512xf32> to vector<16x256xf32>
    %158 = vector.broadcast %30 : vector<1x256xf32> to vector<16x256xf32>
    %159 = arith.mulf %157, %158 : vector<16x256xf32>
    %c0_89 = arith.constant 0 : index
    %c6_90 = arith.constant 6 : index
    %c0_91 = arith.constant 0 : index
    %c0_92 = arith.constant 0 : index
    %160 = vector.load %arg4[%c0_89, %c6_90, %c0_91, %c0_92] : memref<5x9x16x16xf32, #tpu.memory_space<vmem>>, vector<1x1x16x16xf32>
    %161 = vector.shape_cast %160 : vector<1x1x16x16xf32> to vector<16x16xf32>
    %cst_93 = arith.constant dense<0.000000e+00> : vector<16x256xf32>
    %162 = tpu.matmul %161, %159, %cst_93 {dimension_numbers = #tpu.dot_dimension_numbers<[1], [0], [0], [1], [0, 0, 1, 1], [], []>} : vector<16x16xf32>, vector<16x256xf32>, vector<16x256xf32> -> vector<16x256xf32>
    %163 = arith.addf %156, %162 : vector<16x256xf32>
    %164 = vector.extract_strided_slice %117 {offsets = [0, 144], sizes = [16, 256], strides = [1, 1]} : vector<16x512xf32> to vector<16x256xf32>
    %c0_94 = arith.constant 0 : index
    %c7_95 = arith.constant 7 : index
    %c0_96 = arith.constant 0 : index
    %c0_97 = arith.constant 0 : index
    %165 = vector.load %arg4[%c0_94, %c7_95, %c0_96, %c0_97] : memref<5x9x16x16xf32, #tpu.memory_space<vmem>>, vector<1x1x16x16xf32>
    %166 = vector.shape_cast %165 : vector<1x1x16x16xf32> to vector<16x16xf32>
    %cst_98 = arith.constant dense<0.000000e+00> : vector<16x256xf32>
    %167 = tpu.matmul %166, %164, %cst_98 {dimension_numbers = #tpu.dot_dimension_numbers<[1], [0], [0], [1], [0, 0, 1, 1], [], []>} : vector<16x16xf32>, vector<16x256xf32>, vector<16x256xf32> -> vector<16x256xf32>
    %168 = arith.addf %163, %167 : vector<16x256xf32>
    %169 = vector.extract_strided_slice %117 {offsets = [0, 145], sizes = [16, 256], strides = [1, 1]} : vector<16x512xf32> to vector<16x256xf32>
    %170 = vector.broadcast %42 : vector<1x256xf32> to vector<16x256xf32>
    %171 = arith.mulf %169, %170 : vector<16x256xf32>
    %c0_99 = arith.constant 0 : index
    %c8_100 = arith.constant 8 : index
    %c0_101 = arith.constant 0 : index
    %c0_102 = arith.constant 0 : index
    %172 = vector.load %arg4[%c0_99, %c8_100, %c0_101, %c0_102] : memref<5x9x16x16xf32, #tpu.memory_space<vmem>>, vector<1x1x16x16xf32>
    %173 = vector.shape_cast %172 : vector<1x1x16x16xf32> to vector<16x16xf32>
    %cst_103 = arith.constant dense<0.000000e+00> : vector<16x256xf32>
    %174 = tpu.matmul %173, %171, %cst_103 {dimension_numbers = #tpu.dot_dimension_numbers<[1], [0], [0], [1], [0, 0, 1, 1], [], []>} : vector<16x16xf32>, vector<16x256xf32>, vector<16x256xf32> -> vector<16x256xf32>
    %175 = arith.addf %168, %174 : vector<16x256xf32>
    %176 = vector.broadcast %115 : vector<16x1xf32> to vector<16x256xf32>
    %177 = arith.addf %175, %176 : vector<16x256xf32>
    %cst_104 = arith.constant 0.000000e+00 : f32
    %178 = vector.broadcast %cst_104 : f32 to vector<16x256xf32>
    %179 = arith.maximumf %177, %178 : vector<16x256xf32>
    %c1_105 = arith.constant 1 : index
    %c0_106 = arith.constant 0 : index
    %c0_107 = arith.constant 0 : index
    %180 = vector.load %arg7[%c1_105, %c0_106, %c0_107] : memref<6x16x16xf32, #tpu.memory_space<vmem>>, vector<1x16x16xf32>
    %181 = vector.shape_cast %180 : vector<1x16x16xf32> to vector<16x16xf32>
    %cst_108 = arith.constant dense<0.000000e+00> : vector<16x256xf32>
    %182 = tpu.matmul %181, %179, %cst_108 {dimension_numbers = #tpu.dot_dimension_numbers<[1], [0], [0], [1], [0, 0, 1, 1], [], []>} : vector<16x16xf32>, vector<16x256xf32>, vector<16x256xf32> -> vector<16x256xf32>
    %183 = arith.addf %113, %182 : vector<16x256xf32>
    %c1_109 = arith.constant 1 : index
    %c0_110 = arith.constant 0 : index
    %c0_111 = arith.constant 0 : index
    %184 = vector.load %arg5[%c1_109, %c0_110, %c0_111] : memref<5x16x1xf32, #tpu.memory_space<vmem>>, vector<1x16x1xf32>
    %185 = vector.shape_cast %184 : vector<1x16x1xf32> to vector<16x1xf32>
    %cst_112 = arith.constant 0.000000e+00 : f32
    %186 = vector.broadcast %cst_112 : f32 to vector<16x128xf32>
    %187 = tpu.concatenate %186, %179, %186 in 1 : vector<16x128xf32>, vector<16x256xf32>, vector<16x128xf32> -> vector<16x512xf32>
    %cst_113 = arith.constant 0.000000e+00 : f32
    %188 = vector.broadcast %cst_113 : f32 to vector<16x256xf32>
    %189 = vector.extract_strided_slice %187 {offsets = [0, 111], sizes = [16, 256], strides = [1, 1]} : vector<16x512xf32> to vector<16x256xf32>
    %190 = vector.broadcast %30 : vector<1x256xf32> to vector<16x256xf32>
    %191 = arith.mulf %189, %190 : vector<16x256xf32>
    %c1_114 = arith.constant 1 : index
    %c0_115 = arith.constant 0 : index
    %c0_116 = arith.constant 0 : index
    %c0_117 = arith.constant 0 : index
    %192 = vector.load %arg4[%c1_114, %c0_115, %c0_116, %c0_117] : memref<5x9x16x16xf32, #tpu.memory_space<vmem>>, vector<1x1x16x16xf32>
    %193 = vector.shape_cast %192 : vector<1x1x16x16xf32> to vector<16x16xf32>
    %cst_118 = arith.constant dense<0.000000e+00> : vector<16x256xf32>
    %194 = tpu.matmul %193, %191, %cst_118 {dimension_numbers = #tpu.dot_dimension_numbers<[1], [0], [0], [1], [0, 0, 1, 1], [], []>} : vector<16x16xf32>, vector<16x256xf32>, vector<16x256xf32> -> vector<16x256xf32>
    %195 = arith.addf %188, %194 : vector<16x256xf32>
    %196 = vector.extract_strided_slice %187 {offsets = [0, 112], sizes = [16, 256], strides = [1, 1]} : vector<16x512xf32> to vector<16x256xf32>
    %c1_119 = arith.constant 1 : index
    %c1_120 = arith.constant 1 : index
    %c0_121 = arith.constant 0 : index
    %c0_122 = arith.constant 0 : index
    %197 = vector.load %arg4[%c1_119, %c1_120, %c0_121, %c0_122] : memref<5x9x16x16xf32, #tpu.memory_space<vmem>>, vector<1x1x16x16xf32>
    %198 = vector.shape_cast %197 : vector<1x1x16x16xf32> to vector<16x16xf32>
    %cst_123 = arith.constant dense<0.000000e+00> : vector<16x256xf32>
    %199 = tpu.matmul %198, %196, %cst_123 {dimension_numbers = #tpu.dot_dimension_numbers<[1], [0], [0], [1], [0, 0, 1, 1], [], []>} : vector<16x16xf32>, vector<16x256xf32>, vector<16x256xf32> -> vector<16x256xf32>
    %200 = arith.addf %195, %199 : vector<16x256xf32>
    %201 = vector.extract_strided_slice %187 {offsets = [0, 113], sizes = [16, 256], strides = [1, 1]} : vector<16x512xf32> to vector<16x256xf32>
    %202 = vector.broadcast %42 : vector<1x256xf32> to vector<16x256xf32>
    %203 = arith.mulf %201, %202 : vector<16x256xf32>
    %c1_124 = arith.constant 1 : index
    %c2_125 = arith.constant 2 : index
    %c0_126 = arith.constant 0 : index
    %c0_127 = arith.constant 0 : index
    %204 = vector.load %arg4[%c1_124, %c2_125, %c0_126, %c0_127] : memref<5x9x16x16xf32, #tpu.memory_space<vmem>>, vector<1x1x16x16xf32>
    %205 = vector.shape_cast %204 : vector<1x1x16x16xf32> to vector<16x16xf32>
    %cst_128 = arith.constant dense<0.000000e+00> : vector<16x256xf32>
    %206 = tpu.matmul %205, %203, %cst_128 {dimension_numbers = #tpu.dot_dimension_numbers<[1], [0], [0], [1], [0, 0, 1, 1], [], []>} : vector<16x16xf32>, vector<16x256xf32>, vector<16x256xf32> -> vector<16x256xf32>
    %207 = arith.addf %200, %206 : vector<16x256xf32>
    %208 = vector.extract_strided_slice %187 {offsets = [0, 127], sizes = [16, 256], strides = [1, 1]} : vector<16x512xf32> to vector<16x256xf32>
    %209 = vector.broadcast %30 : vector<1x256xf32> to vector<16x256xf32>
    %210 = arith.mulf %208, %209 : vector<16x256xf32>
    %c1_129 = arith.constant 1 : index
    %c3_130 = arith.constant 3 : index
    %c0_131 = arith.constant 0 : index
    %c0_132 = arith.constant 0 : index
    %211 = vector.load %arg4[%c1_129, %c3_130, %c0_131, %c0_132] : memref<5x9x16x16xf32, #tpu.memory_space<vmem>>, vector<1x1x16x16xf32>
    %212 = vector.shape_cast %211 : vector<1x1x16x16xf32> to vector<16x16xf32>
    %cst_133 = arith.constant dense<0.000000e+00> : vector<16x256xf32>
    %213 = tpu.matmul %212, %210, %cst_133 {dimension_numbers = #tpu.dot_dimension_numbers<[1], [0], [0], [1], [0, 0, 1, 1], [], []>} : vector<16x16xf32>, vector<16x256xf32>, vector<16x256xf32> -> vector<16x256xf32>
    %214 = arith.addf %207, %213 : vector<16x256xf32>
    %215 = vector.extract_strided_slice %187 {offsets = [0, 128], sizes = [16, 256], strides = [1, 1]} : vector<16x512xf32> to vector<16x256xf32>
    %c1_134 = arith.constant 1 : index
    %c4_135 = arith.constant 4 : index
    %c0_136 = arith.constant 0 : index
    %c0_137 = arith.constant 0 : index
    %216 = vector.load %arg4[%c1_134, %c4_135, %c0_136, %c0_137] : memref<5x9x16x16xf32, #tpu.memory_space<vmem>>, vector<1x1x16x16xf32>
    %217 = vector.shape_cast %216 : vector<1x1x16x16xf32> to vector<16x16xf32>
    %cst_138 = arith.constant dense<0.000000e+00> : vector<16x256xf32>
    %218 = tpu.matmul %217, %215, %cst_138 {dimension_numbers = #tpu.dot_dimension_numbers<[1], [0], [0], [1], [0, 0, 1, 1], [], []>} : vector<16x16xf32>, vector<16x256xf32>, vector<16x256xf32> -> vector<16x256xf32>
    %219 = arith.addf %214, %218 : vector<16x256xf32>
    %220 = vector.extract_strided_slice %187 {offsets = [0, 129], sizes = [16, 256], strides = [1, 1]} : vector<16x512xf32> to vector<16x256xf32>
    %221 = vector.broadcast %42 : vector<1x256xf32> to vector<16x256xf32>
    %222 = arith.mulf %220, %221 : vector<16x256xf32>
    %c1_139 = arith.constant 1 : index
    %c5_140 = arith.constant 5 : index
    %c0_141 = arith.constant 0 : index
    %c0_142 = arith.constant 0 : index
    %223 = vector.load %arg4[%c1_139, %c5_140, %c0_141, %c0_142] : memref<5x9x16x16xf32, #tpu.memory_space<vmem>>, vector<1x1x16x16xf32>
    %224 = vector.shape_cast %223 : vector<1x1x16x16xf32> to vector<16x16xf32>
    %cst_143 = arith.constant dense<0.000000e+00> : vector<16x256xf32>
    %225 = tpu.matmul %224, %222, %cst_143 {dimension_numbers = #tpu.dot_dimension_numbers<[1], [0], [0], [1], [0, 0, 1, 1], [], []>} : vector<16x16xf32>, vector<16x256xf32>, vector<16x256xf32> -> vector<16x256xf32>
    %226 = arith.addf %219, %225 : vector<16x256xf32>
    %227 = vector.extract_strided_slice %187 {offsets = [0, 143], sizes = [16, 256], strides = [1, 1]} : vector<16x512xf32> to vector<16x256xf32>
    %228 = vector.broadcast %30 : vector<1x256xf32> to vector<16x256xf32>
    %229 = arith.mulf %227, %228 : vector<16x256xf32>
    %c1_144 = arith.constant 1 : index
    %c6_145 = arith.constant 6 : index
    %c0_146 = arith.constant 0 : index
    %c0_147 = arith.constant 0 : index
    %230 = vector.load %arg4[%c1_144, %c6_145, %c0_146, %c0_147] : memref<5x9x16x16xf32, #tpu.memory_space<vmem>>, vector<1x1x16x16xf32>
    %231 = vector.shape_cast %230 : vector<1x1x16x16xf32> to vector<16x16xf32>
    %cst_148 = arith.constant dense<0.000000e+00> : vector<16x256xf32>
    %232 = tpu.matmul %231, %229, %cst_148 {dimension_numbers = #tpu.dot_dimension_numbers<[1], [0], [0], [1], [0, 0, 1, 1], [], []>} : vector<16x16xf32>, vector<16x256xf32>, vector<16x256xf32> -> vector<16x256xf32>
    %233 = arith.addf %226, %232 : vector<16x256xf32>
    %234 = vector.extract_strided_slice %187 {offsets = [0, 144], sizes = [16, 256], strides = [1, 1]} : vector<16x512xf32> to vector<16x256xf32>
    %c1_149 = arith.constant 1 : index
    %c7_150 = arith.constant 7 : index
    %c0_151 = arith.constant 0 : index
    %c0_152 = arith.constant 0 : index
    %235 = vector.load %arg4[%c1_149, %c7_150, %c0_151, %c0_152] : memref<5x9x16x16xf32, #tpu.memory_space<vmem>>, vector<1x1x16x16xf32>
    %236 = vector.shape_cast %235 : vector<1x1x16x16xf32> to vector<16x16xf32>
    %cst_153 = arith.constant dense<0.000000e+00> : vector<16x256xf32>
    %237 = tpu.matmul %236, %234, %cst_153 {dimension_numbers = #tpu.dot_dimension_numbers<[1], [0], [0], [1], [0, 0, 1, 1], [], []>} : vector<16x16xf32>, vector<16x256xf32>, vector<16x256xf32> -> vector<16x256xf32>
    %238 = arith.addf %233, %237 : vector<16x256xf32>
    %239 = vector.extract_strided_slice %187 {offsets = [0, 145], sizes = [16, 256], strides = [1, 1]} : vector<16x512xf32> to vector<16x256xf32>
    %240 = vector.broadcast %42 : vector<1x256xf32> to vector<16x256xf32>
    %241 = arith.mulf %239, %240 : vector<16x256xf32>
    %c1_154 = arith.constant 1 : index
    %c8_155 = arith.constant 8 : index
    %c0_156 = arith.constant 0 : index
    %c0_157 = arith.constant 0 : index
    %242 = vector.load %arg4[%c1_154, %c8_155, %c0_156, %c0_157] : memref<5x9x16x16xf32, #tpu.memory_space<vmem>>, vector<1x1x16x16xf32>
    %243 = vector.shape_cast %242 : vector<1x1x16x16xf32> to vector<16x16xf32>
    %cst_158 = arith.constant dense<0.000000e+00> : vector<16x256xf32>
    %244 = tpu.matmul %243, %241, %cst_158 {dimension_numbers = #tpu.dot_dimension_numbers<[1], [0], [0], [1], [0, 0, 1, 1], [], []>} : vector<16x16xf32>, vector<16x256xf32>, vector<16x256xf32> -> vector<16x256xf32>
    %245 = arith.addf %238, %244 : vector<16x256xf32>
    %246 = vector.broadcast %185 : vector<16x1xf32> to vector<16x256xf32>
    %247 = arith.addf %245, %246 : vector<16x256xf32>
    %cst_159 = arith.constant 0.000000e+00 : f32
    %248 = vector.broadcast %cst_159 : f32 to vector<16x256xf32>
    %249 = arith.maximumf %247, %248 : vector<16x256xf32>
    %c2_160 = arith.constant 2 : index
    %c0_161 = arith.constant 0 : index
    %c0_162 = arith.constant 0 : index
    %250 = vector.load %arg7[%c2_160, %c0_161, %c0_162] : memref<6x16x16xf32, #tpu.memory_space<vmem>>, vector<1x16x16xf32>
    %251 = vector.shape_cast %250 : vector<1x16x16xf32> to vector<16x16xf32>
    %cst_163 = arith.constant dense<0.000000e+00> : vector<16x256xf32>
    %252 = tpu.matmul %251, %249, %cst_163 {dimension_numbers = #tpu.dot_dimension_numbers<[1], [0], [0], [1], [0, 0, 1, 1], [], []>} : vector<16x16xf32>, vector<16x256xf32>, vector<16x256xf32> -> vector<16x256xf32>
    %253 = arith.addf %183, %252 : vector<16x256xf32>
    %c2_164 = arith.constant 2 : index
    %c0_165 = arith.constant 0 : index
    %c0_166 = arith.constant 0 : index
    %254 = vector.load %arg5[%c2_164, %c0_165, %c0_166] : memref<5x16x1xf32, #tpu.memory_space<vmem>>, vector<1x16x1xf32>
    %255 = vector.shape_cast %254 : vector<1x16x1xf32> to vector<16x1xf32>
    %cst_167 = arith.constant 0.000000e+00 : f32
    %256 = vector.broadcast %cst_167 : f32 to vector<16x128xf32>
    %257 = tpu.concatenate %256, %249, %256 in 1 : vector<16x128xf32>, vector<16x256xf32>, vector<16x128xf32> -> vector<16x512xf32>
    %cst_168 = arith.constant 0.000000e+00 : f32
    %258 = vector.broadcast %cst_168 : f32 to vector<16x256xf32>
    %259 = vector.extract_strided_slice %257 {offsets = [0, 111], sizes = [16, 256], strides = [1, 1]} : vector<16x512xf32> to vector<16x256xf32>
    %260 = vector.broadcast %30 : vector<1x256xf32> to vector<16x256xf32>
    %261 = arith.mulf %259, %260 : vector<16x256xf32>
    %c2_169 = arith.constant 2 : index
    %c0_170 = arith.constant 0 : index
    %c0_171 = arith.constant 0 : index
    %c0_172 = arith.constant 0 : index
    %262 = vector.load %arg4[%c2_169, %c0_170, %c0_171, %c0_172] : memref<5x9x16x16xf32, #tpu.memory_space<vmem>>, vector<1x1x16x16xf32>
    %263 = vector.shape_cast %262 : vector<1x1x16x16xf32> to vector<16x16xf32>
    %cst_173 = arith.constant dense<0.000000e+00> : vector<16x256xf32>
    %264 = tpu.matmul %263, %261, %cst_173 {dimension_numbers = #tpu.dot_dimension_numbers<[1], [0], [0], [1], [0, 0, 1, 1], [], []>} : vector<16x16xf32>, vector<16x256xf32>, vector<16x256xf32> -> vector<16x256xf32>
    %265 = arith.addf %258, %264 : vector<16x256xf32>
    %266 = vector.extract_strided_slice %257 {offsets = [0, 112], sizes = [16, 256], strides = [1, 1]} : vector<16x512xf32> to vector<16x256xf32>
    %c2_174 = arith.constant 2 : index
    %c1_175 = arith.constant 1 : index
    %c0_176 = arith.constant 0 : index
    %c0_177 = arith.constant 0 : index
    %267 = vector.load %arg4[%c2_174, %c1_175, %c0_176, %c0_177] : memref<5x9x16x16xf32, #tpu.memory_space<vmem>>, vector<1x1x16x16xf32>
    %268 = vector.shape_cast %267 : vector<1x1x16x16xf32> to vector<16x16xf32>
    %cst_178 = arith.constant dense<0.000000e+00> : vector<16x256xf32>
    %269 = tpu.matmul %268, %266, %cst_178 {dimension_numbers = #tpu.dot_dimension_numbers<[1], [0], [0], [1], [0, 0, 1, 1], [], []>} : vector<16x16xf32>, vector<16x256xf32>, vector<16x256xf32> -> vector<16x256xf32>
    %270 = arith.addf %265, %269 : vector<16x256xf32>
    %271 = vector.extract_strided_slice %257 {offsets = [0, 113], sizes = [16, 256], strides = [1, 1]} : vector<16x512xf32> to vector<16x256xf32>
    %272 = vector.broadcast %42 : vector<1x256xf32> to vector<16x256xf32>
    %273 = arith.mulf %271, %272 : vector<16x256xf32>
    %c2_179 = arith.constant 2 : index
    %c2_180 = arith.constant 2 : index
    %c0_181 = arith.constant 0 : index
    %c0_182 = arith.constant 0 : index
    %274 = vector.load %arg4[%c2_179, %c2_180, %c0_181, %c0_182] : memref<5x9x16x16xf32, #tpu.memory_space<vmem>>, vector<1x1x16x16xf32>
    %275 = vector.shape_cast %274 : vector<1x1x16x16xf32> to vector<16x16xf32>
    %cst_183 = arith.constant dense<0.000000e+00> : vector<16x256xf32>
    %276 = tpu.matmul %275, %273, %cst_183 {dimension_numbers = #tpu.dot_dimension_numbers<[1], [0], [0], [1], [0, 0, 1, 1], [], []>} : vector<16x16xf32>, vector<16x256xf32>, vector<16x256xf32> -> vector<16x256xf32>
    %277 = arith.addf %270, %276 : vector<16x256xf32>
    %278 = vector.extract_strided_slice %257 {offsets = [0, 127], sizes = [16, 256], strides = [1, 1]} : vector<16x512xf32> to vector<16x256xf32>
    %279 = vector.broadcast %30 : vector<1x256xf32> to vector<16x256xf32>
    %280 = arith.mulf %278, %279 : vector<16x256xf32>
    %c2_184 = arith.constant 2 : index
    %c3_185 = arith.constant 3 : index
    %c0_186 = arith.constant 0 : index
    %c0_187 = arith.constant 0 : index
    %281 = vector.load %arg4[%c2_184, %c3_185, %c0_186, %c0_187] : memref<5x9x16x16xf32, #tpu.memory_space<vmem>>, vector<1x1x16x16xf32>
    %282 = vector.shape_cast %281 : vector<1x1x16x16xf32> to vector<16x16xf32>
    %cst_188 = arith.constant dense<0.000000e+00> : vector<16x256xf32>
    %283 = tpu.matmul %282, %280, %cst_188 {dimension_numbers = #tpu.dot_dimension_numbers<[1], [0], [0], [1], [0, 0, 1, 1], [], []>} : vector<16x16xf32>, vector<16x256xf32>, vector<16x256xf32> -> vector<16x256xf32>
    %284 = arith.addf %277, %283 : vector<16x256xf32>
    %285 = vector.extract_strided_slice %257 {offsets = [0, 128], sizes = [16, 256], strides = [1, 1]} : vector<16x512xf32> to vector<16x256xf32>
    %c2_189 = arith.constant 2 : index
    %c4_190 = arith.constant 4 : index
    %c0_191 = arith.constant 0 : index
    %c0_192 = arith.constant 0 : index
    %286 = vector.load %arg4[%c2_189, %c4_190, %c0_191, %c0_192] : memref<5x9x16x16xf32, #tpu.memory_space<vmem>>, vector<1x1x16x16xf32>
    %287 = vector.shape_cast %286 : vector<1x1x16x16xf32> to vector<16x16xf32>
    %cst_193 = arith.constant dense<0.000000e+00> : vector<16x256xf32>
    %288 = tpu.matmul %287, %285, %cst_193 {dimension_numbers = #tpu.dot_dimension_numbers<[1], [0], [0], [1], [0, 0, 1, 1], [], []>} : vector<16x16xf32>, vector<16x256xf32>, vector<16x256xf32> -> vector<16x256xf32>
    %289 = arith.addf %284, %288 : vector<16x256xf32>
    %290 = vector.extract_strided_slice %257 {offsets = [0, 129], sizes = [16, 256], strides = [1, 1]} : vector<16x512xf32> to vector<16x256xf32>
    %291 = vector.broadcast %42 : vector<1x256xf32> to vector<16x256xf32>
    %292 = arith.mulf %290, %291 : vector<16x256xf32>
    %c2_194 = arith.constant 2 : index
    %c5_195 = arith.constant 5 : index
    %c0_196 = arith.constant 0 : index
    %c0_197 = arith.constant 0 : index
    %293 = vector.load %arg4[%c2_194, %c5_195, %c0_196, %c0_197] : memref<5x9x16x16xf32, #tpu.memory_space<vmem>>, vector<1x1x16x16xf32>
    %294 = vector.shape_cast %293 : vector<1x1x16x16xf32> to vector<16x16xf32>
    %cst_198 = arith.constant dense<0.000000e+00> : vector<16x256xf32>
    %295 = tpu.matmul %294, %292, %cst_198 {dimension_numbers = #tpu.dot_dimension_numbers<[1], [0], [0], [1], [0, 0, 1, 1], [], []>} : vector<16x16xf32>, vector<16x256xf32>, vector<16x256xf32> -> vector<16x256xf32>
    %296 = arith.addf %289, %295 : vector<16x256xf32>
    %297 = vector.extract_strided_slice %257 {offsets = [0, 143], sizes = [16, 256], strides = [1, 1]} : vector<16x512xf32> to vector<16x256xf32>
    %298 = vector.broadcast %30 : vector<1x256xf32> to vector<16x256xf32>
    %299 = arith.mulf %297, %298 : vector<16x256xf32>
    %c2_199 = arith.constant 2 : index
    %c6_200 = arith.constant 6 : index
    %c0_201 = arith.constant 0 : index
    %c0_202 = arith.constant 0 : index
    %300 = vector.load %arg4[%c2_199, %c6_200, %c0_201, %c0_202] : memref<5x9x16x16xf32, #tpu.memory_space<vmem>>, vector<1x1x16x16xf32>
    %301 = vector.shape_cast %300 : vector<1x1x16x16xf32> to vector<16x16xf32>
    %cst_203 = arith.constant dense<0.000000e+00> : vector<16x256xf32>
    %302 = tpu.matmul %301, %299, %cst_203 {dimension_numbers = #tpu.dot_dimension_numbers<[1], [0], [0], [1], [0, 0, 1, 1], [], []>} : vector<16x16xf32>, vector<16x256xf32>, vector<16x256xf32> -> vector<16x256xf32>
    %303 = arith.addf %296, %302 : vector<16x256xf32>
    %304 = vector.extract_strided_slice %257 {offsets = [0, 144], sizes = [16, 256], strides = [1, 1]} : vector<16x512xf32> to vector<16x256xf32>
    %c2_204 = arith.constant 2 : index
    %c7_205 = arith.constant 7 : index
    %c0_206 = arith.constant 0 : index
    %c0_207 = arith.constant 0 : index
    %305 = vector.load %arg4[%c2_204, %c7_205, %c0_206, %c0_207] : memref<5x9x16x16xf32, #tpu.memory_space<vmem>>, vector<1x1x16x16xf32>
    %306 = vector.shape_cast %305 : vector<1x1x16x16xf32> to vector<16x16xf32>
    %cst_208 = arith.constant dense<0.000000e+00> : vector<16x256xf32>
    %307 = tpu.matmul %306, %304, %cst_208 {dimension_numbers = #tpu.dot_dimension_numbers<[1], [0], [0], [1], [0, 0, 1, 1], [], []>} : vector<16x16xf32>, vector<16x256xf32>, vector<16x256xf32> -> vector<16x256xf32>
    %308 = arith.addf %303, %307 : vector<16x256xf32>
    %309 = vector.extract_strided_slice %257 {offsets = [0, 145], sizes = [16, 256], strides = [1, 1]} : vector<16x512xf32> to vector<16x256xf32>
    %310 = vector.broadcast %42 : vector<1x256xf32> to vector<16x256xf32>
    %311 = arith.mulf %309, %310 : vector<16x256xf32>
    %c2_209 = arith.constant 2 : index
    %c8_210 = arith.constant 8 : index
    %c0_211 = arith.constant 0 : index
    %c0_212 = arith.constant 0 : index
    %312 = vector.load %arg4[%c2_209, %c8_210, %c0_211, %c0_212] : memref<5x9x16x16xf32, #tpu.memory_space<vmem>>, vector<1x1x16x16xf32>
    %313 = vector.shape_cast %312 : vector<1x1x16x16xf32> to vector<16x16xf32>
    %cst_213 = arith.constant dense<0.000000e+00> : vector<16x256xf32>
    %314 = tpu.matmul %313, %311, %cst_213 {dimension_numbers = #tpu.dot_dimension_numbers<[1], [0], [0], [1], [0, 0, 1, 1], [], []>} : vector<16x16xf32>, vector<16x256xf32>, vector<16x256xf32> -> vector<16x256xf32>
    %315 = arith.addf %308, %314 : vector<16x256xf32>
    %316 = vector.broadcast %255 : vector<16x1xf32> to vector<16x256xf32>
    %317 = arith.addf %315, %316 : vector<16x256xf32>
    %cst_214 = arith.constant 0.000000e+00 : f32
    %318 = vector.broadcast %cst_214 : f32 to vector<16x256xf32>
    %319 = arith.maximumf %317, %318 : vector<16x256xf32>
    %c3_215 = arith.constant 3 : index
    %c0_216 = arith.constant 0 : index
    %c0_217 = arith.constant 0 : index
    %320 = vector.load %arg7[%c3_215, %c0_216, %c0_217] : memref<6x16x16xf32, #tpu.memory_space<vmem>>, vector<1x16x16xf32>
    %321 = vector.shape_cast %320 : vector<1x16x16xf32> to vector<16x16xf32>
    %cst_218 = arith.constant dense<0.000000e+00> : vector<16x256xf32>
    %322 = tpu.matmul %321, %319, %cst_218 {dimension_numbers = #tpu.dot_dimension_numbers<[1], [0], [0], [1], [0, 0, 1, 1], [], []>} : vector<16x16xf32>, vector<16x256xf32>, vector<16x256xf32> -> vector<16x256xf32>
    %323 = arith.addf %253, %322 : vector<16x256xf32>
    %c3_219 = arith.constant 3 : index
    %c0_220 = arith.constant 0 : index
    %c0_221 = arith.constant 0 : index
    %324 = vector.load %arg5[%c3_219, %c0_220, %c0_221] : memref<5x16x1xf32, #tpu.memory_space<vmem>>, vector<1x16x1xf32>
    %325 = vector.shape_cast %324 : vector<1x16x1xf32> to vector<16x1xf32>
    %cst_222 = arith.constant 0.000000e+00 : f32
    %326 = vector.broadcast %cst_222 : f32 to vector<16x128xf32>
    %327 = tpu.concatenate %326, %319, %326 in 1 : vector<16x128xf32>, vector<16x256xf32>, vector<16x128xf32> -> vector<16x512xf32>
    %cst_223 = arith.constant 0.000000e+00 : f32
    %328 = vector.broadcast %cst_223 : f32 to vector<16x256xf32>
    %329 = vector.extract_strided_slice %327 {offsets = [0, 111], sizes = [16, 256], strides = [1, 1]} : vector<16x512xf32> to vector<16x256xf32>
    %330 = vector.broadcast %30 : vector<1x256xf32> to vector<16x256xf32>
    %331 = arith.mulf %329, %330 : vector<16x256xf32>
    %c3_224 = arith.constant 3 : index
    %c0_225 = arith.constant 0 : index
    %c0_226 = arith.constant 0 : index
    %c0_227 = arith.constant 0 : index
    %332 = vector.load %arg4[%c3_224, %c0_225, %c0_226, %c0_227] : memref<5x9x16x16xf32, #tpu.memory_space<vmem>>, vector<1x1x16x16xf32>
    %333 = vector.shape_cast %332 : vector<1x1x16x16xf32> to vector<16x16xf32>
    %cst_228 = arith.constant dense<0.000000e+00> : vector<16x256xf32>
    %334 = tpu.matmul %333, %331, %cst_228 {dimension_numbers = #tpu.dot_dimension_numbers<[1], [0], [0], [1], [0, 0, 1, 1], [], []>} : vector<16x16xf32>, vector<16x256xf32>, vector<16x256xf32> -> vector<16x256xf32>
    %335 = arith.addf %328, %334 : vector<16x256xf32>
    %336 = vector.extract_strided_slice %327 {offsets = [0, 112], sizes = [16, 256], strides = [1, 1]} : vector<16x512xf32> to vector<16x256xf32>
    %c3_229 = arith.constant 3 : index
    %c1_230 = arith.constant 1 : index
    %c0_231 = arith.constant 0 : index
    %c0_232 = arith.constant 0 : index
    %337 = vector.load %arg4[%c3_229, %c1_230, %c0_231, %c0_232] : memref<5x9x16x16xf32, #tpu.memory_space<vmem>>, vector<1x1x16x16xf32>
    %338 = vector.shape_cast %337 : vector<1x1x16x16xf32> to vector<16x16xf32>
    %cst_233 = arith.constant dense<0.000000e+00> : vector<16x256xf32>
    %339 = tpu.matmul %338, %336, %cst_233 {dimension_numbers = #tpu.dot_dimension_numbers<[1], [0], [0], [1], [0, 0, 1, 1], [], []>} : vector<16x16xf32>, vector<16x256xf32>, vector<16x256xf32> -> vector<16x256xf32>
    %340 = arith.addf %335, %339 : vector<16x256xf32>
    %341 = vector.extract_strided_slice %327 {offsets = [0, 113], sizes = [16, 256], strides = [1, 1]} : vector<16x512xf32> to vector<16x256xf32>
    %342 = vector.broadcast %42 : vector<1x256xf32> to vector<16x256xf32>
    %343 = arith.mulf %341, %342 : vector<16x256xf32>
    %c3_234 = arith.constant 3 : index
    %c2_235 = arith.constant 2 : index
    %c0_236 = arith.constant 0 : index
    %c0_237 = arith.constant 0 : index
    %344 = vector.load %arg4[%c3_234, %c2_235, %c0_236, %c0_237] : memref<5x9x16x16xf32, #tpu.memory_space<vmem>>, vector<1x1x16x16xf32>
    %345 = vector.shape_cast %344 : vector<1x1x16x16xf32> to vector<16x16xf32>
    %cst_238 = arith.constant dense<0.000000e+00> : vector<16x256xf32>
    %346 = tpu.matmul %345, %343, %cst_238 {dimension_numbers = #tpu.dot_dimension_numbers<[1], [0], [0], [1], [0, 0, 1, 1], [], []>} : vector<16x16xf32>, vector<16x256xf32>, vector<16x256xf32> -> vector<16x256xf32>
    %347 = arith.addf %340, %346 : vector<16x256xf32>
    %348 = vector.extract_strided_slice %327 {offsets = [0, 127], sizes = [16, 256], strides = [1, 1]} : vector<16x512xf32> to vector<16x256xf32>
    %349 = vector.broadcast %30 : vector<1x256xf32> to vector<16x256xf32>
    %350 = arith.mulf %348, %349 : vector<16x256xf32>
    %c3_239 = arith.constant 3 : index
    %c3_240 = arith.constant 3 : index
    %c0_241 = arith.constant 0 : index
    %c0_242 = arith.constant 0 : index
    %351 = vector.load %arg4[%c3_239, %c3_240, %c0_241, %c0_242] : memref<5x9x16x16xf32, #tpu.memory_space<vmem>>, vector<1x1x16x16xf32>
    %352 = vector.shape_cast %351 : vector<1x1x16x16xf32> to vector<16x16xf32>
    %cst_243 = arith.constant dense<0.000000e+00> : vector<16x256xf32>
    %353 = tpu.matmul %352, %350, %cst_243 {dimension_numbers = #tpu.dot_dimension_numbers<[1], [0], [0], [1], [0, 0, 1, 1], [], []>} : vector<16x16xf32>, vector<16x256xf32>, vector<16x256xf32> -> vector<16x256xf32>
    %354 = arith.addf %347, %353 : vector<16x256xf32>
    %355 = vector.extract_strided_slice %327 {offsets = [0, 128], sizes = [16, 256], strides = [1, 1]} : vector<16x512xf32> to vector<16x256xf32>
    %c3_244 = arith.constant 3 : index
    %c4_245 = arith.constant 4 : index
    %c0_246 = arith.constant 0 : index
    %c0_247 = arith.constant 0 : index
    %356 = vector.load %arg4[%c3_244, %c4_245, %c0_246, %c0_247] : memref<5x9x16x16xf32, #tpu.memory_space<vmem>>, vector<1x1x16x16xf32>
    %357 = vector.shape_cast %356 : vector<1x1x16x16xf32> to vector<16x16xf32>
    %cst_248 = arith.constant dense<0.000000e+00> : vector<16x256xf32>
    %358 = tpu.matmul %357, %355, %cst_248 {dimension_numbers = #tpu.dot_dimension_numbers<[1], [0], [0], [1], [0, 0, 1, 1], [], []>} : vector<16x16xf32>, vector<16x256xf32>, vector<16x256xf32> -> vector<16x256xf32>
    %359 = arith.addf %354, %358 : vector<16x256xf32>
    %360 = vector.extract_strided_slice %327 {offsets = [0, 129], sizes = [16, 256], strides = [1, 1]} : vector<16x512xf32> to vector<16x256xf32>
    %361 = vector.broadcast %42 : vector<1x256xf32> to vector<16x256xf32>
    %362 = arith.mulf %360, %361 : vector<16x256xf32>
    %c3_249 = arith.constant 3 : index
    %c5_250 = arith.constant 5 : index
    %c0_251 = arith.constant 0 : index
    %c0_252 = arith.constant 0 : index
    %363 = vector.load %arg4[%c3_249, %c5_250, %c0_251, %c0_252] : memref<5x9x16x16xf32, #tpu.memory_space<vmem>>, vector<1x1x16x16xf32>
    %364 = vector.shape_cast %363 : vector<1x1x16x16xf32> to vector<16x16xf32>
    %cst_253 = arith.constant dense<0.000000e+00> : vector<16x256xf32>
    %365 = tpu.matmul %364, %362, %cst_253 {dimension_numbers = #tpu.dot_dimension_numbers<[1], [0], [0], [1], [0, 0, 1, 1], [], []>} : vector<16x16xf32>, vector<16x256xf32>, vector<16x256xf32> -> vector<16x256xf32>
    %366 = arith.addf %359, %365 : vector<16x256xf32>
    %367 = vector.extract_strided_slice %327 {offsets = [0, 143], sizes = [16, 256], strides = [1, 1]} : vector<16x512xf32> to vector<16x256xf32>
    %368 = vector.broadcast %30 : vector<1x256xf32> to vector<16x256xf32>
    %369 = arith.mulf %367, %368 : vector<16x256xf32>
    %c3_254 = arith.constant 3 : index
    %c6_255 = arith.constant 6 : index
    %c0_256 = arith.constant 0 : index
    %c0_257 = arith.constant 0 : index
    %370 = vector.load %arg4[%c3_254, %c6_255, %c0_256, %c0_257] : memref<5x9x16x16xf32, #tpu.memory_space<vmem>>, vector<1x1x16x16xf32>
    %371 = vector.shape_cast %370 : vector<1x1x16x16xf32> to vector<16x16xf32>
    %cst_258 = arith.constant dense<0.000000e+00> : vector<16x256xf32>
    %372 = tpu.matmul %371, %369, %cst_258 {dimension_numbers = #tpu.dot_dimension_numbers<[1], [0], [0], [1], [0, 0, 1, 1], [], []>} : vector<16x16xf32>, vector<16x256xf32>, vector<16x256xf32> -> vector<16x256xf32>
    %373 = arith.addf %366, %372 : vector<16x256xf32>
    %374 = vector.extract_strided_slice %327 {offsets = [0, 144], sizes = [16, 256], strides = [1, 1]} : vector<16x512xf32> to vector<16x256xf32>
    %c3_259 = arith.constant 3 : index
    %c7_260 = arith.constant 7 : index
    %c0_261 = arith.constant 0 : index
    %c0_262 = arith.constant 0 : index
    %375 = vector.load %arg4[%c3_259, %c7_260, %c0_261, %c0_262] : memref<5x9x16x16xf32, #tpu.memory_space<vmem>>, vector<1x1x16x16xf32>
    %376 = vector.shape_cast %375 : vector<1x1x16x16xf32> to vector<16x16xf32>
    %cst_263 = arith.constant dense<0.000000e+00> : vector<16x256xf32>
    %377 = tpu.matmul %376, %374, %cst_263 {dimension_numbers = #tpu.dot_dimension_numbers<[1], [0], [0], [1], [0, 0, 1, 1], [], []>} : vector<16x16xf32>, vector<16x256xf32>, vector<16x256xf32> -> vector<16x256xf32>
    %378 = arith.addf %373, %377 : vector<16x256xf32>
    %379 = vector.extract_strided_slice %327 {offsets = [0, 145], sizes = [16, 256], strides = [1, 1]} : vector<16x512xf32> to vector<16x256xf32>
    %380 = vector.broadcast %42 : vector<1x256xf32> to vector<16x256xf32>
    %381 = arith.mulf %379, %380 : vector<16x256xf32>
    %c3_264 = arith.constant 3 : index
    %c8_265 = arith.constant 8 : index
    %c0_266 = arith.constant 0 : index
    %c0_267 = arith.constant 0 : index
    %382 = vector.load %arg4[%c3_264, %c8_265, %c0_266, %c0_267] : memref<5x9x16x16xf32, #tpu.memory_space<vmem>>, vector<1x1x16x16xf32>
    %383 = vector.shape_cast %382 : vector<1x1x16x16xf32> to vector<16x16xf32>
    %cst_268 = arith.constant dense<0.000000e+00> : vector<16x256xf32>
    %384 = tpu.matmul %383, %381, %cst_268 {dimension_numbers = #tpu.dot_dimension_numbers<[1], [0], [0], [1], [0, 0, 1, 1], [], []>} : vector<16x16xf32>, vector<16x256xf32>, vector<16x256xf32> -> vector<16x256xf32>
    %385 = arith.addf %378, %384 : vector<16x256xf32>
    %386 = vector.broadcast %325 : vector<16x1xf32> to vector<16x256xf32>
    %387 = arith.addf %385, %386 : vector<16x256xf32>
    %cst_269 = arith.constant 0.000000e+00 : f32
    %388 = vector.broadcast %cst_269 : f32 to vector<16x256xf32>
    %389 = arith.maximumf %387, %388 : vector<16x256xf32>
    %c4_270 = arith.constant 4 : index
    %c0_271 = arith.constant 0 : index
    %c0_272 = arith.constant 0 : index
    %390 = vector.load %arg7[%c4_270, %c0_271, %c0_272] : memref<6x16x16xf32, #tpu.memory_space<vmem>>, vector<1x16x16xf32>
    %391 = vector.shape_cast %390 : vector<1x16x16xf32> to vector<16x16xf32>
    %cst_273 = arith.constant dense<0.000000e+00> : vector<16x256xf32>
    %392 = tpu.matmul %391, %389, %cst_273 {dimension_numbers = #tpu.dot_dimension_numbers<[1], [0], [0], [1], [0, 0, 1, 1], [], []>} : vector<16x16xf32>, vector<16x256xf32>, vector<16x256xf32> -> vector<16x256xf32>
    %393 = arith.addf %323, %392 : vector<16x256xf32>
    %c4_274 = arith.constant 4 : index
    %c0_275 = arith.constant 0 : index
    %c0_276 = arith.constant 0 : index
    %394 = vector.load %arg5[%c4_274, %c0_275, %c0_276] : memref<5x16x1xf32, #tpu.memory_space<vmem>>, vector<1x16x1xf32>
    %395 = vector.shape_cast %394 : vector<1x16x1xf32> to vector<16x1xf32>
    %cst_277 = arith.constant 0.000000e+00 : f32
    %396 = vector.broadcast %cst_277 : f32 to vector<16x128xf32>
    %397 = tpu.concatenate %396, %389, %396 in 1 : vector<16x128xf32>, vector<16x256xf32>, vector<16x128xf32> -> vector<16x512xf32>
    %cst_278 = arith.constant 0.000000e+00 : f32
    %398 = vector.broadcast %cst_278 : f32 to vector<16x256xf32>
    %399 = vector.extract_strided_slice %397 {offsets = [0, 111], sizes = [16, 256], strides = [1, 1]} : vector<16x512xf32> to vector<16x256xf32>
    %400 = vector.broadcast %30 : vector<1x256xf32> to vector<16x256xf32>
    %401 = arith.mulf %399, %400 : vector<16x256xf32>
    %c4_279 = arith.constant 4 : index
    %c0_280 = arith.constant 0 : index
    %c0_281 = arith.constant 0 : index
    %c0_282 = arith.constant 0 : index
    %402 = vector.load %arg4[%c4_279, %c0_280, %c0_281, %c0_282] : memref<5x9x16x16xf32, #tpu.memory_space<vmem>>, vector<1x1x16x16xf32>
    %403 = vector.shape_cast %402 : vector<1x1x16x16xf32> to vector<16x16xf32>
    %cst_283 = arith.constant dense<0.000000e+00> : vector<16x256xf32>
    %404 = tpu.matmul %403, %401, %cst_283 {dimension_numbers = #tpu.dot_dimension_numbers<[1], [0], [0], [1], [0, 0, 1, 1], [], []>} : vector<16x16xf32>, vector<16x256xf32>, vector<16x256xf32> -> vector<16x256xf32>
    %405 = arith.addf %398, %404 : vector<16x256xf32>
    %406 = vector.extract_strided_slice %397 {offsets = [0, 112], sizes = [16, 256], strides = [1, 1]} : vector<16x512xf32> to vector<16x256xf32>
    %c4_284 = arith.constant 4 : index
    %c1_285 = arith.constant 1 : index
    %c0_286 = arith.constant 0 : index
    %c0_287 = arith.constant 0 : index
    %407 = vector.load %arg4[%c4_284, %c1_285, %c0_286, %c0_287] : memref<5x9x16x16xf32, #tpu.memory_space<vmem>>, vector<1x1x16x16xf32>
    %408 = vector.shape_cast %407 : vector<1x1x16x16xf32> to vector<16x16xf32>
    %cst_288 = arith.constant dense<0.000000e+00> : vector<16x256xf32>
    %409 = tpu.matmul %408, %406, %cst_288 {dimension_numbers = #tpu.dot_dimension_numbers<[1], [0], [0], [1], [0, 0, 1, 1], [], []>} : vector<16x16xf32>, vector<16x256xf32>, vector<16x256xf32> -> vector<16x256xf32>
    %410 = arith.addf %405, %409 : vector<16x256xf32>
    %411 = vector.extract_strided_slice %397 {offsets = [0, 113], sizes = [16, 256], strides = [1, 1]} : vector<16x512xf32> to vector<16x256xf32>
    %412 = vector.broadcast %42 : vector<1x256xf32> to vector<16x256xf32>
    %413 = arith.mulf %411, %412 : vector<16x256xf32>
    %c4_289 = arith.constant 4 : index
    %c2_290 = arith.constant 2 : index
    %c0_291 = arith.constant 0 : index
    %c0_292 = arith.constant 0 : index
    %414 = vector.load %arg4[%c4_289, %c2_290, %c0_291, %c0_292] : memref<5x9x16x16xf32, #tpu.memory_space<vmem>>, vector<1x1x16x16xf32>
    %415 = vector.shape_cast %414 : vector<1x1x16x16xf32> to vector<16x16xf32>
    %cst_293 = arith.constant dense<0.000000e+00> : vector<16x256xf32>
    %416 = tpu.matmul %415, %413, %cst_293 {dimension_numbers = #tpu.dot_dimension_numbers<[1], [0], [0], [1], [0, 0, 1, 1], [], []>} : vector<16x16xf32>, vector<16x256xf32>, vector<16x256xf32> -> vector<16x256xf32>
    %417 = arith.addf %410, %416 : vector<16x256xf32>
    %418 = vector.extract_strided_slice %397 {offsets = [0, 127], sizes = [16, 256], strides = [1, 1]} : vector<16x512xf32> to vector<16x256xf32>
    %419 = vector.broadcast %30 : vector<1x256xf32> to vector<16x256xf32>
    %420 = arith.mulf %418, %419 : vector<16x256xf32>
    %c4_294 = arith.constant 4 : index
    %c3_295 = arith.constant 3 : index
    %c0_296 = arith.constant 0 : index
    %c0_297 = arith.constant 0 : index
    %421 = vector.load %arg4[%c4_294, %c3_295, %c0_296, %c0_297] : memref<5x9x16x16xf32, #tpu.memory_space<vmem>>, vector<1x1x16x16xf32>
    %422 = vector.shape_cast %421 : vector<1x1x16x16xf32> to vector<16x16xf32>
    %cst_298 = arith.constant dense<0.000000e+00> : vector<16x256xf32>
    %423 = tpu.matmul %422, %420, %cst_298 {dimension_numbers = #tpu.dot_dimension_numbers<[1], [0], [0], [1], [0, 0, 1, 1], [], []>} : vector<16x16xf32>, vector<16x256xf32>, vector<16x256xf32> -> vector<16x256xf32>
    %424 = arith.addf %417, %423 : vector<16x256xf32>
    %425 = vector.extract_strided_slice %397 {offsets = [0, 128], sizes = [16, 256], strides = [1, 1]} : vector<16x512xf32> to vector<16x256xf32>
    %c4_299 = arith.constant 4 : index
    %c4_300 = arith.constant 4 : index
    %c0_301 = arith.constant 0 : index
    %c0_302 = arith.constant 0 : index
    %426 = vector.load %arg4[%c4_299, %c4_300, %c0_301, %c0_302] : memref<5x9x16x16xf32, #tpu.memory_space<vmem>>, vector<1x1x16x16xf32>
    %427 = vector.shape_cast %426 : vector<1x1x16x16xf32> to vector<16x16xf32>
    %cst_303 = arith.constant dense<0.000000e+00> : vector<16x256xf32>
    %428 = tpu.matmul %427, %425, %cst_303 {dimension_numbers = #tpu.dot_dimension_numbers<[1], [0], [0], [1], [0, 0, 1, 1], [], []>} : vector<16x16xf32>, vector<16x256xf32>, vector<16x256xf32> -> vector<16x256xf32>
    %429 = arith.addf %424, %428 : vector<16x256xf32>
    %430 = vector.extract_strided_slice %397 {offsets = [0, 129], sizes = [16, 256], strides = [1, 1]} : vector<16x512xf32> to vector<16x256xf32>
    %431 = vector.broadcast %42 : vector<1x256xf32> to vector<16x256xf32>
    %432 = arith.mulf %430, %431 : vector<16x256xf32>
    %c4_304 = arith.constant 4 : index
    %c5_305 = arith.constant 5 : index
    %c0_306 = arith.constant 0 : index
    %c0_307 = arith.constant 0 : index
    %433 = vector.load %arg4[%c4_304, %c5_305, %c0_306, %c0_307] : memref<5x9x16x16xf32, #tpu.memory_space<vmem>>, vector<1x1x16x16xf32>
    %434 = vector.shape_cast %433 : vector<1x1x16x16xf32> to vector<16x16xf32>
    %cst_308 = arith.constant dense<0.000000e+00> : vector<16x256xf32>
    %435 = tpu.matmul %434, %432, %cst_308 {dimension_numbers = #tpu.dot_dimension_numbers<[1], [0], [0], [1], [0, 0, 1, 1], [], []>} : vector<16x16xf32>, vector<16x256xf32>, vector<16x256xf32> -> vector<16x256xf32>
    %436 = arith.addf %429, %435 : vector<16x256xf32>
    %437 = vector.extract_strided_slice %397 {offsets = [0, 143], sizes = [16, 256], strides = [1, 1]} : vector<16x512xf32> to vector<16x256xf32>
    %438 = vector.broadcast %30 : vector<1x256xf32> to vector<16x256xf32>
    %439 = arith.mulf %437, %438 : vector<16x256xf32>
    %c4_309 = arith.constant 4 : index
    %c6_310 = arith.constant 6 : index
    %c0_311 = arith.constant 0 : index
    %c0_312 = arith.constant 0 : index
    %440 = vector.load %arg4[%c4_309, %c6_310, %c0_311, %c0_312] : memref<5x9x16x16xf32, #tpu.memory_space<vmem>>, vector<1x1x16x16xf32>
    %441 = vector.shape_cast %440 : vector<1x1x16x16xf32> to vector<16x16xf32>
    %cst_313 = arith.constant dense<0.000000e+00> : vector<16x256xf32>
    %442 = tpu.matmul %441, %439, %cst_313 {dimension_numbers = #tpu.dot_dimension_numbers<[1], [0], [0], [1], [0, 0, 1, 1], [], []>} : vector<16x16xf32>, vector<16x256xf32>, vector<16x256xf32> -> vector<16x256xf32>
    %443 = arith.addf %436, %442 : vector<16x256xf32>
    %444 = vector.extract_strided_slice %397 {offsets = [0, 144], sizes = [16, 256], strides = [1, 1]} : vector<16x512xf32> to vector<16x256xf32>
    %c4_314 = arith.constant 4 : index
    %c7_315 = arith.constant 7 : index
    %c0_316 = arith.constant 0 : index
    %c0_317 = arith.constant 0 : index
    %445 = vector.load %arg4[%c4_314, %c7_315, %c0_316, %c0_317] : memref<5x9x16x16xf32, #tpu.memory_space<vmem>>, vector<1x1x16x16xf32>
    %446 = vector.shape_cast %445 : vector<1x1x16x16xf32> to vector<16x16xf32>
    %cst_318 = arith.constant dense<0.000000e+00> : vector<16x256xf32>
    %447 = tpu.matmul %446, %444, %cst_318 {dimension_numbers = #tpu.dot_dimension_numbers<[1], [0], [0], [1], [0, 0, 1, 1], [], []>} : vector<16x16xf32>, vector<16x256xf32>, vector<16x256xf32> -> vector<16x256xf32>
    %448 = arith.addf %443, %447 : vector<16x256xf32>
    %449 = vector.extract_strided_slice %397 {offsets = [0, 145], sizes = [16, 256], strides = [1, 1]} : vector<16x512xf32> to vector<16x256xf32>
    %450 = vector.broadcast %42 : vector<1x256xf32> to vector<16x256xf32>
    %451 = arith.mulf %449, %450 : vector<16x256xf32>
    %c4_319 = arith.constant 4 : index
    %c8_320 = arith.constant 8 : index
    %c0_321 = arith.constant 0 : index
    %c0_322 = arith.constant 0 : index
    %452 = vector.load %arg4[%c4_319, %c8_320, %c0_321, %c0_322] : memref<5x9x16x16xf32, #tpu.memory_space<vmem>>, vector<1x1x16x16xf32>
    %453 = vector.shape_cast %452 : vector<1x1x16x16xf32> to vector<16x16xf32>
    %cst_323 = arith.constant dense<0.000000e+00> : vector<16x256xf32>
    %454 = tpu.matmul %453, %451, %cst_323 {dimension_numbers = #tpu.dot_dimension_numbers<[1], [0], [0], [1], [0, 0, 1, 1], [], []>} : vector<16x16xf32>, vector<16x256xf32>, vector<16x256xf32> -> vector<16x256xf32>
    %455 = arith.addf %448, %454 : vector<16x256xf32>
    %456 = vector.broadcast %395 : vector<16x1xf32> to vector<16x256xf32>
    %457 = arith.addf %455, %456 : vector<16x256xf32>
    %cst_324 = arith.constant 0.000000e+00 : f32
    %458 = vector.broadcast %cst_324 : f32 to vector<16x256xf32>
    %459 = arith.maximumf %457, %458 : vector<16x256xf32>
    %c5_325 = arith.constant 5 : index
    %c0_326 = arith.constant 0 : index
    %c0_327 = arith.constant 0 : index
    %460 = vector.load %arg7[%c5_325, %c0_326, %c0_327] : memref<6x16x16xf32, #tpu.memory_space<vmem>>, vector<1x16x16xf32>
    %461 = vector.shape_cast %460 : vector<1x16x16xf32> to vector<16x16xf32>
    %cst_328 = arith.constant dense<0.000000e+00> : vector<16x256xf32>
    %462 = tpu.matmul %461, %459, %cst_328 {dimension_numbers = #tpu.dot_dimension_numbers<[1], [0], [0], [1], [0, 0, 1, 1], [], []>} : vector<16x16xf32>, vector<16x256xf32>, vector<16x256xf32> -> vector<16x256xf32>
    %463 = arith.addf %393, %462 : vector<16x256xf32>
    %c0_329 = arith.constant 0 : index
    %c0_330 = arith.constant 0 : index
    %464 = vector.load %arg8[%c0_329, %c0_330] : memref<16x1xf32, #tpu.memory_space<vmem>>, vector<16x1xf32>
    %465 = vector.broadcast %464 : vector<16x1xf32> to vector<16x256xf32>
    %466 = arith.addf %463, %465 : vector<16x256xf32>
    %cst_331 = arith.constant 0.000000e+00 : f32
    %467 = vector.broadcast %cst_331 : f32 to vector<16x256xf32>
    %468 = arith.maximumf %466, %467 : vector<16x256xf32>
    %c0_332 = arith.constant 0 : index
    %c0_333 = arith.constant 0 : index
    %469 = vector.load %arg9[%c0_332, %c0_333] : memref<32x16xf32, #tpu.memory_space<vmem>>, vector<32x16xf32>
    %cst_334 = arith.constant dense<0.000000e+00> : vector<32x256xf32>
    %470 = tpu.matmul %469, %468, %cst_334 {dimension_numbers = #tpu.dot_dimension_numbers<[1], [0], [0], [1], [0, 0, 1, 1], [], []>} : vector<32x16xf32>, vector<16x256xf32>, vector<32x256xf32> -> vector<32x256xf32>
    %c0_335 = arith.constant 0 : index
    %c0_336 = arith.constant 0 : index
    %471 = vector.load %arg10[%c0_335, %c0_336] : memref<32x1xf32, #tpu.memory_space<vmem>>, vector<32x1xf32>
    %472 = vector.broadcast %471 : vector<32x1xf32> to vector<32x256xf32>
    %473 = arith.addf %470, %472 : vector<32x256xf32>
    %cst_337 = arith.constant 0.000000e+00 : f32
    %474 = vector.broadcast %cst_337 : f32 to vector<32x256xf32>
    %475 = arith.maximumf %473, %474 : vector<32x256xf32>
    %c0_338 = arith.constant 0 : index
    %c0_339 = arith.constant 0 : index
    %c0_340 = arith.constant 0 : index
    %476 = vector.load %arg11[%c0_338, %c0_339, %c0_340] : memref<1x32x256xf32, #tpu.memory_space<vmem>>, vector<1x32x256xf32>
    %477 = vector.shape_cast %476 : vector<1x32x256xf32> to vector<32x256xf32>
    %478 = vector.shape_cast %475 : vector<32x256xf32> to vector<1x32x256xf32>
    tpu.vector_store %arg11[%c0_338, %c0_339, %c0_340], %478 {strides = array<i32>} : memref<1x32x256xf32, #tpu.memory_space<vmem>>, vector<1x32x256xf32>,
    return
  }
  func.func @transform_0(%arg0: i32) -> (i32, i32, i32) {
    %c0_i32 = arith.constant 0 : i32
    %c0_i32_0 = arith.constant 0 : i32
    %c0_i32_1 = arith.constant 0 : i32
    return %arg0, %c0_i32, %c0_i32_0 : i32, i32, i32
  }
  func.func @transform_1(%arg0: i32) -> (i32, i32, i32) {
    %c0_i32 = arith.constant 0 : i32
    %c0_i32_0 = arith.constant 0 : i32
    %c0_i32_1 = arith.constant 0 : i32
    %c0_i32_2 = arith.constant 0 : i32
    return %c0_i32, %c0_i32_0, %c0_i32_1 : i32, i32, i32
  }
  func.func @transform_2(%arg0: i32) -> (i32, i32) {
    %c0_i32 = arith.constant 0 : i32
    %c0_i32_0 = arith.constant 0 : i32
    %c0_i32_1 = arith.constant 0 : i32
    return %c0_i32, %c0_i32_0 : i32, i32
  }
  func.func @transform_3(%arg0: i32) -> (i32, i32, i32, i32) {
    %c0_i32 = arith.constant 0 : i32
    %c0_i32_0 = arith.constant 0 : i32
    %c0_i32_1 = arith.constant 0 : i32
    %c0_i32_2 = arith.constant 0 : i32
    %c0_i32_3 = arith.constant 0 : i32
    return %c0_i32, %c0_i32_0, %c0_i32_1, %c0_i32_2 : i32, i32, i32, i32
  }
  func.func @transform_4(%arg0: i32) -> (i32, i32, i32) {
    %c0_i32 = arith.constant 0 : i32
    %c0_i32_0 = arith.constant 0 : i32
    %c0_i32_1 = arith.constant 0 : i32
    %c0_i32_2 = arith.constant 0 : i32
    return %c0_i32, %c0_i32_0, %c0_i32_1 : i32, i32, i32
  }
  func.func @transform_5(%arg0: i32) -> (i32, i32) {
    %c0_i32 = arith.constant 0 : i32
    %c0_i32_0 = arith.constant 0 : i32
    %c0_i32_1 = arith.constant 0 : i32
    return %c0_i32, %c0_i32_0 : i32, i32
  }
  func.func @transform_6(%arg0: i32) -> (i32, i32, i32) {
    %c0_i32 = arith.constant 0 : i32
    %c0_i32_0 = arith.constant 0 : i32
    %c0_i32_1 = arith.constant 0 : i32
    %c0_i32_2 = arith.constant 0 : i32
    return %c0_i32, %c0_i32_0, %c0_i32_1 : i32, i32, i32
  }
  func.func @transform_7(%arg0: i32) -> (i32, i32) {
    %c0_i32 = arith.constant 0 : i32
    %c0_i32_0 = arith.constant 0 : i32
    %c0_i32_1 = arith.constant 0 : i32
    return %c0_i32, %c0_i32_0 : i32, i32
  }
  func.func @transform_8(%arg0: i32) -> (i32, i32) {
    %c0_i32 = arith.constant 0 : i32
    %c0_i32_0 = arith.constant 0 : i32
    %c0_i32_1 = arith.constant 0 : i32
    return %c0_i32, %c0_i32_0 : i32, i32
  }
  func.func @transform_9(%arg0: i32) -> (i32, i32) {
    %c0_i32 = arith.constant 0 : i32
    %c0_i32_0 = arith.constant 0 : i32
    %c0_i32_1 = arith.constant 0 : i32
    return %c0_i32, %c0_i32_0 : i32, i32
  }
  func.func @transform_10(%arg0: i32) -> (i32, i32, i32) {
    %c0_i32 = arith.constant 0 : i32
    %c0_i32_0 = arith.constant 0 : i32
    %c0_i32_1 = arith.constant 0 : i32
    return %arg0, %c0_i32, %c0_i32_0 : i32, i32, i32
  }
}

</mosaic_0001>

<bundles_post_ra>
// kernel: tpu_custom_call.1
= control target key start
LH: loop header
LB: loop body
LE: loop exit
PB: predicated region body
PF: predicated region fallthrough
CT: control target
= control target key end

     0   :  { %s9749_s0 = inlined_call_operand.hbm [shape: f32[2,16,256], index: 0, kind: input, shape index: {}]   ;;  %s9750_s1 = inlined_call_operand.vmem [shape: f32[9,16,16], index: 1, kind: input, shape index: {}]   ;;  %s9751_s2 = inlined_call_operand.vmem [shape: f32[16,1], index: 2, kind: input, shape index: {}]   ;;  %s9752_s3 = inlined_call_operand.hbm [shape: f32[5,9,16,16], index: 3, kind: input, shape index: {}]   ;;  %s9753_s4 = inlined_call_operand.vmem [shape: f32[5,16,1], index: 4, kind: input, shape index: {}]   ;;  %s9754_s5 = inlined_call_operand.vmem [shape: f32[16,16], index: 5, kind: input, shape index: {}]   ;;  %s9755_s6 = inlined_call_operand.hbm [shape: f32[6,16,16], index: 6, kind: input, shape index: {}]   ;;  %s9756_s7 = inlined_call_operand.vmem [shape: f32[16,1], index: 7, kind: input, shape index: {}]   ;;  %s9757_s8 = inlined_call_operand.vmem [shape: f32[32,16], index: 8, kind: input, shape index: {}]   ;;  %s9758_s9 = inlined_call_operand.vmem [shape: f32[32,1], index: 9, kind: input, shape index: {}]   ;;  %s9759_s10 = inlined_call_operand.hbm [shape: f32[2,32,256], index: 10, kind: output, shape index: {}]  }
   0x1   :  { %9765 = sst [smem:[#allocation14_spill]] %s9752_s3 }
   0x2   :  { %9766 = sst [smem:[#allocation15_spill]] %s9755_s6 }
   0x3   :  { %15 = vsyncpa [#allocation3], 0 }
   0x4   :  { %17 = vsyncpa [#allocation3 + $0x1], 0 }
   0x5   :  { %18 = vsyncpa [#allocation6], 0 }
   0x6   :  { %19 = vsyncpa [#allocation4], 0 }
   0x7   :  { %21 = vsyncpa [#allocation4 + $0x1], 0  ;;  %s7964_s13 = smov 0   ;;  %s7966_s14 = smov 0  }
   0x8   :  { %s7968_s15 = smov 0   ;;  %s7970_s16 = smov 0  }
   0x9 LB: > { %9767 = sst [smem:[#allocation12_spill]] %s7884_s15  ;;  %s7985_s17 = sadd.s32 4294967295, %s7888_s16   ;;  %s7888_s16 = sphi %s7970_s16, %s9789_s16   ;;  %s7884_s15 = sphi %s7968_s15, %s9786_s15   ;;  %s7880_s14 = sphi %s7966_s14, %s9788_s14   ;;  %s7876_s13 = sphi %s7964_s13, %s9787_s13  }
   0xa   : > { %s7452_s18 = sadd.s32 4294967294, %s7888_s16   ;;  %p47_p0 = scmp.ne.s32.totalorder %s7880_s14, %s7876_s13 }
   0xb   : > { %p9760_p1 = scmp.eq.s32.totalorder %s7985_s17, 0  ;;  %p266_p3 = scmp.eq.s32.totalorder %s7452_s18, 1 }
   0xc   : > { %p7453_p5 = scmp.ge.s32.totalorder %s7888_s16, 1  ;;  %p273_p7 = scmp.lt.s32.totalorder %s7888_s16, 3 }
   0xd   : > { %p7994_p4 = por %p9760_p1, %p47_p0  ;;  %p7999_p6 = por %p266_p3, %p47_p0 }
   0xe   : > { %p8004_p8 = pnand %p7453_p5, %p273_p7  ;;  %s7890_s22 = smov [#allocation5]  }
   0xf   : > { %s9768_s19 = scalar_select %p7994_p4, 1, 0 }
  0x10   : > { %s9769_s20 = scalar_select %p7999_p6, 1, 0 }
  0x11   : > { %s9770_s21 = scalar_select %p8004_p8, 1, 0 }
  0x12   : > { %s291_s23 = sshll.u32 %s7890_s22, 4  ;;  %p7638_p9 = pneg %p8004_p8  ;;  %s292_s23 = int_to_ptr.vmem [resolvable:$true] %s291_s23 }
  0x13   : > { %s7891_s25 = smov [#allocation7]   ;;  %s7751_s27 = scalar_lea.vmem %s292_s23, 11520 }
  0x14   : > { %p8013_p11 = pnand %p7638_p9, %p9760_p1  ;;  %s310_s26 = sshll.u32 %s7891_s25, 4  ;;  %s311_s26 = int_to_ptr.vmem [resolvable:$true] %s310_s26 }
  0x15   : > { %p7752_p13 = scmp.ne.s32.totalorder %s292_s23, %s7751_s27  ;;  %p7759_p5 = scmp.lt.s32.totalorder %s292_s23, %s292_s23 }
  0x16   : > { %p7742_p12 = pneg %p8013_p11  ;;  %p7760_p7 = scmp.lt.s32.totalorder %s7751_s27, %s7751_s27 }
  0x18   : > { %p7754_p0 = pnand %p7752_p13, %p7742_p12  ;;  %p7761_p10 = por %p7760_p7, %p7759_p5 }
  0x1a   : > { %p7755_p3 = pneg %p7754_p0 }
  0x1c   : > { %p7762_p9 = pnand %p7761_p10, %p7755_p3 }
  0x1e   : > { %7765 = shalt.err (!%p7762_p9)
}
  0x1f   : > { %s7892_s28 = smov 128   ;;  %s7893_s29 = smov 8  }
  0x20   : > { %s9772_s3 = sld [smem:[#allocation14_spill]]  ;;  %s7777_s12 = scalar_lea.vmem %s311_s26, 1536 }
  0x21   : > { %p7778_p1 = scmp.ne.s32.totalorder %s311_s26, %s7777_s12  ;;  %p7785_p2 = scmp.lt.s32.totalorder %s311_s26, %s311_s26 }
  0x22   : > { %p7786_p6 = scmp.lt.s32.totalorder %s7777_s12, %s7777_s12 }
  0x23   : > { %p7780_p13 = pnand %p7778_p1, %p7742_p12 }
  0x24   : > { %p7787_p5 = por %p7786_p6, %p7785_p2 }
  0x25   : > { %p7781_p0 = pneg %p7780_p13 }
  0x26   : > { %7641 = dma.hbm_to_vmem [thread:$0]  (!%p8013_p11), %s9772_s3, 11520, %s292_s23, [#allocation6], %s7892_s28, %s7892_s28, %s7893_s29  }
  0x27   : > { %p7788_p10 = pnand %p7787_p5, %p7781_p0 }
  0x29   : > { %7791 = shalt.err (!%p7788_p10)
}
  0x2a   : > { %s9773_s6 = sld [smem:[#allocation15_spill]]  ;;  %s8036_s23 = sadd.s32 1, %s7888_s16  }
  0x2b   : > { %s34_s25 = sadd.s32 1, %s7884_s15  ;;  %s31_s24 = ssub.s32 %s7888_s16, %s8036_s23 }
  0x2c   : > { %p41_p1 = scmp.ne.s32.totalorder %s7884_s15, %s7880_s14  ;;  %p32_p2 = scmp.eq.s32.totalorder %s31_s24, 0 }
  0x2d   : > { %p42_p6 = scmp.eq.s32.totalorder %s7888_s16, 0  ;;  %p9774_p12 = scmp.eq.s32.totalorder %s7985_s17, 1 }
  0x2e   : > { %p7655_p7 = scmp.lt.s32.totalorder %s7888_s16, 2  ;;  %s333_s11 = sand.u32 1, %s7884_s15  }
  0x2f   : > { %p8046_p3 = por %p9774_p12, %p41_p1  ;;  %p43_p9 = por %p42_p6, %p41_p1 }
  0x30   : > { %7644 = dma.hbm_to_vmem [thread:$0]  (!%p8013_p11), %s9773_s6, 1536, %s311_s26, [#allocation6], %s7892_s28, %s7892_s28, %s7893_s29  }
  0x31   : > { %s9775_s27 = scalar_select %p8046_p3, 1, 0 }
  0x32   : > { %s8052_s30 = scalar_select %p32_p2, %s7884_s15, %s34_s25  }
  0x33   : > { %s7457_s12 = sshll.u32 %s333_s11, 5  ;;  %s7620_s26 = sshll.u32 %s7888_s16, 9 }
  0x34   : > { %9776 = sst [smem:[#allocation13_spill]] %s8052_s30  ;;  %s8059_s18 = scalar_lea.hbm %s9749_s0, %s7620_s26 }
  0x35   : > { %s337_s22 = scalar_lea.vmem [#allocation2], %s7457_s12  ;;  %p8063_p11 = pnand %p7655_p7, %p43_p9 }
  0x36   : > { %s344_s24 = sshll.u32 %s337_s22, 4  ;;  %s8067_s25 = scalar_lea.sflag [#allocation3], %s333_s11  ;;  %s8061_s24 = int_to_ptr.vmem [resolvable:$true] %s344_s24 }
  0x37   : > { %s7792_s6 = scalar_lea.hbm %s8059_s18, 512  ;;  %p7794_p0 = pneg %p8063_p11 }
  0x38   : > { %p7793_p13 = scmp.ne.s32.totalorder %s8059_s18, %s7792_s6  ;;  %s7797_s12 = scalar_lea.hbm %s9749_s0, 1024 }
  0x39   : > { %p7798_p1 = scmp.lt.s32.totalorder %s8059_s18, %s9749_s0  ;;  %p7799_p2 = scmp.lt.s32.totalorder %s7797_s12, %s7792_s6 }
  0x3a   : > { %p7795_p5 = pnand %p7794_p0, %p7793_p13 }
  0x3b   : > { %p7800_p6 = por %p7799_p2, %p7798_p1 }
  0x3c   : > { %p7796_p10 = pneg %p7795_p5 }
  0x3e   : > { %p7801_p12 = pnand %p7800_p6, %p7796_p10 }
  0x40   : > { %7804 = shalt.err (!%p7801_p12)
}
  0x41   : > { %s7805_s11 = scalar_lea.vmem %s8061_s24, 512  ;;  %s7894_s30 = smov [#allocation2]  }
  0x42   : > { %p7806_p7 = scmp.ne.s32.totalorder %s8061_s24, %s7805_s11  ;;  %s7810_s15 = sshll.u32 %s7894_s30, 4  ;;  %s7811_s15 = int_to_ptr.vmem [resolvable:$false] %s7810_s15 }
  0x43   : > { %s7812_s26 = scalar_lea.vmem %s7811_s15, 1024  ;;  %p7813_p5 = scmp.lt.s32.totalorder %s8061_s24, %s7811_s15 }
  0x44   : > { %p7808_p9 = pnand %p7806_p7, %p7794_p0  ;;  %p7814_p3 = scmp.lt.s32.totalorder %s7812_s26, %s7805_s11 }
  0x46   : > { %p7809_p13 = pneg %p7808_p9  ;;  %p7815_p4 = por %p7814_p3, %p7813_p5 }
  0x48   : > { %p7816_p8 = pnand %p7815_p4, %p7809_p13 }
  0x4a   : > { %7819 = shalt.err (!%p7816_p8)
}
  0x4b   : > { %s7895_s6 = smov 256   ;;  %s7896_s28 = smov 16  }
  0x4c   : > { %7648 = dma.hbm_to_vmem [thread:$0]  (!%p8063_p11), %s8059_s18, 512, %s8061_s24, %s8067_s25, %s7895_s6, %s7895_s6, %s7896_s28  }
  0x4d   : > { %p9778_p0 = scmp.ne.s32.totalorder %s9770_s21, 0 }
  0x4e   : > { %s8091_s30 = sand.u32 (!%p9778_p0), 1, %s7880_s14   ;;  %p9779_p4 = scmp.ne.s32.totalorder (!%p9778_p0), %s9768_s19, 0 }
  0x4f   : > { %356 = sbr.rel (%p9778_p0) target bundleno = 2948 (0xb84), region = 60  ;;  %s7461_s15 = sshll.u32 (!%p9778_p0), %s8091_s30, 5 }
  0x50   : > { %s359_s12 = scalar_lea.sflag (!%p9778_p0), [#allocation3], %s8091_s30  ;;  %s8095_s29 = scalar_lea.vmem (!%p9778_p0), [#allocation2], %s7461_s15 }
  0x54   : > { %7863 = dma.done.wait (%p9779_p4), %s359_s12, 512  }
  0x55   : > { %7865 = vsyncadd (%p9779_p4), %s359_s12, 4294966784  ;;  %p9780_p8 = scmp.eq.s32.totalorder %s7985_s17, 0 }
  0x57   : > { %7867 = dma.done.wait (%p9780_p8), [#allocation6], 13056   ;;  %p9781_p3 = pmov %p9780_p8 }
  0x58   : > { %v411_v0 = vlaneseq  ;;  %v7897_v1 = vmov 0.0   ;;  %v8108_v8 = vld [vmem:[%s8095_s29 + $0x18] sm:$0xff]  ;;  %s7898_s3 = smov 16   ;;  %s7899_s19 = smov 111   ;;  %v8121_v17 = vld [vmem:[%s8095_s29 + $0x10] sm:$0xff]  ;;  %v8127_v18 = vld [vmem:[%s8095_s29] sm:$0xff] }
  0x59   : > { %7869 = vsyncadd (%p9781_p3), [#allocation6], 4294954240  ;;  %577 = vmatprep.mubr.f32.mxu0 %v7897_v1  ;;  %690 = vmatprep.mubr.f32.mxu1 %v7897_v1  ;;  %s7900_s21 = smov 127   ;;  %s7901_s18 = smov 113   ;;  %v8135_v19 = vld [vmem:[%s8095_s29 + $0x8] sm:$0xff]  ;;  %vm498_vm4 = vcmask 130048  }
  0x5a   : > { %v412_v2 = vand.u32 127, %v411_v0  ;;  %496 = vrot.lane.b32.xlu1 %v8108_v8, %s7898_s3  ;;  %s7902_s24 = smov 1   ;;  %s7903_s25 = smov 17   ;;  %v7465_v50 = vld [vmem:[%s9750_s1 + $0x10] sm:$0xff]  ;;  %v7466_v54 = vld [vmem:[%s9750_s1 + $0x18] sm:$0xff]  ;;  %vm468_vm5 = vcmask 908288  }
  0x5b   : > { %s7904_s22 = smov 15   ;;  %vm703_vm6 = vcmask 924672   ;;  %vm831_vm7 = vcmask 1039360   ;;  %s7905_s15 = smov 112   ;;  %vm859_vm8 = vcmask 7168   ;;  %vm731_vm9 = vcmask 121856  }
  0x5c   : > { %v413_v3 = vadd.s32 128, %v412_v2  ;;  %v418_v4 = vand.u32 15, %v412_v2  ;;  %vm605_vm10 = vcmask 138240   ;;  %vm1310_vm11 = vcmask 916480   ;;  %s7464_s12 = sshll.u32 %s8091_s30, 6  ;;  %p9782_p10 = scmp.ne.s32.totalorder %s9775_s27, 0 }
  0x5d   : > { %s9688_s29 = scalar_lea.vmem [#allocation8], %s7464_s12 }
  0x5e   : > { %v425_v5 = vand.u32 15, %v413_v3  ;;  %v438_v6 = vadd.s32 4294967295, %v418_v4  ;;  %v448_v7 = vadd.s32 1, %v418_v4 }
  0x60   : > { %v439_v9 = vadd.s32 4294967295, %v425_v5  ;;  %vm440_vm0 = vcmp.ge.s32.totalorder %v438_v6, 0  ;;  %v449_v10 = vadd.s32 1, %v425_v5  ;;  %vm452_vm1 = vcmp.le.s32.totalorder %v448_v7, 15 }
  0x61   : > { %v446_v11 = vsel %vm440_vm0, 1.0, %v7897_v1  ;;  %v456_v13 = vsel %vm452_vm1, 1.0, %v7897_v1 }
  0x62   : > { %vm441_vm2 = vcmp.ge.s32.totalorder %v439_v9, 0  ;;  %vm453_vm3 = vcmp.le.s32.totalorder %v449_v10, 15 }
  0x63   : > { %v447_v12 = vsel %vm441_vm2, 1.0, %v7897_v1  ;;  %v457_v14 = vsel %vm453_vm3, 1.0, %v7897_v1 }
  0x64   : > { %v7708_v15 = vpack.i.bf16 %v447_v12, %v446_v11  ;;  %v7713_v16 = vpack.i.bf16 %v457_v14, %v456_v13 }
  0x66   : > { %7709 = vrot.lane.b32.xlu0 %v7708_v15, %s7899_s19  ;;  %7719 = vrot.lane.b32.xlu1 %v7708_v15, %s7900_s21 }
  0x6a   : > { %7714 = vrot.lane.b32.xlu0 %v7713_v16, %s7901_s18  ;;  %7724 = vrot.lane.b32.xlu1 %v7713_v16, %s7902_s24 }
  0x6e   : > { %494 = vrot.lane.b32.xlu0 %v8121_v17, %s7898_s3  ;;  %7734 = vrot.lane.b32.xlu1 %v7713_v16, %s7903_s25 }
  0x72   : > { %7729 = vrot.lane.b32.xlu0 %v7708_v15, %s7904_s22  ;;  %490 = vrot.lane.b32.xlu1 %v8127_v18, %s7898_s3 }
  0x76   : > { %488 = vrot.lane.b32.xlu0 %v7897_v1, %s7898_s3 }
  0x7a   : > { %492 = vrot.lane.b32.xlu0 %v8135_v19, %s7898_s3 }
  0xcc   : > { %v497_v20 = vpop.permute.xlu1 %496 }
  0xd8   : > { %v8139_v21 = vpop.permute.xlu0 %7709  ;;  %v8141_v22 = vpop.permute.xlu1 %7719 }
  0xd9   : > { %v7711_v23 = vunpack.i.l.bf16 %v8139_v21  ;;  %v7721_v24 = vunpack.i.l.bf16 %v8141_v22  ;;  %v8172_v38 = vunpack.i.h.bf16 %v8139_v21  ;;  %v8200_v51 = vunpack.i.h.bf16 %v8141_v22 }
  0xdb   : > { %v473_v25 = vmul.f32 0.0, %v7711_v23  ;;  %v836_v30 = vmul.f32 0.0, %v7721_v24  ;;  %v477_v45 = vmul.f32 %v8172_v38, %v8108_v8  ;;  %v475_v52 = vmul.f32 %v8172_v38, %v8135_v19 }
  0xdc   : > { %v8145_v26 = vpop.permute.xlu0 %7714  ;;  %v8147_v27 = vpop.permute.xlu1 %7724  ;;  %v840_v57 = vmul.f32 %v8200_v51, %v8108_v8  ;;  %v838_v59 = vmul.f32 %v8200_v51, %v8135_v19  ;;  %v8227_v61 = vsel %vm468_vm5, %v7711_v23, %v8172_v38  ;;  %v8254_v5 = vsel %vm831_vm7, %v7721_v24, %v8200_v51 }
  0xdd   : > { %v7716_v28 = vunpack.i.l.bf16 %v8145_v26  ;;  %595 = vrot.lane.b32.xlu1 %v473_v25, %s7903_s25  ;;  %v8152_v29 = vunpack.i.l.bf16 %v8147_v27  ;;  %v8185_v43 = vunpack.i.h.bf16 %v8145_v26  ;;  %v7727_v55 = vunpack.i.h.bf16 %v8147_v27  ;;  %v461_v26 = vld [vmem:[%s9751_s2 + $0x8] sm:$0xff] }
  0xde   : > { %v476_v62 = vmul.f32 %v8227_v61, %v8121_v17  ;;  %v474_v0 = vmul.f32 %v8227_v61, %v8127_v18  ;;  %v839_v6 = vmul.f32 %v8254_v5, %v8121_v17  ;;  %v837_v7 = vmul.f32 %v8254_v5, %v8127_v18 }
  0xdf   : > { %v708_v31 = vmul.f32 0.0, %v7716_v28  ;;  %v1056_v34 = vmul.f32 %v8152_v29, %v8121_v17  ;;  %v1053_v37 = vmul.f32 %v8152_v29, %v8127_v18  ;;  %v710_v53 = vmul.f32 %v8185_v43, %v8135_v19 }
  0xe0   : > { %v495_v32 = vpop.permute.xlu0 %494  ;;  %v8176_v40 = vpop.permute.xlu1 %7734  ;;  %v712_v56 = vmul.f32 %v8185_v43, %v8108_v8  ;;  %v1055_v60 = vmul.f32 0.0, %v7727_v55  ;;  %v8241_v2 = vsel %vm703_vm6, %v7716_v28, %v8185_v43  ;;  %v8267_v9 = vsel %vm859_vm8, %v8152_v29, %v7727_v55  ;;  %v460_v28 = vld [vmem:[%s9751_s2] sm:$0xff] }
  0xe1   : > { %721 = vrot.lane.b32.xlu0 %v708_v31, %s7904_s22  ;;  %v502_v33 = vsel %vm498_vm4, %v495_v32, %v497_v20  ;;  %849 = vrot.lane.b32.xlu1 %v836_v30, %s7902_s24  ;;  %v709_v3 = vmul.f32 %v8241_v2, %v8127_v18  ;;  %v711_v4 = vmul.f32 %v8241_v2, %v8121_v17  ;;  %v7737_v10 = vunpack.i.h.bf16 %v8176_v40 }
  0xe2   : > { %541 = vmatprep.subr.mxu0 %v502_v33  ;;  %v1057_v11 = vmul.f32 %v8267_v9, %v8108_v8  ;;  %v1054_v13 = vmul.f32 %v8267_v9, %v8135_v19  ;;  %v8287_v15 = vunpack.i.l.bf16 %v8176_v40  ;;  %v7906_v25 = vmov 0  }
  0xe3   : > { %v1416_v12 = vmul.f32 0.0, %v7737_v10  ;;  %7739 = vset.pattern.permute.xlu1 %v7906_v25  ;;  %7738 = vset.pattern.permute.xlu0 %v7906_v25 }
  0xe4   : > { %v8163_v35 = vpop.permute.xlu0 %7729  ;;  %v491_v46 = vpop.permute.xlu1 %490  ;;  %v1417_v21 = vmul.f32 %v8287_v15, %v8121_v17  ;;  %v8299_v22 = vsel %vm605_vm10, %v8287_v15, %v7737_v10  ;;  %v1414_v27 = vmul.f32 %v8287_v15, %v8127_v18 }
  0xe5   : > { %v8166_v36 = vunpack.i.l.bf16 %v8163_v35  ;;  %1072 = vrot.lane.b32.xlu0 %v1056_v34, %s7900_s21  ;;  %v7732_v58 = vunpack.i.h.bf16 %v8163_v35  ;;  %v1418_v23 = vmul.f32 %v8299_v22, %v8108_v8  ;;  %v1415_v24 = vmul.f32 %v8299_v22, %v8135_v19 }
  0xe7   : > { %v1182_v39 = vmul.f32 %v8166_v36, %v8121_v17  ;;  %v1179_v44 = vmul.f32 %v8166_v36, %v8127_v18  ;;  %v1181_v63 = vmul.f32 0.0, %v7732_v58  ;;  %v8282_v14 = vsel %vm731_vm9, %v8166_v36, %v7732_v58  ;;  %v479_v58 = vld [vmem:[%s9750_s1 + $0x8] sm:$0xff] }
  0xe8   : > { %v8178_v41 = vpop.permute.xlu0 %488  ;;  %v1183_v16 = vmul.f32 %v8282_v14, %v8108_v8  ;;  %v1180_v20 = vmul.f32 %v8282_v14, %v8135_v19 }
  0xe9   : > { %1198 = vrot.lane.b32.xlu1 %v1182_v39, %s7901_s18  ;;  %1066 = vrot.lane.b32.xlu0 %v1053_v37, %s7900_s21  ;;  %v501_v42 = vsel %vm498_vm4, %v8178_v41, %v495_v32  ;;  %v499_v48 = vsel %vm498_vm4, %v8178_v41, %v491_v46 }
  0xea   : > { %542 = vmatpush1.msra.mxu0 %v501_v42 }
  0xec   : > { %v493_v47 = vpop.permute.xlu0 %492 }
  0xed   : > { %1192 = vrot.lane.b32.xlu1 %v1179_v44, %s7901_s18  ;;  %603 = vrot.lane.b32.xlu0 %v477_v45, %s7903_s25  ;;  %v500_v49 = vsel %vm498_vm4, %v491_v46, %v493_v47 }
  0xee   : > { %543 = vmatprep.subr.mxu0 %v500_v49 }
  0xef   : > { %544 = vmatpush1.msra.mxu0 %v499_v48 }
  0xf0   : > { %7467 = vmatmul.mubr.msk.f32.vlgmr.msra.gmra.mxu0 %vm498_vm4, %v7465_v50 }
  0xf1   : > { %599 = vrot.lane.b32.xlu1 %v475_v52, %s7903_s25  ;;  %725 = vrot.lane.b32.xlu0 %v710_v53, %s7904_s22 }
  0xf2   : > { %583 = vmatprep.mubr.f32.mxu0 %v7897_v1 }
  0xf4   : > { %7468 = vmatmul.mubr.msk.f32.gmra.mxu0 %vm498_vm4, %v7466_v54 }
  0xf5   : > { %729 = vrot.lane.b32.xlu1 %v712_v56, %s7904_s22  ;;  %857 = vrot.lane.b32.xlu0 %v840_v57, %s7902_s24  ;;  %v478_v57 = vld [vmem:[%s9750_s1] sm:$0xff] }
  0xf6   : > { %684 = vmatprep.mubr.f32.mxu0 %v7897_v1 }
  0xf9   : > { %853 = vrot.lane.b32.xlu1 %v838_v59, %s7902_s24  ;;  %1070 = vrot.lane.b32.xlu0 %v1055_v60, %s7900_s21 }
  0xfd   : > { %601 = vrot.lane.b32.xlu1 %v476_v62, %s7903_s25  ;;  %1196 = vrot.lane.b32.xlu0 %v1181_v63, %s7901_s18 }
 0x101   : > { %1308 = vrot.lane.b32.xlu1 %v8108_v8, %s7905_s15  ;;  %597 = vrot.lane.b32.xlu0 %v474_v0, %s7903_s25 }
 0x105   : > { %723 = vrot.lane.b32.xlu1 %v709_v3, %s7904_s22  ;;  %727 = vrot.lane.b32.xlu0 %v711_v4, %s7904_s22  ;;  %v7471_v3 = vld [vmem:[%s9750_s1 + $0x20] sm:$0xff] }
 0x109   : > { %855 = vrot.lane.b32.xlu1 %v839_v6, %s7902_s24  ;;  %1304 = vrot.lane.b32.xlu0 %v7897_v1, %s7905_s15 }
 0x10d   : > { %1302 = vrot.lane.b32.xlu1 %v8135_v19, %s7905_s15  ;;  %851 = vrot.lane.b32.xlu0 %v837_v7, %s7902_s24 }
 0x111   : > { %1074 = vrot.lane.b32.xlu1 %v1057_v11, %s7900_s21  ;;  %1306 = vrot.lane.b32.xlu0 %v8121_v17, %s7905_s15 }
 0x115   : > { %1068 = vrot.lane.b32.xlu1 %v1054_v13, %s7900_s21  ;;  %1431 = vrot.lane.b32.xlu0 %v1416_v12, %s7899_s19  ;;  %v7472_v12 = vld [vmem:[%s9750_s1 + $0x28] sm:$0xff] }
 0x119   : > { %1200 = vrot.lane.b32.xlu1 %v1183_v16, %s7901_s18  ;;  %1194 = vrot.lane.b32.xlu0 %v1180_v20, %s7901_s18 }
 0x11d   : > { %1433 = vrot.lane.b32.xlu1 %v1417_v21, %s7899_s19  ;;  %1300 = vrot.lane.b32.xlu0 %v8127_v18, %s7905_s15 }
 0x121   : > { %1435 = vrot.lane.b32.xlu1 %v1418_v23, %s7899_s19  ;;  %1429 = vrot.lane.b32.xlu0 %v1415_v24, %s7899_s19  ;;  %v7475_v23 = vld [vmem:[%s9750_s1 + $0x30] sm:$0xff]  ;;  %v7479_v24 = vld [vmem:[%s9750_s1 + $0x40] sm:$0xff] }
 0x125   : > { %1427 = vrot.lane.b32.xlu1 %v1414_v27, %s7899_s19  ;;  %1539 = vperm.xlu0 %7738, %v461_v26  }
 0x129   : > { %1534 = vperm.xlu1 %7739, %v460_v28  }
 0x14f   : > { %v8319_v30 = vpop.permute.xlu1 %595 }
 0x153   : > { %v8321_v31 = vpop.permute.xlu0 %721  ;;  %v8323_v32 = vpop.permute.xlu1 %849 }
 0x157   : > { %v8325_v33 = vpop.permute.xlu0 %1072 }
 0x15b   : > { %v8327_v34 = vpop.permute.xlu1 %1198  ;;  %v8329_v35 = vpop.permute.xlu0 %1066 }
 0x15f   : > { %v8331_v37 = vpop.permute.xlu1 %1192  ;;  %v604_v39 = vpop.permute.xlu0 %603 }
 0x163   : > { %v600_v40 = vpop.permute.xlu1 %599  ;;  %v726_v42 = vpop.permute.xlu0 %725 }
 0x167   : > { %v730_v44 = vpop.permute.xlu1 %729  ;;  %v858_v45 = vpop.permute.xlu0 %857 }
 0x16b   : > { %v854_v46 = vpop.permute.xlu1 %853  ;;  %v8333_v47 = vpop.permute.xlu0 %1070 }
 0x16f   : > { %v602_v48 = vpop.permute.xlu1 %601  ;;  %v8335_v49 = vpop.permute.xlu0 %1196 }
 0x170   : > { %v609_v50 = vsel %vm605_vm10, %v602_v48, %v604_v39  ;;  %v608_v52 = vsel %vm605_vm10, %v8319_v30, %v602_v48  ;;  %v7476_v39 = vld [vmem:[%s9750_s1 + $0x38] sm:$0xff] }
 0x171   : > { %648 = vmatprep.subr.mxu0 %v609_v50  ;;  %7622 = vmatprep.subr.mxu1 %v609_v50 }
 0x172   : > { %649 = vmatpush1.msra.mxu0 %v608_v52  ;;  %7624 = vmatpush1.msra.mxu1 %v608_v52 }
 0x173   : > { %v8340_v53 = vpop.permute.xlu1 %1308  ;;  %v598_v54 = vpop.permute.xlu0 %597 }
 0x174   : > { %v607_v55 = vsel %vm605_vm10, %v598_v54, %v600_v40  ;;  %v606_v56 = vsel %vm605_vm10, %v8319_v30, %v598_v54  ;;  %v7480_v40 = vld [vmem:[%s9750_s1 + $0x48] sm:$0xff] }
 0x175   : > { %650 = vmatprep.subr.mxu0 %v607_v55  ;;  %7623 = vmatprep.subr.mxu1 %v607_v55 }
 0x176   : > { %651 = vmatpush1.msra.mxu0 %v606_v56  ;;  %7625 = vmatpush1.msra.mxu1 %v606_v56 }
 0x177   : > { %v724_v59 = vpop.permute.xlu1 %723  ;;  %7469 = vmatmul.mubr.msk.f32.vlgmr.msra.gmra.mxu0 %vm498_vm4, %v478_v57  ;;  %v728_v60 = vpop.permute.xlu0 %727  ;;  %7470 = vmatmul.mubr.msk.f32.vlgmr.msra.gmra.mxu1 %vm498_vm4, %v479_v58  ;;  %v7487_v58 = vld [vmem:[%s9750_s1 + $0x60] sm:$0xff] }
 0x178   : > { %v735_v62 = vsel %vm731_vm9, %v728_v60, %v730_v44  ;;  %v734_v63 = vsel %vm731_vm9, %v8321_v31, %v728_v60  ;;  %810 = vmatprep.mubr.f32.mxu0 %v7897_v1  ;;  %938 = vmatprep.mubr.f32.mxu1 %v7897_v1  ;;  %v733_v0 = vsel %vm731_vm9, %v724_v59, %v726_v42 }
 0x179   : > { %774 = vmatprep.subr.mxu0 %v735_v62  ;;  %v732_v7 = vsel %vm731_vm9, %v8321_v31, %v724_v59 }
 0x17a   : > { %775 = vmatpush1.msra.mxu0 %v734_v63  ;;  %v7491_v63 = vld [vmem:[%s9750_s1 + $0x70] sm:$0xff] }
 0x17b   : > { %v856_v4 = vpop.permute.xlu1 %855  ;;  %776 = vmatprep.subr.mxu0 %v733_v0  ;;  %v8362_v6 = vpop.permute.xlu0 %1304  ;;  %v7488_v0 = vld [vmem:[%s9750_s1 + $0x68] sm:$0xff] }
 0x17c   : > { %777 = vmatpush1.msra.mxu0 %v732_v7  ;;  %v863_v10 = vsel %vm859_vm8, %v856_v4, %v858_v45  ;;  %v862_v11 = vsel %vm859_vm8, %v8323_v32, %v856_v4  ;;  %v1314_v48 = vsel %vm1310_vm11, %v8340_v53, %v8362_v6 }
 0x17d   : > { %7473 = vmatmul.mubr.msk.f32.vlgmr.msra.gmra.mxu0 %vm498_vm4, %v7471_v3  ;;  %902 = vmatprep.subr.mxu1 %v863_v10  ;;  %v7492_v10 = vld [vmem:[%s9750_s1 + $0x78] sm:$0xff] }
 0x17e   : > { %903 = vmatpush1.msra.mxu1 %v862_v11  ;;  %816 = vmatprep.mubr.f32.mxu0 %v7897_v1 }
 0x17f   : > { %v1303_v13 = vpop.permute.xlu1 %1302  ;;  %v852_v16 = vpop.permute.xlu0 %851  ;;  %992 = vmatprep.subr.mxu0 %v8108_v8 }
 0x180   : > { %v861_v20 = vsel %vm859_vm8, %v852_v16, %v854_v46  ;;  %v860_v21 = vsel %vm859_vm8, %v8323_v32, %v852_v16  ;;  %993 = vmatpush1.msra.mxu0 %v8121_v17  ;;  %v7483_v46 = vld [vmem:[%s9750_s1 + $0x50] sm:$0xff]  ;;  %v1312_v55 = vsel %vm1310_vm11, %v1303_v13, %v8362_v6 }
 0x181   : > { %7474 = vmatmul.mubr.msk.f32.gmra.mxu0 %vm498_vm4, %v7472_v12  ;;  %904 = vmatprep.subr.mxu1 %v861_v20  ;;  %v7496_v20 = vld [vmem:[%s9750_s1 + $0x88] sm:$0xff] }
 0x182   : > { %905 = vmatpush1.msra.mxu1 %v860_v21  ;;  %994 = vmatprep.subr.mxu0 %v8135_v19 }
 0x183   : > { %v1075_v25 = vpop.permute.xlu1 %1074  ;;  %7477 = vmatmul.mubr.msk.f32.vlgmr.msra.gmra.mxu1 %vm498_vm4, %v7475_v23  ;;  %v1307_v26 = vpop.permute.xlu0 %1306  ;;  %995 = vmatpush1.msra.mxu0 %v8127_v18 }
 0x184   : > { %1028 = vmatprep.mubr.f32.mxu0 %v7897_v1  ;;  %v1079_v27 = vsel %vm831_vm7, %v1075_v25, %v8333_v47  ;;  %944 = vmatprep.mubr.f32.mxu1 %v7897_v1  ;;  %v1078_v28 = vsel %vm831_vm7, %v8325_v33, %v1075_v25  ;;  %v1313_v50 = vsel %vm1310_vm11, %v1307_v26, %v8340_v53  ;;  %v7484_v53 = vld [vmem:[%s9750_s1 + $0x58] sm:$0xff] }
 0x185   : > { %7481 = vmatmul.mubr.msk.f32.vlgmr.msra.gmra.mxu0 %vm498_vm4, %v7479_v24  ;;  %1118 = vmatprep.subr.mxu1 %v1079_v27 }
 0x186   : > { %1119 = vmatpush1.msra.mxu1 %v1078_v28  ;;  %1034 = vmatprep.mubr.f32.mxu0 %v7897_v1 }
 0x187   : > { %v1069_v42 = vpop.permute.xlu1 %1068  ;;  %7478 = vmatmul.mubr.msk.f32.gmra.mxu1 %vm498_vm4, %v7476_v39  ;;  %v8404_v44 = vpop.permute.xlu0 %1431 }
 0x188   : > { %v1077_v33 = vsel %vm831_vm7, %v1069_v42, %v8333_v47  ;;  %v1076_v45 = vsel %vm831_vm7, %v8329_v35, %v1069_v42  ;;  %1154 = vmatprep.mubr.f32.mxu1 %v7897_v1 }
 0x189   : > { %7482 = vmatmul.mubr.msk.f32.gmra.mxu0 %vm498_vm4, %v7480_v40  ;;  %1120 = vmatprep.subr.mxu1 %v1077_v33 }
 0x18a   : > { %1121 = vmatpush1.msra.mxu1 %v1076_v45  ;;  %1280 = vmatprep.mubr.f32.mxu0 %v7897_v1 }
 0x18b   : > { %v1201_v35 = vpop.permute.xlu1 %1200  ;;  %7485 = vmatmul.mubr.msk.f32.vlgmr.msra.gmra.mxu1 %vm498_vm4, %v7483_v46  ;;  %1353 = vmatprep.subr.mxu1 %v1314_v48  ;;  %v1195_v52 = vpop.permute.xlu0 %1194 }
 0x18c   : > { %1354 = vmatpush1.msra.mxu1 %v1313_v50  ;;  %v1205_v54 = vsel %vm703_vm6, %v1201_v35, %v8335_v49  ;;  %1160 = vmatprep.mubr.f32.mxu1 %v7897_v1  ;;  %v1204_v56 = vsel %vm703_vm6, %v8327_v34, %v1201_v35  ;;  %v1203_v57 = vsel %vm703_vm6, %v1195_v52, %v8335_v49 }
 0x18d   : > { %1244 = vmatprep.subr.mxu0 %v1205_v54  ;;  %1355 = vmatprep.subr.mxu1 %v1312_v55  ;;  %v1202_v34 = vsel %vm703_vm6, %v8331_v37, %v1195_v52 }
 0x18e   : > { %1245 = vmatpush1.msra.mxu0 %v1204_v56 }
 0x18f   : > { %v1434_v59 = vpop.permute.xlu1 %1433  ;;  %7486 = vmatmul.mubr.msk.f32.gmra.mxu1 %vm498_vm4, %v7484_v53  ;;  %1246 = vmatprep.subr.mxu0 %v1203_v57  ;;  %v1301_v60 = vpop.permute.xlu0 %1300 }
 0x190   : > { %v1311_v62 = vsel %vm1310_vm11, %v1301_v60, %v1303_v13  ;;  %1247 = vmatpush1.msra.mxu0 %v1202_v34  ;;  %1389 = vmatprep.mubr.f32.mxu1 %v7897_v1  ;;  %v7495_v13 = vld [vmem:[%s9750_s1 + $0x80] sm:$0xff] }
 0x191   : > { %7489 = vmatmul.mubr.msk.f32.vlgmr.msra.gmra.mxu0 %vm498_vm4, %v7487_v58  ;;  %1356 = vmatpush1.msra.mxu1 %v1311_v62 }
 0x192   : > { %1286 = vmatprep.mubr.f32.mxu0 %v7897_v1 }
 0x193   : > { %v1436_v3 = vpop.permute.xlu1 %1435  ;;  %7493 = vmatmul.mubr.msk.f32.vlgmr.msra.gmra.mxu1 %vm498_vm4, %v7491_v63  ;;  %v1430_v37 = vpop.permute.xlu0 %1429 }
 0x194   : > { %v1440_v4 = vsel %vm468_vm5, %v1436_v3, %v8404_v44  ;;  %1395 = vmatprep.mubr.f32.mxu1 %v7897_v1  ;;  %v1439_v7 = vsel %vm468_vm5, %v1434_v59, %v1436_v3  ;;  %v1438_v11 = vsel %vm468_vm5, %v1430_v37, %v8404_v44 }
 0x195   : > { %7490 = vmatmul.mubr.msk.f32.gmra.mxu0 %vm498_vm4, %v7488_v0  ;;  %1479 = vmatprep.subr.mxu0 %v1440_v4 }
 0x196   : > { %1480 = vmatpush1.msra.mxu0 %v1439_v7  ;;  %1515 = vmatprep.mubr.f32.mxu0 %v7897_v1 }
 0x197   : > { %v1428_v12 = vpop.permute.xlu1 %1427  ;;  %7494 = vmatmul.mubr.msk.f32.gmra.mxu1 %vm498_vm4, %v7492_v10  ;;  %1481 = vmatprep.subr.mxu0 %v1438_v11 }
 0x198   : > { %v1437_v16 = vsel %vm468_vm5, %v1428_v12, %v1430_v37  ;;  %1622 = vmatprep.mubr.f32.mxu1 %v7897_v1 }
 0x199   : > { %1482 = vmatpush1.msra.mxu0 %v1437_v16 }
 0x19a   : > { %7497 = vmatmul.mubr.msk.f32.vlgmr.msra.gmra.mxu0 %vm498_vm4, %v7495_v13  ;;  %1669 = vmatprep.subr.mxu0 %v8108_v8 }
 0x19b   : > { %1521 = vmatprep.mubr.f32.mxu0 %v7897_v1  ;;  %1670 = vmatpush1.msra.mxu0 %v8121_v17 }
 0x19c   : > { %1671 = vmatprep.subr.mxu0 %v8135_v19 }
 0x19d   : > { %1672 = vmatpush1.msra.mxu0 %v8127_v18 }
 0x19e   : > { %7498 = vmatmul.mubr.msk.f32.gmra.mxu0 %vm498_vm4, %v7496_v20 }
 0x19f   : > { %1705 = vmatprep.mubr.f32.mxu0 %v7897_v1 }
 0x1b0   : > { %v579_v21 = vpop.f32.mrf.mxu0 }
 0x1b2   : > { %v581_v23 = vpop.f32.mrf.mxu0 }
 0x1b4   : > { %v585_v24 = vpop.f32.mrf.mxu0 }
 0x1b6   : > { %v587_v8 = vpop.f32.mrf.mxu0 }
 0x237   : > { %v686_v25 = vpop.f32.mrf.mxu0  ;;  %v692_v27 = vpop.f32.mrf.mxu1 }
 0x238   : > { %v687_v48 = vadd.f32 %v686_v25, %v579_v21  ;;  %v693_v56 = vadd.f32 %v692_v27, %v585_v24 }
 0x239   : > { %v688_v26 = vpop.f32.mrf.mxu0  ;;  %v694_v40 = vpop.f32.mrf.mxu1 }
 0x23a   : > { %v689_v35 = vadd.f32 %v688_v26, %v581_v23  ;;  %v695_v59 = vadd.f32 %v694_v40, %v587_v8 }
 0x23d   : > { %v812_v28 = vpop.f32.mrf.mxu0 }
 0x23e   : > { %v823_v52 = vadd.f32 %v812_v28, %v687_v48 }
 0x23f   : > { %v814_v39 = vpop.f32.mrf.mxu0 }
 0x240   : > { %v824_v53 = vadd.f32 %v814_v39, %v689_v35 }
 0x241   : > { %v818_v42 = vpop.f32.mrf.mxu0 }
 0x242   : > { %v825_v60 = vadd.f32 %v818_v42, %v693_v56 }
 0x243   : > { %v820_v17 = vpop.f32.mrf.mxu0  ;;  %v940_v33 = vpop.f32.mrf.mxu1 }
 0x244   : > { %v951_v57 = vadd.f32 %v940_v33, %v823_v52  ;;  %v826_v0 = vadd.f32 %v820_v17, %v695_v59  ;;  %v1540_v59 = vpop.permute.xlu0 %1539 }
 0x245   : > { %v942_v19 = vpop.f32.mrf.mxu1  ;;  %v1030_v45 = vpop.f32.mrf.mxu0 }
 0x246   : > { %v952_v34 = vadd.f32 %v942_v19, %v824_v53  ;;  %v1041_v3 = vadd.f32 %v1030_v45, %v951_v57  ;;  %v1535_v19 = vpop.permute.xlu1 %1534 }
 0x247   : > { %v946_v18 = vpop.f32.mrf.mxu1  ;;  %v1032_v46 = vpop.f32.mrf.mxu0 }
 0x248   : > { %v953_v37 = vadd.f32 %v946_v18, %v825_v60  ;;  %v1042_v10 = vadd.f32 %v1032_v46, %v952_v34 }
 0x249   : > { %v948_v50 = vpop.f32.mrf.mxu1  ;;  %v1036_v54 = vpop.f32.mrf.mxu0 }
 0x24a   : > { %v954_v11 = vadd.f32 %v948_v50, %v826_v0  ;;  %v1043_v20 = vadd.f32 %v1036_v54, %v953_v37 }
 0x24b   : > { %v1156_v55 = vpop.f32.mrf.mxu1  ;;  %v1038_v62 = vpop.f32.mrf.mxu0 }
 0x24c   : > { %v1167_v12 = vadd.f32 %v1156_v55, %v1041_v3  ;;  %v1044_v8 = vadd.f32 %v1038_v62, %v954_v11 }
 0x24d   : > { %v1158_v58 = vpop.f32.mrf.mxu1 }
 0x24e   : > { %v1168_v21 = vadd.f32 %v1158_v58, %v1042_v10 }
 0x24f   : > { %v1162_v63 = vpop.f32.mrf.mxu1 }
 0x250   : > { %v1169_v26 = vadd.f32 %v1162_v63, %v1043_v20 }
 0x251   : > { %v1164_v4 = vpop.f32.mrf.mxu1  ;;  %v1282_v7 = vpop.f32.mrf.mxu0 }
 0x252   : > { %v1293_v23 = vadd.f32 %v1282_v7, %v1167_v12  ;;  %v1170_v40 = vadd.f32 %v1164_v4, %v1044_v8  ;;  %v1550_v12 = vld [vmem:[#allocation7] sm:$0xff] }
 0x253   : > { %v1284_v13 = vpop.f32.mrf.mxu0  ;;  %v1391_v16 = vpop.f32.mrf.mxu1 }
 0x254   : > { %v1294_v27 = vadd.f32 %v1284_v13, %v1168_v21  ;;  %v1402_v42 = vadd.f32 %v1391_v16, %v1293_v23  ;;  %v458_v13 = vld [vmem:[%s9754_s5] sm:$0xff]  ;;  %v1551_v21 = vld [vmem:[#allocation7 + $0x8] sm:$0xff]  ;;  %v459_v23 = vld [vmem:[%s9754_s5 + $0x8] sm:$0xff] }
 0x255   : > { %v1288_v24 = vpop.f32.mrf.mxu0  ;;  %v1393_v25 = vpop.f32.mrf.mxu1  ;;  %7501 = vmatmul.mubr.msk.f32.vlgmr.msra.gmra.mxu0 %vm498_vm4, %v458_v13 }
 0x256   : > { %v1295_v17 = vadd.f32 %v1288_v24, %v1169_v26  ;;  %v1403_v45 = vadd.f32 %v1393_v25, %v1294_v27  ;;  %1711 = vmatprep.mubr.f32.mxu0 %v7897_v1 }
 0x257   : > { %v1290_v28 = vpop.f32.mrf.mxu0  ;;  %v1397_v39 = vpop.f32.mrf.mxu1 }
 0x258   : > { %v1296_v18 = vadd.f32 %v1290_v28, %v1170_v40  ;;  %v1404_v35 = vadd.f32 %v1397_v39, %v1295_v17 }
 0x259   : > { %v1399_v48 = vpop.f32.mrf.mxu1  ;;  %7502 = vmatmul.mubr.msk.f32.gmra.mxu0 %vm498_vm4, %v459_v23 }
 0x25a   : > { %v1517_v33 = vpop.f32.mrf.mxu0  ;;  %v1405_v56 = vadd.f32 %v1399_v48, %v1296_v18  ;;  %1922 = vmatprep.mubr.f32.mxu0 %v7897_v1 }
 0x25b   : > { %v1528_v46 = vadd.f32 %v1517_v33, %v1402_v42 }
 0x25c   : > { %v1519_v50 = vpop.f32.mrf.mxu0 }
 0x25d   : > { %v1542_v52 = vadd.f32 %v1535_v19, %v1528_v46  ;;  %v1529_v54 = vadd.f32 %v1519_v50, %v1403_v45 }
 0x25e   : > { %v1523_v55 = vpop.f32.mrf.mxu0 }
 0x25f   : > { %v8479_v53 = vmax.f32 %v1542_v52, 0.0  ;;  %v1543_v57 = vadd.f32 %v1535_v19, %v1529_v54  ;;  %v1530_v58 = vadd.f32 %v1523_v55, %v1404_v35  ;;  %v1719_v52 = vld [vmem:[%s9753_s4 + $0x8] sm:$0xff]  ;;  %v1718_v54 = vld [vmem:[%s9753_s4] sm:$0xff] }
 0x260   : > { %v1525_v60 = vpop.f32.mrf.mxu0 }
 0x261   : > { %v8481_v34 = vmax.f32 %v1543_v57, 0.0  ;;  %v1531_v62 = vadd.f32 %v1525_v60, %v1405_v56  ;;  %1733 = vrot.lane.b32.xlu1 %v8479_v53, %s7898_s3  ;;  %v1544_v63 = vadd.f32 %v1540_v59, %v1530_v58  ;;  %v1720_v3 = vmul.f32 %v8479_v53, %v8227_v61 }
 0x262   : > { %v1935_v10 = vmul.f32 %v8479_v53, %v8241_v2  ;;  %v2049_v16 = vmul.f32 %v8479_v53, %v8254_v5  ;;  %v2253_v24 = vmul.f32 %v8152_v29, %v8479_v53  ;;  %v2367_v19 = vmul.f32 %v8166_v36, %v8479_v53 }
 0x263   : > { %v1545_v0 = vadd.f32 %v1540_v59, %v1531_v62  ;;  %1735 = vrot.lane.b32.xlu0 %v8481_v34, %s7898_s3  ;;  %v1721_v4 = vmul.f32 %v8172_v38, %v8481_v34  ;;  %v8494_v7 = vmax.f32 %v1544_v63, 0.0  ;;  %v1936_v11 = vmul.f32 %v8185_v43, %v8481_v34 }
 0x264   : > { %v2050_v20 = vmul.f32 %v8200_v51, %v8481_v34  ;;  %v2254_v8 = vmul.f32 %v8481_v34, %v8267_v9  ;;  %v2368_v42 = vmul.f32 %v8481_v34, %v8282_v14  ;;  %v2588_v50 = vmul.f32 %v8481_v34, %v8299_v22 }
 0x265   : > { %v8489_v37 = vmax.f32 %v1545_v0, 0.0  ;;  %1836 = vrot.lane.b32.xlu1 %v1720_v3, %s7903_s25  ;;  %v2255_v25 = vmul.f32 %v8152_v29, %v8494_v7  ;;  %v2369_v26 = vmul.f32 %v8166_v36, %v8494_v7  ;;  %v1722_v27 = vmul.f32 %v8494_v7, %v8227_v61 }
 0x266   : > { %v1937_v39 = vmul.f32 %v8494_v7, %v8241_v2  ;;  %v2051_v33 = vmul.f32 %v8494_v7, %v8254_v5  ;;  %v2589_v46 = vmul.f32 %v8287_v15, %v8494_v7  ;;  %v2587_v35 = vmul.f32 %v8287_v15, %v8479_v53 }
 0x267   : > { %1838 = vrot.lane.b32.xlu0 %v1721_v4, %s7903_s25  ;;  %1586 = vmatprep.subr.mxu1 %v8489_v37  ;;  %v1723_v28 = vmul.f32 %v8172_v38, %v8489_v37  ;;  %v1938_v40 = vmul.f32 %v8185_v43, %v8489_v37  ;;  %v2052_v17 = vmul.f32 %v8200_v51, %v8489_v37 }
 0x268   : > { %1587 = vmatpush1.msra.mxu1 %v8494_v7  ;;  %v2256_v45 = vmul.f32 %v8489_v37, %v8267_v9  ;;  %v2370_v18 = vmul.f32 %v8489_v37, %v8282_v14  ;;  %v2590_v48 = vmul.f32 %v8489_v37, %v8299_v22 }
 0x269   : > { %1946 = vrot.lane.b32.xlu1 %v1935_v10, %s7904_s22  ;;  %1588 = vmatprep.subr.mxu1 %v8481_v34 }
 0x26a   : > { %1589 = vmatpush1.msra.mxu1 %v8479_v53 }
 0x26b   : > { %1948 = vrot.lane.b32.xlu0 %v1936_v11, %s7904_s22  ;;  %7499 = vmatmul.mubr.msk.f32.vlgmr.msra.gmra.mxu1 %vm498_vm4, %v1550_v12 }
 0x26c   : > { %1628 = vmatprep.mubr.f32.mxu1 %v7897_v1 }
 0x26d   : > { %2060 = vrot.lane.b32.xlu1 %v2049_v16, %s7902_s24  ;;  %v1727_v16 = vld [vmem:[#allocation5 + $0x10] sm:$0xff] }
 0x26f   : > { %2062 = vrot.lane.b32.xlu0 %v2050_v20, %s7902_s24  ;;  %7500 = vmatmul.mubr.msk.f32.gmra.mxu1 %vm498_vm4, %v1551_v21 }
 0x270   : > { %1819 = vmatprep.mubr.f32.mxu1 %v7897_v1 }
 0x271   : > { %2264 = vrot.lane.b32.xlu1 %v2253_v24, %s7900_s21  ;;  %v1728_v24 = vld [vmem:[#allocation5 + $0x18] sm:$0xff] }
 0x273   : > { %1739 = vrot.lane.b32.xlu0 %v8489_v37, %s7898_s3 }
 0x275   : > { %1737 = vrot.lane.b32.xlu1 %v8494_v7, %s7898_s3 }
 0x277   : > { %2268 = vrot.lane.b32.xlu0 %v2255_v25, %s7900_s21 }
 0x279   : > { %2266 = vrot.lane.b32.xlu1 %v2254_v8, %s7900_s21 }
 0x27b   : > { %2382 = vrot.lane.b32.xlu0 %v2369_v26, %s7901_s18 }
 0x27d   : > { %1840 = vrot.lane.b32.xlu1 %v1722_v27, %s7903_s25 }
 0x27f   : > { %1842 = vrot.lane.b32.xlu0 %v1723_v28, %s7903_s25 }
 0x281   : > { %1950 = vrot.lane.b32.xlu1 %v1937_v39, %s7904_s22 }
 0x283   : > { %1952 = vrot.lane.b32.xlu0 %v1938_v40, %s7904_s22  ;;  %v1724_v40 = vld [vmem:[#allocation5] sm:$0xff] }
 0x285   : > { %2380 = vrot.lane.b32.xlu1 %v2368_v42, %s7901_s18 }
 0x287   : > { %2066 = vrot.lane.b32.xlu0 %v2052_v17, %s7902_s24 }
 0x289   : > { %2064 = vrot.lane.b32.xlu1 %v2051_v33, %s7902_s24 }
 0x28b   : > { %2378 = vrot.lane.b32.xlu0 %v2367_v19, %s7901_s18 }
 0x28d   : > { %2490 = vrot.lane.b32.xlu1 %v8489_v37, %s7905_s15 }
 0x28f   : > { %2488 = vrot.lane.b32.xlu0 %v8494_v7, %s7905_s15 }
 0x291   : > { %2270 = vrot.lane.b32.xlu1 %v2256_v45, %s7900_s21 }
 0x293   : > { %2384 = vrot.lane.b32.xlu0 %v2370_v18, %s7901_s18 }
 0x295   : > { %2486 = vrot.lane.b32.xlu1 %v8481_v34, %s7905_s15 }
 0x297   : > { %2602 = vrot.lane.b32.xlu0 %v2589_v46, %s7899_s19  ;;  %v1725_v46 = vld [vmem:[#allocation5 + $0x8] sm:$0xff] }
 0x299   : > { %2484 = vrot.lane.b32.xlu1 %v8479_v53, %s7905_s15 }
 0x29b   : > { %2604 = vrot.lane.b32.xlu0 %v2590_v48, %s7899_s19  ;;  %v1940_v48 = vld [vmem:[#allocation5 + $0x20] sm:$0xff] }
 0x29d   : > { %2600 = vrot.lane.b32.xlu1 %v2588_v50, %s7899_s19 }
 0x29f   : > { %2598 = vrot.lane.b32.xlu0 %v2587_v35, %s7899_s19 }
 0x2a1   : > { %2708 = vperm.xlu1 %7739, %v1719_v52  }
 0x2a3   : > { %2703 = vperm.xlu0 %7738, %v1718_v54  }
 0x2d3   : > { %v1734_v55 = vpop.permute.xlu1 %1733 }
 0x2d4   : > { %v1741_v21 = vsel %vm498_vm4, %v8178_v41, %v1734_v55 }
 0x2d5   : > { %v1736_v56 = vpop.permute.xlu0 %1735 }
 0x2d6   : > { %v1742_v13 = vsel %vm498_vm4, %v1734_v55, %v1736_v56 }
 0x2d7   : > { %v1837_v57 = vpop.permute.xlu1 %1836 }
 0x2d8   : > { %v1844_v17 = vsel %vm605_vm10, %v8319_v30, %v1837_v57 }
 0x2d9   : > { %v1839_v58 = vpop.permute.xlu0 %1838 }
 0x2da   : > { %v1845_v39 = vsel %vm605_vm10, %v1837_v57, %v1839_v58  ;;  %v1941_v57 = vld [vmem:[#allocation5 + $0x28] sm:$0xff] }
 0x2db   : > { %v1947_v59 = vpop.permute.xlu1 %1946 }
 0x2dc   : > { %v1954_v35 = vsel %vm731_vm9, %v8321_v31, %v1947_v59 }
 0x2dd   : > { %v1949_v60 = vpop.permute.xlu0 %1948 }
 0x2de   : > { %v1955_v18 = vsel %vm731_vm9, %v1947_v59, %v1949_v60  ;;  %v2054_v60 = vld [vmem:[#allocation5 + $0x30] sm:$0xff] }
 0x2df   : > { %v8599_v62 = vpop.permute.xlu1 %2060 }
 0x2e0   : > { %v2068_v59 = vsel %vm859_vm8, %v8323_v32, %v8599_v62 }
 0x2e1   : > { %v2063_v63 = vpop.permute.xlu0 %2062 }
 0x2e2   : > { %v2069_v58 = vsel %vm859_vm8, %v8599_v62, %v2063_v63 }
 0x2e3   : > { %v8601_v0 = vpop.permute.xlu1 %2264 }
 0x2e5   : > { %v1740_v3 = vpop.permute.xlu0 %1739 }
 0x2e7   : > { %v1738_v4 = vpop.permute.xlu1 %1737 }
 0x2e8   : > { %v1744_v10 = vsel %vm498_vm4, %v1738_v4, %v1740_v3  ;;  %v1743_v11 = vsel %vm498_vm4, %v8178_v41, %v1738_v4 }
 0x2e9   : > { %1783 = vmatprep.subr.mxu1 %v1744_v10  ;;  %v8606_v12 = vpop.permute.xlu0 %2268  ;;  %v2165_v10 = vld [vmem:[#allocation5 + $0x48] sm:$0xff] }
 0x2ea   : > { %1784 = vmatpush1.msra.mxu1 %v1743_v11 }
 0x2eb   : > { %v8609_v20 = vpop.permute.xlu1 %2266  ;;  %1785 = vmatprep.subr.mxu1 %v1742_v13 }
 0x2ec   : > { %1786 = vmatpush1.msra.mxu1 %v1741_v21  ;;  %v2258_v21 = vld [vmem:[#allocation5 + $0x50] sm:$0xff] }
 0x2ed   : > { %v8613_v23 = vpop.permute.xlu0 %2382  ;;  %7503 = vmatmul.mubr.msk.f32.vlgmr.msra.gmra.mxu1 %vm498_vm4, %v1727_v16  ;;  %v2273_v16 = vsel %vm831_vm7, %v8609_v20, %v8333_v47 }
 0x2ee   : > { %1825 = vmatprep.mubr.f32.mxu1 %v7897_v1 }
 0x2ef   : > { %v1841_v25 = vpop.permute.xlu1 %1840 }
 0x2f0   : > { %v1846_v28 = vsel %vm605_vm10, %v8319_v30, %v1841_v25 }
 0x2f1   : > { %v1843_v8 = vpop.permute.xlu0 %1842  ;;  %7504 = vmatmul.mubr.msk.f32.gmra.mxu1 %vm498_vm4, %v1728_v24  ;;  %v2272_v24 = vsel %vm831_vm7, %v8601_v0, %v8609_v20 }
 0x2f2   : > { %v1847_v26 = vsel %vm605_vm10, %v1841_v25, %v1843_v8  ;;  %2032 = vmatprep.mubr.f32.mxu1 %v7897_v1 }
 0x2f3   : > { %v1951_v27 = vpop.permute.xlu1 %1950  ;;  %1886 = vmatprep.subr.mxu0 %v1847_v26  ;;  %v2372_v26 = vld [vmem:[#allocation5 + $0x60] sm:$0xff] }
 0x2f4   : > { %1887 = vmatpush1.msra.mxu0 %v1846_v28  ;;  %v1956_v45 = vsel %vm731_vm9, %v8321_v31, %v1951_v27  ;;  %v2259_v28 = vld [vmem:[#allocation5 + $0x58] sm:$0xff] }
 0x2f5   : > { %1888 = vmatprep.subr.mxu0 %v1845_v39  ;;  %v1953_v42 = vpop.permute.xlu0 %1952 }
 0x2f6   : > { %1889 = vmatpush1.msra.mxu0 %v1844_v17  ;;  %v1957_v33 = vsel %vm731_vm9, %v1951_v27, %v1953_v42  ;;  %v2373_v17 = vld [vmem:[#allocation5 + $0x68] sm:$0xff] }
 0x2f7   : > { %v8626_v19 = vpop.permute.xlu1 %2380  ;;  %7505 = vmatmul.mubr.msk.f32.vlgmr.msra.gmra.mxu0 %vm498_vm4, %v1724_v40  ;;  %1996 = vmatprep.subr.mxu1 %v1957_v33 }
 0x2f8   : > { %1997 = vmatpush1.msra.mxu1 %v1956_v45  ;;  %1928 = vmatprep.mubr.f32.mxu0 %v7897_v1  ;;  %v2387_v8 = vsel %vm703_vm6, %v8626_v19, %v8335_v49 }
 0x2f9   : > { %1998 = vmatprep.subr.mxu1 %v1955_v18  ;;  %v2067_v50 = vpop.permute.xlu0 %2066  ;;  %v2482_v18 = vld [vmem:[#allocation5 + $0x70] sm:$0xff] }
 0x2fa   : > { %1999 = vmatpush1.msra.mxu1 %v1954_v35  ;;  %v2592_v35 = vld [vmem:[#allocation5 + $0x80] sm:$0xff] }
 0x2fb   : > { %v2065_v52 = vpop.permute.xlu1 %2064  ;;  %7506 = vmatmul.mubr.msk.f32.gmra.mxu0 %vm498_vm4, %v1725_v46  ;;  %7507 = vmatmul.mubr.msk.f32.vlgmr.msra.gmra.mxu1 %vm498_vm4, %v1940_v48 }
 0x2fc   : > { %2200 = vmatprep.subr.mxu1 %v8489_v37  ;;  %v2071_v54 = vsel %vm859_vm8, %v2065_v52, %v2067_v50  ;;  %2038 = vmatprep.mubr.f32.mxu1 %v7897_v1  ;;  %v2070_v55 = vsel %vm859_vm8, %v8323_v32, %v2065_v52  ;;  %v2483_v52 = vld [vmem:[#allocation5 + $0x78] sm:$0xff] }
 0x2fd   : > { %2201 = vmatpush1.msra.mxu1 %v8494_v7  ;;  %2110 = vmatprep.subr.mxu0 %v2071_v54  ;;  %v2379_v56 = vpop.permute.xlu0 %2378  ;;  %v2593_v54 = vld [vmem:[#allocation5 + $0x88] sm:$0xff] }
 0x2fe   : > { %2202 = vmatprep.subr.mxu1 %v8481_v34  ;;  %2111 = vmatpush1.msra.mxu0 %v2070_v55  ;;  %v2164_v34 = vld [vmem:[#allocation5 + $0x40] sm:$0xff]  ;;  %v2386_v27 = vsel %vm703_vm6, %v2379_v56, %v8626_v19 }
 0x2ff   : > { %2203 = vmatpush1.msra.mxu1 %v8479_v53  ;;  %v2491_v37 = vpop.permute.xlu1 %2490  ;;  %2112 = vmatprep.subr.mxu0 %v2069_v58  ;;  %v2055_v53 = vld [vmem:[#allocation5 + $0x38] sm:$0xff] }
 0x300   : > { %7508 = vmatmul.mubr.msk.f32.gmra.mxu1 %vm498_vm4, %v1941_v57  ;;  %2113 = vmatpush1.msra.mxu0 %v2068_v59 }
 0x301   : > { %2146 = vmatprep.mubr.f32.mxu0 %v7897_v1  ;;  %v2489_v7 = vpop.permute.xlu0 %2488  ;;  %2236 = vmatprep.mubr.f32.mxu1 %v7897_v1 }
 0x302   : > { %7509 = vmatmul.mubr.msk.f32.vlgmr.msra.gmra.mxu0 %vm498_vm4, %v2054_v60  ;;  %v2494_v20 = vsel %vm1310_vm11, %v2489_v7, %v2491_v37 }
 0x303   : > { %v2271_v63 = vpop.permute.xlu1 %2270  ;;  %2152 = vmatprep.mubr.f32.mxu0 %v7897_v1 }
 0x304   : > { %7511 = vmatmul.mubr.msk.f32.vlgmr.msra.gmra.mxu1 %vm498_vm4, %v2164_v34  ;;  %v2275_v62 = vsel %vm831_vm7, %v2271_v63, %v8333_v47  ;;  %v2274_v3 = vsel %vm831_vm7, %v8606_v12, %v2271_v63 }
 0x305   : > { %2314 = vmatprep.subr.mxu0 %v2275_v62  ;;  %v2385_v4 = vpop.permute.xlu0 %2384  ;;  %2242 = vmatprep.mubr.f32.mxu1 %v7897_v1 }
 0x306   : > { %7510 = vmatmul.mubr.msk.f32.gmra.mxu0 %vm498_vm4, %v2055_v53  ;;  %v2389_v11 = vsel %vm703_vm6, %v2385_v4, %v8335_v49  ;;  %v2388_v12 = vsel %vm703_vm6, %v8613_v23, %v2385_v4  ;;  %v2495_v23 = vsel %vm1310_vm11, %v2491_v37, %v8362_v6 }
 0x307   : > { %2315 = vmatpush1.msra.mxu0 %v2274_v3  ;;  %v2487_v13 = vpop.permute.xlu1 %2486  ;;  %2428 = vmatprep.subr.mxu1 %v2389_v11 }
 0x308   : > { %7512 = vmatmul.mubr.msk.f32.gmra.mxu1 %vm498_vm4, %v2165_v10  ;;  %2316 = vmatprep.subr.mxu0 %v2273_v16  ;;  %v2493_v40 = vsel %vm1310_vm11, %v2487_v13, %v8362_v6 }
 0x309   : > { %2317 = vmatpush1.msra.mxu0 %v2272_v24  ;;  %2350 = vmatprep.mubr.f32.mxu0 %v7897_v1  ;;  %v2603_v25 = vpop.permute.xlu0 %2602 }
 0x30a   : > { %2429 = vmatpush1.msra.mxu1 %v2388_v12  ;;  %7513 = vmatmul.mubr.msk.f32.vlgmr.msra.gmra.mxu0 %vm498_vm4, %v2258_v21 }
 0x30b   : > { %2430 = vmatprep.subr.mxu1 %v2387_v8  ;;  %2534 = vmatprep.subr.mxu0 %v2495_v23  ;;  %v2485_v0 = vpop.permute.xlu1 %2484 }
 0x30c   : > { %2431 = vmatpush1.msra.mxu1 %v2386_v27  ;;  %2464 = vmatprep.mubr.f32.mxu1 %v7897_v1  ;;  %v2492_v39 = vsel %vm1310_vm11, %v2485_v0, %v2487_v13 }
 0x30d   : > { %2535 = vmatpush1.msra.mxu0 %v2494_v20  ;;  %7515 = vmatmul.mubr.msk.f32.vlgmr.msra.gmra.mxu1 %vm498_vm4, %v2372_v26  ;;  %v2605_v42 = vpop.permute.xlu0 %2604 }
 0x30e   : > { %2536 = vmatprep.subr.mxu0 %v2493_v40  ;;  %2356 = vmatprep.mubr.f32.mxu0 %v7897_v1  ;;  %v2609_v33 = vsel %vm468_vm5, %v2605_v42, %v8404_v44  ;;  %v2608_v45 = vsel %vm468_vm5, %v2603_v25, %v2605_v42 }
 0x30f   : > { %7514 = vmatmul.mubr.msk.f32.gmra.mxu0 %vm498_vm4, %v2259_v28  ;;  %2470 = vmatprep.mubr.f32.mxu1 %v7897_v1  ;;  %v2601_v19 = vpop.permute.xlu1 %2600 }
 0x310   : > { %2537 = vmatpush1.msra.mxu0 %v2492_v39  ;;  %2648 = vmatprep.subr.mxu1 %v2609_v33  ;;  %v2607_v46 = vsel %vm468_vm5, %v2601_v19, %v8404_v44 }
 0x311   : > { %7516 = vmatmul.mubr.msk.f32.gmra.mxu1 %vm498_vm4, %v2373_v17  ;;  %2570 = vmatprep.mubr.f32.mxu0 %v7897_v1  ;;  %v2599_v48 = vpop.permute.xlu0 %2598 }
 0x312   : > { %2649 = vmatpush1.msra.mxu1 %v2608_v45  ;;  %v2606_v50 = vsel %vm468_vm5, %v2599_v48, %v2601_v19  ;;  %2684 = vmatprep.mubr.f32.mxu1 %v7897_v1 }
 0x313   : > { %7517 = vmatmul.mubr.msk.f32.vlgmr.msra.gmra.mxu0 %vm498_vm4, %v2482_v18  ;;  %2650 = vmatprep.subr.mxu1 %v2607_v46 }
 0x314   : > { %2651 = vmatpush1.msra.mxu1 %v2606_v50  ;;  %2576 = vmatprep.mubr.f32.mxu0 %v7897_v1 }
 0x315   : > { %7519 = vmatmul.mubr.msk.f32.vlgmr.msra.gmra.mxu1 %vm498_vm4, %v2592_v35  ;;  %v1707_v55 = vpop.f32.mrf.mxu0 }
 0x316   : > { %2690 = vmatprep.mubr.f32.mxu1 %v7897_v1 }
 0x317   : > { %7518 = vmatmul.mubr.msk.f32.gmra.mxu0 %vm498_vm4, %v2483_v52  ;;  %v1709_v58 = vpop.f32.mrf.mxu0 }
 0x318   : > { %2792 = vmatprep.mubr.f32.mxu0 %v7897_v1 }
 0x319   : > { %7520 = vmatmul.mubr.msk.f32.gmra.mxu1 %vm498_vm4, %v2593_v54  ;;  %v1713_v7 = vpop.f32.mrf.mxu0 }
 0x31a   : > { %2912 = vmatprep.mubr.f32.mxu1 %v7897_v1 }
 0x31b   : > { %v8716_v4 = vpop.f32.mrf.mxu0 }
 0x32b   : > { %v1624_v56 = vpop.f32.mrf.mxu1 }
 0x32c   : > { %v8708_v57 = vadd.f32 %v1707_v55, %v1624_v56 }
 0x32d   : > { %v1626_v37 = vpop.f32.mrf.mxu1 }
 0x32e   : > { %v8710_v59 = vadd.f32 %v1709_v58, %v1626_v37 }
 0x32f   : > { %v1630_v60 = vpop.f32.mrf.mxu1 }
 0x330   : > { %v8712_v34 = vadd.f32 %v1713_v7, %v1630_v60 }
 0x331   : > { %v8714_v63 = vpop.f32.mrf.mxu1 }
 0x3ad   : > { %v1821_v53 = vpop.f32.mrf.mxu1 }
 0x3af   : > { %v1823_v62 = vpop.f32.mrf.mxu1 }
 0x3b1   : > { %v1827_v3 = vpop.f32.mrf.mxu1 }
 0x3b3   : > { %v1829_v11 = vpop.f32.mrf.mxu1 }
 0x3b7   : > { %v1924_v10 = vpop.f32.mrf.mxu0 }
 0x3b8   : > { %v1925_v26 = vadd.f32 %v1924_v10, %v1821_v53 }
 0x3b9   : > { %v1926_v13 = vpop.f32.mrf.mxu0 }
 0x3ba   : > { %v1927_v20 = vadd.f32 %v1926_v13, %v1823_v62 }
 0x3bb   : > { %v2034_v16 = vpop.f32.mrf.mxu1  ;;  %v1930_v12 = vpop.f32.mrf.mxu0 }
 0x3bc   : > { %v2045_v28 = vadd.f32 %v2034_v16, %v1925_v26  ;;  %v1931_v42 = vadd.f32 %v1930_v12, %v1827_v3 }
 0x3bd   : > { %v2036_v21 = vpop.f32.mrf.mxu1  ;;  %v1932_v24 = vpop.f32.mrf.mxu0 }
 0x3be   : > { %v2046_v17 = vadd.f32 %v2036_v21, %v1927_v20  ;;  %v1933_v18 = vadd.f32 %v1932_v24, %v1829_v11  ;;  %v2704_v20 = vpop.permute.xlu0 %2703 }
 0x3c0   : > { %v2040_v25 = vpop.f32.mrf.mxu1 }
 0x3c1   : > { %v2047_v46 = vadd.f32 %v2040_v25, %v1931_v42 }
 0x3c2   : > { %v2042_v8 = vpop.f32.mrf.mxu1  ;;  %v2148_v23 = vpop.f32.mrf.mxu0 }
 0x3c3   : > { %v2159_v33 = vadd.f32 %v2148_v23, %v2045_v28  ;;  %v2048_v52 = vadd.f32 %v2042_v8, %v1933_v18 }
 0x3c4   : > { %v2150_v27 = vpop.f32.mrf.mxu0  ;;  %v2238_v0 = vpop.f32.mrf.mxu1 }
 0x3c5   : > { %v2160_v48 = vadd.f32 %v2150_v27, %v2046_v17  ;;  %v2249_v54 = vadd.f32 %v2238_v0, %v2159_v33 }
 0x3c6   : > { %v2154_v39 = vpop.f32.mrf.mxu0  ;;  %v2240_v40 = vpop.f32.mrf.mxu1 }
 0x3c7   : > { %v2161_v55 = vadd.f32 %v2154_v39, %v2047_v46  ;;  %v2250_v37 = vadd.f32 %v2240_v40, %v2160_v48 }
 0x3c8   : > { %v2156_v19 = vpop.f32.mrf.mxu0  ;;  %v2244_v45 = vpop.f32.mrf.mxu1 }
 0x3c9   : > { %v2162_v60 = vadd.f32 %v2156_v19, %v2048_v52  ;;  %v2251_v3 = vadd.f32 %v2244_v45, %v2161_v55 }
 0x3ca   : > { %v2246_v50 = vpop.f32.mrf.mxu1  ;;  %v2352_v35 = vpop.f32.mrf.mxu0 }
 0x3cb   : > { %v2363_v7 = vadd.f32 %v2352_v35, %v2249_v54  ;;  %v2252_v12 = vadd.f32 %v2246_v50, %v2162_v60 }
 0x3cc   : > { %v2354_v56 = vpop.f32.mrf.mxu0 }
 0x3cd   : > { %v2466_v58 = vpop.f32.mrf.mxu1  ;;  %v2364_v10 = vadd.f32 %v2354_v56, %v2250_v37  ;;  %v2709_v56 = vpop.permute.xlu1 %2708 }
 0x3ce   : > { %v2477_v11 = vadd.f32 %v2466_v58, %v2363_v7 }
 0x3cf   : > { %v2358_v53 = vpop.f32.mrf.mxu0  ;;  %v2468_v62 = vpop.f32.mrf.mxu1 }
 0x3d0   : > { %v2365_v21 = vadd.f32 %v2358_v53, %v2251_v3  ;;  %v2478_v23 = vadd.f32 %v2468_v62, %v2364_v10 }
 0x3d1   : > { %v2360_v13 = vpop.f32.mrf.mxu0  ;;  %v2472_v16 = vpop.f32.mrf.mxu1 }
 0x3d2   : > { %v2366_v8 = vadd.f32 %v2360_v13, %v2252_v12  ;;  %v2479_v28 = vadd.f32 %v2472_v16, %v2365_v21  ;;  %v2720_v16 = vld [vmem:[#allocation7 + $0x10] sm:$0xff]  ;;  %v2721_v21 = vld [vmem:[#allocation7 + $0x18] sm:$0xff] }
 0x3d3   : > { %v2474_v24 = vpop.f32.mrf.mxu1  ;;  %v2572_v25 = vpop.f32.mrf.mxu0 }
 0x3d4   : > { %v2583_v26 = vadd.f32 %v2572_v25, %v2477_v11  ;;  %v2480_v33 = vadd.f32 %v2474_v24, %v2366_v8 }
 0x3d5   : > { %v2574_v27 = vpop.f32.mrf.mxu0  ;;  %v2686_v0 = vpop.f32.mrf.mxu1 }
 0x3d6   : > { %v2584_v39 = vadd.f32 %v2574_v27, %v2478_v23  ;;  %v2697_v40 = vadd.f32 %v2686_v0, %v2583_v26 }
 0x3d7   : > { %v2578_v42 = vpop.f32.mrf.mxu0  ;;  %v2688_v17 = vpop.f32.mrf.mxu1 }
 0x3d8   : > { %v2711_v19 = vadd.f32 %v2704_v20, %v2697_v40  ;;  %v2585_v45 = vadd.f32 %v2578_v42, %v2479_v28  ;;  %v2698_v18 = vadd.f32 %v2688_v17, %v2584_v39 }
 0x3d9   : > { %v2580_v46 = vpop.f32.mrf.mxu0  ;;  %v2692_v48 = vpop.f32.mrf.mxu1 }
 0x3da   : > { %v8718_v50 = vmax.f32 %v2711_v19, 0.0  ;;  %v2712_v35 = vadd.f32 %v2704_v20, %v2698_v18  ;;  %v2586_v52 = vadd.f32 %v2580_v46, %v2480_v33  ;;  %v2699_v54 = vadd.f32 %v2692_v48, %v2585_v45 }
 0x3db   : > { %v2694_v55 = vpop.f32.mrf.mxu1 }
 0x3dc   : > { %v8720_v58 = vmax.f32 %v2712_v35, 0.0  ;;  %v2700_v37 = vadd.f32 %v2694_v55, %v2586_v52  ;;  %2826 = vrot.lane.b32.xlu1 %v8718_v50, %s7898_s3  ;;  %v2713_v60 = vadd.f32 %v2709_v56, %v2699_v54  ;;  %v2812_v53 = vmul.f32 %v8718_v50, %v8227_v61  ;;  %v7524_v35 = vld [vmem:[%s9753_s4 + $0x18] sm:$0xff]  ;;  %v7523_v52 = vld [vmem:[%s9753_s4 + $0x10] sm:$0xff] }
 0x3dd   : > { %v3028_v13 = vmul.f32 %v8718_v50, %v8241_v2  ;;  %v3142_v11 = vmul.f32 %v8718_v50, %v8254_v5  ;;  %v3346_v25 = vmul.f32 %v8152_v29, %v8718_v50  ;;  %v3460_v17 = vmul.f32 %v8166_v36, %v8718_v50 }
 0x3de   : > { %v2714_v7 = vadd.f32 %v2709_v56, %v2700_v37  ;;  %2828 = vrot.lane.b32.xlu0 %v8720_v58, %s7898_s3  ;;  %v2813_v3 = vmul.f32 %v8172_v38, %v8720_v58  ;;  %v8733_v10 = vmax.f32 %v2713_v60, 0.0  ;;  %v3029_v12 = vmul.f32 %v8185_v43, %v8720_v58 }
 0x3df   : > { %v3143_v24 = vmul.f32 %v8200_v51, %v8720_v58  ;;  %v3347_v8 = vmul.f32 %v8720_v58, %v8267_v9  ;;  %v3461_v39 = vmul.f32 %v8720_v58, %v8282_v14  ;;  %v3681_v46 = vmul.f32 %v8720_v58, %v8299_v22 }
 0x3e0   : > { %v8728_v62 = vmax.f32 %v2714_v7, 0.0  ;;  %2929 = vrot.lane.b32.xlu1 %v2812_v53, %s7903_s25  ;;  %v3348_v23 = vmul.f32 %v8152_v29, %v8733_v10  ;;  %v3462_v26 = vmul.f32 %v8166_v36, %v8733_v10  ;;  %v2814_v27 = vmul.f32 %v8733_v10, %v8227_v61 }
 0x3e1   : > { %v3030_v20 = vmul.f32 %v8733_v10, %v8241_v2  ;;  %v3144_v42 = vmul.f32 %v8733_v10, %v8254_v5  ;;  %v3682_v45 = vmul.f32 %v8287_v15, %v8733_v10  ;;  %v3680_v48 = vmul.f32 %v8287_v15, %v8718_v50 }
 0x3e2   : > { %2756 = vmatprep.subr.mxu0 %v8728_v62  ;;  %2931 = vrot.lane.b32.xlu0 %v2813_v3, %s7903_s25  ;;  %v2815_v0 = vmul.f32 %v8172_v38, %v8728_v62  ;;  %v3031_v28 = vmul.f32 %v8185_v43, %v8728_v62  ;;  %v3145_v40 = vmul.f32 %v8200_v51, %v8728_v62 }
 0x3e3   : > { %2757 = vmatpush1.msra.mxu0 %v8733_v10  ;;  %v3349_v33 = vmul.f32 %v8728_v62, %v8267_v9  ;;  %v3463_v19 = vmul.f32 %v8728_v62, %v8282_v14  ;;  %v3683_v18 = vmul.f32 %v8728_v62, %v8299_v22 }
 0x3e4   : > { %2758 = vmatprep.subr.mxu0 %v8720_v58  ;;  %3039 = vrot.lane.b32.xlu1 %v3028_v13, %s7904_s22 }
 0x3e5   : > { %2759 = vmatpush1.msra.mxu0 %v8718_v50 }
 0x3e6   : > { %3041 = vrot.lane.b32.xlu0 %v3029_v12, %s7904_s22  ;;  %7521 = vmatmul.mubr.msk.f32.vlgmr.msra.gmra.mxu0 %vm498_vm4, %v2720_v16 }
 0x3e7   : > { %2798 = vmatprep.mubr.f32.mxu0 %v7897_v1 }
 0x3e8   : > { %3153 = vrot.lane.b32.xlu1 %v3142_v11, %s7902_s24 }
 0x3ea   : > { %3155 = vrot.lane.b32.xlu0 %v3143_v24, %s7902_s24  ;;  %7522 = vmatmul.mubr.msk.f32.gmra.mxu0 %vm498_vm4, %v2721_v21 }
 0x3eb   : > { %3015 = vmatprep.mubr.f32.mxu0 %v7897_v1 }
 0x3ec   : > { %3357 = vrot.lane.b32.xlu1 %v3346_v25, %s7900_s21 }
 0x3ee   : > { %2832 = vrot.lane.b32.xlu0 %v8728_v62, %s7898_s3 }
 0x3f0   : > { %2830 = vrot.lane.b32.xlu1 %v8733_v10, %s7898_s3 }
 0x3f2   : > { %3361 = vrot.lane.b32.xlu0 %v3348_v23, %s7900_s21  ;;  %v2820_v23 = vld [vmem:[#allocation5 + $0xa0] sm:$0xff] }
 0x3f4   : > { %3359 = vrot.lane.b32.xlu1 %v3347_v8, %s7900_s21 }
 0x3f6   : > { %3475 = vrot.lane.b32.xlu0 %v3462_v26, %s7901_s18 }
 0x3f8   : > { %2933 = vrot.lane.b32.xlu1 %v2814_v27, %s7903_s25 }
 0x3fa   : > { %2935 = vrot.lane.b32.xlu0 %v2815_v0, %s7903_s25  ;;  %v2821_v0 = vld [vmem:[#allocation5 + $0xa8] sm:$0xff] }
 0x3fc   : > { %3043 = vrot.lane.b32.xlu1 %v3030_v20, %s7904_s22 }
 0x3fe   : > { %3045 = vrot.lane.b32.xlu0 %v3031_v28, %s7904_s22 }
 0x400   : > { %3473 = vrot.lane.b32.xlu1 %v3461_v39, %s7901_s18 }
 0x402   : > { %3159 = vrot.lane.b32.xlu0 %v3145_v40, %s7902_s24 }
 0x404   : > { %3157 = vrot.lane.b32.xlu1 %v3144_v42, %s7902_s24 }
 0x406   : > { %3471 = vrot.lane.b32.xlu0 %v3460_v17, %s7901_s18 }
 0x408   : > { %3583 = vrot.lane.b32.xlu1 %v8728_v62, %s7905_s15 }
 0x40a   : > { %3581 = vrot.lane.b32.xlu0 %v8733_v10, %s7905_s15 }
 0x40c   : > { %3363 = vrot.lane.b32.xlu1 %v3349_v33, %s7900_s21  ;;  %v2817_v33 = vld [vmem:[#allocation5 + $0x90] sm:$0xff] }
 0x40e   : > { %3477 = vrot.lane.b32.xlu0 %v3463_v19, %s7901_s18 }
 0x410   : > { %3579 = vrot.lane.b32.xlu1 %v8720_v58, %s7905_s15 }
 0x412   : > { %3695 = vrot.lane.b32.xlu0 %v3682_v45, %s7899_s19 }
 0x414   : > { %3577 = vrot.lane.b32.xlu1 %v8718_v50, %s7905_s15 }
 0x416   : > { %3697 = vrot.lane.b32.xlu0 %v3683_v18, %s7899_s19 }
 0x418   : > { %3693 = vrot.lane.b32.xlu1 %v3681_v46, %s7899_s19 }
 0x41a   : > { %3691 = vrot.lane.b32.xlu0 %v3680_v48, %s7899_s19 }
 0x41c   : > { %3801 = vperm.xlu1 %7739, %v7524_v35  }
 0x41e   : > { %3796 = vperm.xlu0 %7738, %v7523_v52   ;;  %v3033_v52 = vld [vmem:[#allocation5 + $0xb0] sm:$0xff] }
 0x44e   : > { %v2827_v54 = vpop.permute.xlu1 %2826 }
 0x44f   : > { %v2834_v26 = vsel %vm498_vm4, %v8178_v41, %v2827_v54 }
 0x450   : > { %v2829_v55 = vpop.permute.xlu0 %2828 }
 0x451   : > { %v2835_v25 = vsel %vm498_vm4, %v2827_v54, %v2829_v55 }
 0x452   : > { %v2930_v56 = vpop.permute.xlu1 %2929 }
 0x453   : > { %v2937_v45 = vsel %vm605_vm10, %v8319_v30, %v2930_v56 }
 0x454   : > { %v2932_v37 = vpop.permute.xlu0 %2931 }
 0x455   : > { %v2938_v17 = vsel %vm605_vm10, %v2930_v56, %v2932_v37  ;;  %v2818_v56 = vld [vmem:[#allocation5 + $0x98] sm:$0xff] }
 0x456   : > { %v3040_v60 = vpop.permute.xlu1 %3039 }
 0x457   : > { %v3047_v55 = vsel %vm731_vm9, %v8321_v31, %v3040_v60 }
 0x458   : > { %v3042_v7 = vpop.permute.xlu0 %3041 }
 0x459   : > { %v3048_v35 = vsel %vm731_vm9, %v3040_v60, %v3042_v7  ;;  %v3034_v60 = vld [vmem:[#allocation5 + $0xb8] sm:$0xff] }
 0x45a   : > { %v8828_v53 = vpop.permute.xlu1 %3153 }
 0x45c   : > { %v3156_v3 = vpop.permute.xlu0 %3155 }
 0x45e   : > { %v8830_v13 = vpop.permute.xlu1 %3357 }
 0x460   : > { %v2833_v16 = vpop.permute.xlu0 %2832 }
 0x462   : > { %v2831_v12 = vpop.permute.xlu1 %2830 }
 0x463   : > { %v2837_v11 = vsel %vm498_vm4, %v2831_v12, %v2833_v16  ;;  %v2836_v21 = vsel %vm498_vm4, %v8178_v41, %v2831_v12 }
 0x464   : > { %v8835_v24 = vpop.permute.xlu0 %3361  ;;  %2876 = vmatprep.subr.mxu1 %v2837_v11 }
 0x465   : > { %2877 = vmatpush1.msra.mxu1 %v2836_v21  ;;  %v3147_v21 = vld [vmem:[#allocation5 + $0xc0] sm:$0xff] }
 0x466   : > { %2878 = vmatprep.subr.mxu1 %v2835_v25  ;;  %v8838_v8 = vpop.permute.xlu1 %3359  ;;  %v3257_v25 = vld [vmem:[#allocation5 + $0xd0] sm:$0xff] }
 0x467   : > { %2879 = vmatpush1.msra.mxu1 %v2834_v26 }
 0x468   : > { %v8842_v27 = vpop.permute.xlu0 %3475  ;;  %7525 = vmatmul.mubr.msk.f32.vlgmr.msra.gmra.mxu1 %vm498_vm4, %v2820_v23 }
 0x469   : > { %2918 = vmatprep.mubr.f32.mxu1 %v7897_v1 }
 0x46a   : > { %v2934_v20 = vpop.permute.xlu1 %2933 }
 0x46b   : > { %v2939_v42 = vsel %vm605_vm10, %v8319_v30, %v2934_v20 }
 0x46c   : > { %v2936_v28 = vpop.permute.xlu0 %2935  ;;  %7526 = vmatmul.mubr.msk.f32.gmra.mxu1 %vm498_vm4, %v2821_v0  ;;  %v3258_v0 = vld [vmem:[#allocation5 + $0xd8] sm:$0xff] }
 0x46d   : > { %v2940_v39 = vsel %vm605_vm10, %v2934_v20, %v2936_v28  ;;  %3125 = vmatprep.mubr.f32.mxu1 %v7897_v1 }
 0x46e   : > { %v3044_v40 = vpop.permute.xlu1 %3043  ;;  %2979 = vmatprep.subr.mxu0 %v2940_v39  ;;  %v3366_v39 = vsel %vm831_vm7, %v8838_v8, %v8333_v47 }
 0x46f   : > { %2980 = vmatpush1.msra.mxu0 %v2939_v42  ;;  %v3049_v48 = vsel %vm731_vm9, %v8321_v31, %v3044_v40  ;;  %v3365_v42 = vsel %vm831_vm7, %v8830_v13, %v8838_v8 }
 0x470   : > { %v3046_v19 = vpop.permute.xlu0 %3045  ;;  %2981 = vmatprep.subr.mxu0 %v2938_v17 }
 0x471   : > { %2982 = vmatpush1.msra.mxu0 %v2937_v45  ;;  %v3050_v18 = vsel %vm731_vm9, %v3044_v40, %v3046_v19  ;;  %v3351_v40 = vld [vmem:[#allocation5 + $0xe0] sm:$0xff]  ;;  %v3465_v19 = vld [vmem:[#allocation5 + $0xf0] sm:$0xff] }
 0x472   : > { %3089 = vmatprep.subr.mxu1 %v3050_v18  ;;  %v8855_v46 = vpop.permute.xlu1 %3473  ;;  %7527 = vmatmul.mubr.msk.f32.vlgmr.msra.gmra.mxu0 %vm498_vm4, %v2817_v33  ;;  %v3352_v18 = vld [vmem:[#allocation5 + $0xe8] sm:$0xff] }
 0x473   : > { %3090 = vmatpush1.msra.mxu1 %v3049_v48  ;;  %3021 = vmatprep.mubr.f32.mxu0 %v7897_v1  ;;  %v3480_v33 = vsel %vm703_vm6, %v8855_v46, %v8335_v49 }
 0x474   : > { %v3160_v54 = vpop.permute.xlu0 %3159  ;;  %3091 = vmatprep.subr.mxu1 %v3048_v35 }
 0x475   : > { %3092 = vmatpush1.msra.mxu1 %v3047_v55 }
 0x476   : > { %7529 = vmatmul.mubr.msk.f32.vlgmr.msra.gmra.mxu1 %vm498_vm4, %v3033_v52  ;;  %3293 = vmatprep.subr.mxu1 %v8728_v62  ;;  %v3158_v37 = vpop.permute.xlu1 %3157  ;;  %v3162_v62 = vsel %vm859_vm8, %v8828_v53, %v3156_v3 }
 0x477   : > { %7528 = vmatmul.mubr.msk.f32.gmra.mxu0 %vm498_vm4, %v2818_v56  ;;  %3294 = vmatpush1.msra.mxu1 %v8733_v10  ;;  %v3164_v7 = vsel %vm859_vm8, %v3158_v37, %v3160_v54  ;;  %v3163_v16 = vsel %vm859_vm8, %v8323_v32, %v3158_v37  ;;  %v3161_v10 = vsel %vm859_vm8, %v8323_v32, %v8828_v53  ;;  %v3575_v37 = vld [vmem:[#allocation5 + $0x100] sm:$0xff] }
 0x478   : > { %v3472_v12 = vpop.permute.xlu0 %3471  ;;  %3203 = vmatprep.subr.mxu0 %v3164_v7  ;;  %3295 = vmatprep.subr.mxu1 %v8720_v58 }
 0x479   : > { %3131 = vmatprep.mubr.f32.mxu1 %v7897_v1  ;;  %3204 = vmatpush1.msra.mxu0 %v3163_v16  ;;  %v3479_v45 = vsel %vm703_vm6, %v3472_v12, %v8855_v46  ;;  %v3466_v46 = vld [vmem:[#allocation5 + $0xf8] sm:$0xff] }
 0x47a   : > { %3296 = vmatpush1.msra.mxu1 %v8718_v50  ;;  %v3584_v11 = vpop.permute.xlu1 %3583  ;;  %3205 = vmatprep.subr.mxu0 %v3162_v62  ;;  %v3148_v50 = vld [vmem:[#allocation5 + $0xc8] sm:$0xff] }
 0x47b   : > { %7530 = vmatmul.mubr.msk.f32.gmra.mxu1 %vm498_vm4, %v3034_v60  ;;  %3206 = vmatpush1.msra.mxu0 %v3161_v10  ;;  %v3685_v60 = vld [vmem:[#allocation5 + $0x110] sm:$0xff]  ;;  %v3576_v62 = vld [vmem:[#allocation5 + $0x108] sm:$0xff] }
 0x47c   : > { %3239 = vmatprep.mubr.f32.mxu0 %v7897_v1  ;;  %v3582_v58 = vpop.permute.xlu0 %3581  ;;  %3329 = vmatprep.mubr.f32.mxu1 %v7897_v1 }
 0x47d   : > { %7531 = vmatmul.mubr.msk.f32.vlgmr.msra.gmra.mxu0 %vm498_vm4, %v3147_v21  ;;  %v3587_v8 = vsel %vm1310_vm11, %v3582_v58, %v3584_v11 }
 0x47e   : > { %v3364_v3 = vpop.permute.xlu1 %3363  ;;  %3245 = vmatprep.mubr.f32.mxu0 %v7897_v1 }
 0x47f   : > { %7533 = vmatmul.mubr.msk.f32.vlgmr.msra.gmra.mxu1 %vm498_vm4, %v3257_v25  ;;  %v3368_v53 = vsel %vm831_vm7, %v3364_v3, %v8333_v47  ;;  %v3367_v23 = vsel %vm831_vm7, %v8835_v24, %v3364_v3 }
 0x480   : > { %v3478_v26 = vpop.permute.xlu0 %3477  ;;  %3407 = vmatprep.subr.mxu0 %v3368_v53  ;;  %3335 = vmatprep.mubr.f32.mxu1 %v7897_v1 }
 0x481   : > { %7532 = vmatmul.mubr.msk.f32.gmra.mxu0 %vm498_vm4, %v3148_v50  ;;  %v3482_v20 = vsel %vm703_vm6, %v3478_v26, %v8335_v49  ;;  %v3481_v24 = vsel %vm703_vm6, %v8842_v27, %v3478_v26  ;;  %v3588_v27 = vsel %vm1310_vm11, %v3584_v11, %v8362_v6  ;;  %v3686_v11 = vld [vmem:[#allocation5 + $0x118] sm:$0xff] }
 0x482   : > { %3408 = vmatpush1.msra.mxu0 %v3367_v23  ;;  %3521 = vmatprep.subr.mxu1 %v3482_v20  ;;  %v3580_v28 = vpop.permute.xlu1 %3579 }
 0x483   : > { %7534 = vmatmul.mubr.msk.f32.gmra.mxu1 %vm498_vm4, %v3258_v0  ;;  %3409 = vmatprep.subr.mxu0 %v3366_v39  ;;  %v3586_v35 = vsel %vm1310_vm11, %v3580_v28, %v8362_v6 }
 0x484   : > { %3410 = vmatpush1.msra.mxu0 %v3365_v42  ;;  %3443 = vmatprep.mubr.f32.mxu0 %v7897_v1  ;;  %v3696_v17 = vpop.permute.xlu0 %3695 }
 0x485   : > { %3522 = vmatpush1.msra.mxu1 %v3481_v24  ;;  %7535 = vmatmul.mubr.msk.f32.vlgmr.msra.gmra.mxu0 %vm498_vm4, %v3351_v40 }
 0x486   : > { %3523 = vmatprep.subr.mxu1 %v3480_v33  ;;  %3627 = vmatprep.subr.mxu0 %v3588_v27  ;;  %v3578_v13 = vpop.permute.xlu1 %3577 }
 0x487   : > { %3524 = vmatpush1.msra.mxu1 %v3479_v45  ;;  %3557 = vmatprep.mubr.f32.mxu1 %v7897_v1  ;;  %v3585_v48 = vsel %vm1310_vm11, %v3578_v13, %v3580_v28 }
 0x488   : > { %3628 = vmatpush1.msra.mxu0 %v3587_v8  ;;  %7537 = vmatmul.mubr.msk.f32.vlgmr.msra.gmra.mxu1 %vm498_vm4, %v3465_v19  ;;  %v3698_v52 = vpop.permute.xlu0 %3697 }
 0x489   : > { %3629 = vmatprep.subr.mxu0 %v3586_v35  ;;  %3449 = vmatprep.mubr.f32.mxu0 %v7897_v1  ;;  %v3702_v54 = vsel %vm468_vm5, %v3698_v52, %v8404_v44  ;;  %v3701_v56 = vsel %vm468_vm5, %v3696_v17, %v3698_v52 }
 0x48a   : > { %7536 = vmatmul.mubr.msk.f32.gmra.mxu0 %vm498_vm4, %v3352_v18  ;;  %3563 = vmatprep.mubr.f32.mxu1 %v7897_v1  ;;  %v3694_v55 = vpop.permute.xlu1 %3693 }
 0x48b   : > { %3630 = vmatpush1.msra.mxu0 %v3585_v48  ;;  %3741 = vmatprep.subr.mxu1 %v3702_v54  ;;  %v3700_v7 = vsel %vm468_vm5, %v3694_v55, %v8404_v44 }
 0x48c   : > { %7538 = vmatmul.mubr.msk.f32.gmra.mxu1 %vm498_vm4, %v3466_v46  ;;  %3663 = vmatprep.mubr.f32.mxu0 %v7897_v1  ;;  %v3692_v16 = vpop.permute.xlu0 %3691 }
 0x48d   : > { %3742 = vmatpush1.msra.mxu1 %v3701_v56  ;;  %v3699_v12 = vsel %vm468_vm5, %v3692_v16, %v3694_v55  ;;  %3777 = vmatprep.mubr.f32.mxu1 %v7897_v1 }
 0x48e   : > { %7539 = vmatmul.mubr.msk.f32.vlgmr.msra.gmra.mxu0 %vm498_vm4, %v3575_v37  ;;  %3743 = vmatprep.subr.mxu1 %v3700_v7 }
 0x48f   : > { %3744 = vmatpush1.msra.mxu1 %v3699_v12  ;;  %3669 = vmatprep.mubr.f32.mxu0 %v7897_v1 }
 0x490   : > { %7541 = vmatmul.mubr.msk.f32.vlgmr.msra.gmra.mxu1 %vm498_vm4, %v3685_v60 }
 0x491   : > { %3783 = vmatprep.mubr.f32.mxu1 %v7897_v1 }
 0x492   : > { %7540 = vmatmul.mubr.msk.f32.gmra.mxu0 %vm498_vm4, %v3576_v62 }
 0x493   : > { %3885 = vmatprep.mubr.f32.mxu0 %v7897_v1 }
 0x494   : > { %7542 = vmatmul.mubr.msk.f32.gmra.mxu1 %vm498_vm4, %v3686_v11 }
 0x495   : > { %4005 = vmatprep.mubr.f32.mxu1 %v7897_v1 }
 0x4a6   : > { %v2794_v10 = vpop.f32.mrf.mxu0 }
 0x4a7   : > { %v8938_v21 = vadd.f32 %v2794_v10, %v8708_v57 }
 0x4a8   : > { %v2796_v58 = vpop.f32.mrf.mxu0 }
 0x4a9   : > { %v8941_v25 = vadd.f32 %v2796_v58, %v8710_v59 }
 0x4aa   : > { %v2800_v3 = vpop.f32.mrf.mxu0 }
 0x4ab   : > { %v8944_v50 = vadd.f32 %v2800_v3, %v8712_v34 }
 0x4ac   : > { %v8946_v0 = vpop.f32.mrf.mxu0 }
 0x528   : > { %v2914_v53 = vpop.f32.mrf.mxu1 }
 0x52a   : > { %v2916_v23 = vpop.f32.mrf.mxu1 }
 0x52c   : > { %v2920_v26 = vpop.f32.mrf.mxu1 }
 0x52e   : > { %v2922_v28 = vpop.f32.mrf.mxu1 }
 0x532   : > { %v3017_v20 = vpop.f32.mrf.mxu0 }
 0x533   : > { %v3018_v27 = vadd.f32 %v3017_v20, %v2914_v53 }
 0x534   : > { %v3019_v39 = vpop.f32.mrf.mxu0 }
 0x535   : > { %v3020_v34 = vadd.f32 %v3019_v39, %v2916_v23 }
 0x536   : > { %v3127_v24 = vpop.f32.mrf.mxu1 }
 0x537   : > { %v3023_v40 = vpop.f32.mrf.mxu0  ;;  %v3138_v13 = vadd.f32 %v3127_v24, %v3018_v27 }
 0x538   : > { %v3129_v57 = vpop.f32.mrf.mxu1  ;;  %v3024_v48 = vadd.f32 %v3023_v40, %v2920_v26 }
 0x539   : > { %v3025_v42 = vpop.f32.mrf.mxu0  ;;  %v3139_v35 = vadd.f32 %v3129_v57, %v3020_v34 }
 0x53a   : > { %v3026_v55 = vadd.f32 %v3025_v42, %v2922_v28 }
 0x53b   : > { %v3133_v17 = vpop.f32.mrf.mxu1 }
 0x53c   : > { %v3140_v56 = vadd.f32 %v3133_v17, %v3024_v48 }
 0x53d   : > { %v3135_v33 = vpop.f32.mrf.mxu1  ;;  %v3241_v59 = vpop.f32.mrf.mxu0 }
 0x53e   : > { %v3252_v52 = vadd.f32 %v3241_v59, %v3138_v13  ;;  %v3141_v12 = vadd.f32 %v3135_v33, %v3026_v55  ;;  %v3797_v13 = vpop.permute.xlu0 %3796 }
 0x53f   : > { %v3243_v19 = vpop.f32.mrf.mxu0  ;;  %v3331_v45 = vpop.f32.mrf.mxu1 }
 0x540   : > { %v3253_v37 = vadd.f32 %v3243_v19, %v3139_v35  ;;  %v3342_v60 = vadd.f32 %v3331_v45, %v3252_v52 }
 0x541   : > { %v3247_v8 = vpop.f32.mrf.mxu0  ;;  %v3333_v18 = vpop.f32.mrf.mxu1 }
 0x542   : > { %v3254_v62 = vadd.f32 %v3247_v8, %v3140_v56  ;;  %v3343_v58 = vadd.f32 %v3333_v18, %v3253_v37 }
 0x543   : > { %v3249_v46 = vpop.f32.mrf.mxu0  ;;  %v3337_v54 = vpop.f32.mrf.mxu1 }
 0x544   : > { %v3255_v3 = vadd.f32 %v3249_v46, %v3141_v12  ;;  %v3344_v26 = vadd.f32 %v3337_v54, %v3254_v62 }
 0x545   : > { %v3339_v7 = vpop.f32.mrf.mxu1  ;;  %v3445_v16 = vpop.f32.mrf.mxu0 }
 0x546   : > { %v3456_v53 = vadd.f32 %v3445_v16, %v3342_v60  ;;  %v3345_v57 = vadd.f32 %v3339_v7, %v3255_v3 }
 0x547   : > { %v3447_v11 = vpop.f32.mrf.mxu0 }
 0x548   : > { %v3559_v10 = vpop.f32.mrf.mxu1  ;;  %v3457_v39 = vadd.f32 %v3447_v11, %v3343_v58 }
 0x549   : > { %v3570_v28 = vadd.f32 %v3559_v10, %v3456_v53  ;;  %v3802_v10 = vpop.permute.xlu1 %3801 }
 0x54a   : > { %v3451_v23 = vpop.f32.mrf.mxu0  ;;  %v3561_v20 = vpop.f32.mrf.mxu1 }
 0x54b   : > { %v3458_v42 = vadd.f32 %v3451_v23, %v3344_v26  ;;  %v3571_v27 = vadd.f32 %v3561_v20, %v3457_v39 }
 0x54c   : > { %v3453_v24 = vpop.f32.mrf.mxu0  ;;  %v3565_v40 = vpop.f32.mrf.mxu1 }
 0x54d   : > { %v3459_v33 = vadd.f32 %v3453_v24, %v3345_v57  ;;  %v3572_v8 = vadd.f32 %v3565_v40, %v3458_v42  ;;  %v3813_v57 = vld [vmem:[#allocation7 + $0x20] sm:$0xff] }
 0x54e   : > { %v3567_v17 = vpop.f32.mrf.mxu1  ;;  %v3665_v59 = vpop.f32.mrf.mxu0 }
 0x54f   : > { %v3676_v19 = vadd.f32 %v3665_v59, %v3570_v28  ;;  %v3573_v46 = vadd.f32 %v3567_v17, %v3459_v33  ;;  %v3814_v17 = vld [vmem:[#allocation7 + $0x28] sm:$0xff] }
 0x550   : > { %v3667_v45 = vpop.f32.mrf.mxu0  ;;  %v3779_v34 = vpop.f32.mrf.mxu1 }
 0x551   : > { %v3677_v18 = vadd.f32 %v3667_v45, %v3571_v27  ;;  %v3790_v48 = vadd.f32 %v3779_v34, %v3676_v19 }
 0x552   : > { %v3671_v35 = vpop.f32.mrf.mxu0  ;;  %v3781_v52 = vpop.f32.mrf.mxu1 }
 0x553   : > { %v3804_v54 = vadd.f32 %v3797_v13, %v3790_v48  ;;  %v3678_v55 = vadd.f32 %v3671_v35, %v3572_v8  ;;  %v3791_v56 = vadd.f32 %v3781_v52, %v3677_v18 }
 0x554   : > { %v3673_v37 = vpop.f32.mrf.mxu0  ;;  %v3785_v7 = vpop.f32.mrf.mxu1 }
 0x555   : > { %v8948_v16 = vmax.f32 %v3804_v54, 0.0  ;;  %v3805_v12 = vadd.f32 %v3797_v13, %v3791_v56  ;;  %v3679_v60 = vadd.f32 %v3673_v37, %v3573_v46  ;;  %v3792_v62 = vadd.f32 %v3785_v7, %v3678_v55 }
 0x556   : > { %v3787_v11 = vpop.f32.mrf.mxu1 }
 0x557   : > { %v8950_v58 = vmax.f32 %v3805_v12, 0.0  ;;  %v3793_v3 = vadd.f32 %v3787_v11, %v3679_v60  ;;  %3919 = vrot.lane.b32.xlu1 %v8948_v16, %s7898_s3  ;;  %v3806_v53 = vadd.f32 %v3802_v10, %v3792_v62  ;;  %v3905_v20 = vmul.f32 %v8948_v16, %v8227_v61  ;;  %v7546_v60 = vld [vmem:[%s9753_s4 + $0x28] sm:$0xff]  ;;  %v7545_v62 = vld [vmem:[%s9753_s4 + $0x20] sm:$0xff] }
 0x558   : > { %v4121_v40 = vmul.f32 %v8948_v16, %v8241_v2  ;;  %v4235_v42 = vmul.f32 %v8948_v16, %v8254_v5  ;;  %v4439_v27 = vmul.f32 %v8152_v29, %v8948_v16  ;;  %v4553_v46 = vmul.f32 %v8166_v36, %v8948_v16 }
 0x559   : > { %v3807_v23 = vadd.f32 %v3802_v10, %v3793_v3  ;;  %3921 = vrot.lane.b32.xlu0 %v8950_v58, %s7898_s3  ;;  %v3906_v39 = vmul.f32 %v8172_v38, %v8950_v58  ;;  %v8963_v24 = vmax.f32 %v3806_v53, 0.0  ;;  %v4122_v28 = vmul.f32 %v8185_v43, %v8950_v58 }
 0x55a   : > { %v4236_v59 = vmul.f32 %v8200_v51, %v8950_v58  ;;  %v4440_v19 = vmul.f32 %v8950_v58, %v8267_v9  ;;  %v4554_v48 = vmul.f32 %v8950_v58, %v8282_v14  ;;  %v4774_v7 = vmul.f32 %v8950_v58, %v8299_v22 }
 0x55b   : > { %v8958_v26 = vmax.f32 %v3807_v23, 0.0  ;;  %4022 = vrot.lane.b32.xlu1 %v3905_v20, %s7903_s25  ;;  %v4441_v33 = vmul.f32 %v8152_v29, %v8963_v24  ;;  %v4555_v45 = vmul.f32 %v8166_v36, %v8963_v24  ;;  %v3907_v34 = vmul.f32 %v8963_v24, %v8227_v61 }
 0x55c   : > { %v4123_v8 = vmul.f32 %v8963_v24, %v8241_v2  ;;  %v4237_v52 = vmul.f32 %v8963_v24, %v8254_v5  ;;  %v4775_v56 = vmul.f32 %v8287_v15, %v8963_v24  ;;  %v4773_v12 = vmul.f32 %v8287_v15, %v8948_v16 }
 0x55d   : > { %3849 = vmatprep.subr.mxu0 %v8958_v26  ;;  %4024 = vrot.lane.b32.xlu0 %v3906_v39, %s7903_s25  ;;  %v3908_v13 = vmul.f32 %v8172_v38, %v8958_v26  ;;  %v4124_v18 = vmul.f32 %v8185_v43, %v8958_v26  ;;  %v4238_v35 = vmul.f32 %v8200_v51, %v8958_v26 }
 0x55e   : > { %3850 = vmatpush1.msra.mxu0 %v8963_v24  ;;  %v4442_v54 = vmul.f32 %v8958_v26, %v8267_v9  ;;  %v4556_v55 = vmul.f32 %v8958_v26, %v8282_v14  ;;  %v4776_v37 = vmul.f32 %v8958_v26, %v8299_v22 }
 0x55f   : > { %3851 = vmatprep.subr.mxu0 %v8950_v58  ;;  %4132 = vrot.lane.b32.xlu1 %v4121_v40, %s7904_s22 }
 0x560   : > { %3852 = vmatpush1.msra.mxu0 %v8948_v16 }
 0x561   : > { %4134 = vrot.lane.b32.xlu0 %v4122_v28, %s7904_s22  ;;  %7543 = vmatmul.mubr.msk.f32.vlgmr.msra.gmra.mxu0 %vm498_vm4, %v3813_v57 }
 0x562   : > { %3891 = vmatprep.mubr.f32.mxu0 %v7897_v1 }
 0x563   : > { %4246 = vrot.lane.b32.xlu1 %v4235_v42, %s7902_s24 }
 0x565   : > { %4248 = vrot.lane.b32.xlu0 %v4236_v59, %s7902_s24  ;;  %7544 = vmatmul.mubr.msk.f32.gmra.mxu0 %vm498_vm4, %v3814_v17 }
 0x566   : > { %4108 = vmatprep.mubr.f32.mxu0 %v7897_v1 }
 0x567   : > { %4450 = vrot.lane.b32.xlu1 %v4439_v27, %s7900_s21 }
 0x569   : > { %3925 = vrot.lane.b32.xlu0 %v8958_v26, %s7898_s3 }
 0x56b   : > { %3923 = vrot.lane.b32.xlu1 %v8963_v24, %s7898_s3 }
 0x56d   : > { %4454 = vrot.lane.b32.xlu0 %v4441_v33, %s7900_s21 }
 0x56f   : > { %4452 = vrot.lane.b32.xlu1 %v4440_v19, %s7900_s21  ;;  %v3913_v19 = vld [vmem:[#allocation5 + $0x130] sm:$0xff] }
 0x571   : > { %4568 = vrot.lane.b32.xlu0 %v4555_v45, %s7901_s18 }
 0x573   : > { %4026 = vrot.lane.b32.xlu1 %v3907_v34, %s7903_s25 }
 0x575   : > { %4028 = vrot.lane.b32.xlu0 %v3908_v13, %s7903_s25 }
 0x577   : > { %4136 = vrot.lane.b32.xlu1 %v4123_v8, %s7904_s22  ;;  %v3914_v8 = vld [vmem:[#allocation5 + $0x138] sm:$0xff] }
 0x579   : > { %4138 = vrot.lane.b32.xlu0 %v4124_v18, %s7904_s22 }
 0x57b   : > { %4566 = vrot.lane.b32.xlu1 %v4554_v48, %s7901_s18 }
 0x57d   : > { %4252 = vrot.lane.b32.xlu0 %v4238_v35, %s7902_s24 }
 0x57f   : > { %4250 = vrot.lane.b32.xlu1 %v4237_v52, %s7902_s24 }
 0x581   : > { %4564 = vrot.lane.b32.xlu0 %v4553_v46, %s7901_s18 }
 0x583   : > { %4676 = vrot.lane.b32.xlu1 %v8958_v26, %s7905_s15 }
 0x585   : > { %4674 = vrot.lane.b32.xlu0 %v8963_v24, %s7905_s15 }
 0x587   : > { %4456 = vrot.lane.b32.xlu1 %v4442_v54, %s7900_s21 }
 0x589   : > { %4570 = vrot.lane.b32.xlu0 %v4556_v55, %s7901_s18  ;;  %v3910_v55 = vld [vmem:[#allocation5 + $0x120] sm:$0xff] }
 0x58b   : > { %4672 = vrot.lane.b32.xlu1 %v8950_v58, %s7905_s15 }
 0x58d   : > { %4788 = vrot.lane.b32.xlu0 %v4775_v56, %s7899_s19 }
 0x58f   : > { %4670 = vrot.lane.b32.xlu1 %v8948_v16, %s7905_s15 }
 0x591   : > { %4790 = vrot.lane.b32.xlu0 %v4776_v37, %s7899_s19 }
 0x593   : > { %4786 = vrot.lane.b32.xlu1 %v4774_v7, %s7899_s19 }
 0x595   : > { %4784 = vrot.lane.b32.xlu0 %v4773_v12, %s7899_s19 }
 0x597   : > { %4894 = vperm.xlu1 %7739, %v7546_v60  }
 0x599   : > { %4889 = vperm.xlu0 %7738, %v7545_v62  }
 0x5c9   : > { %v3920_v11 = vpop.permute.xlu1 %3919 }
 0x5ca   : > { %v3927_v34 = vsel %vm498_vm4, %v8178_v41, %v3920_v11 }
 0x5cb   : > { %v3922_v10 = vpop.permute.xlu0 %3921 }
 0x5cc   : > { %v3928_v33 = vsel %vm498_vm4, %v3920_v11, %v3922_v10  ;;  %v4126_v11 = vld [vmem:[#allocation5 + $0x140] sm:$0xff] }
 0x5cd   : > { %v4023_v3 = vpop.permute.xlu1 %4022 }
 0x5ce   : > { %v4030_v37 = vsel %vm605_vm10, %v8319_v30, %v4023_v3 }
 0x5cf   : > { %v4025_v53 = vpop.permute.xlu0 %4024 }
 0x5d0   : > { %v4031_v54 = vsel %vm605_vm10, %v4023_v3, %v4025_v53  ;;  %v3911_v53 = vld [vmem:[#allocation5 + $0x128] sm:$0xff] }
 0x5d1   : > { %v4133_v23 = vpop.permute.xlu1 %4132 }
 0x5d2   : > { %v4140_v3 = vsel %vm731_vm9, %v8321_v31, %v4133_v23 }
 0x5d3   : > { %v4135_v20 = vpop.permute.xlu0 %4134 }
 0x5d4   : > { %v4141_v62 = vsel %vm731_vm9, %v4133_v23, %v4135_v20  ;;  %v4127_v23 = vld [vmem:[#allocation5 + $0x148] sm:$0xff] }
 0x5d5   : > { %v9058_v39 = vpop.permute.xlu1 %4246 }
 0x5d7   : > { %v4249_v40 = vpop.permute.xlu0 %4248 }
 0x5d9   : > { %v9060_v57 = vpop.permute.xlu1 %4450 }
 0x5db   : > { %v3926_v28 = vpop.permute.xlu0 %3925 }
 0x5dd   : > { %v3924_v42 = vpop.permute.xlu1 %3923 }
 0x5de   : > { %v3929_v17 = vsel %vm498_vm4, %v8178_v41, %v3924_v42  ;;  %v3930_v59 = vsel %vm498_vm4, %v3924_v42, %v3926_v28 }
 0x5df   : > { %v9065_v27 = vpop.permute.xlu0 %4454  ;;  %3969 = vmatprep.subr.mxu1 %v3930_v59 }
 0x5e0   : > { %3970 = vmatpush1.msra.mxu1 %v3929_v17 }
 0x5e1   : > { %3971 = vmatprep.subr.mxu1 %v3928_v33  ;;  %v9068_v45 = vpop.permute.xlu1 %4452  ;;  %v4240_v33 = vld [vmem:[#allocation5 + $0x150] sm:$0xff] }
 0x5e2   : > { %3972 = vmatpush1.msra.mxu1 %v3927_v34 }
 0x5e3   : > { %v9072_v13 = vpop.permute.xlu0 %4568  ;;  %7547 = vmatmul.mubr.msk.f32.vlgmr.msra.gmra.mxu1 %vm498_vm4, %v3913_v19  ;;  %v4350_v19 = vld [vmem:[#allocation5 + $0x160] sm:$0xff] }
 0x5e4   : > { %4011 = vmatprep.mubr.f32.mxu1 %v7897_v1 }
 0x5e5   : > { %v4027_v18 = vpop.permute.xlu1 %4026 }
 0x5e6   : > { %v4032_v52 = vsel %vm605_vm10, %v8319_v30, %v4027_v18 }
 0x5e7   : > { %v4029_v48 = vpop.permute.xlu0 %4028  ;;  %7548 = vmatmul.mubr.msk.f32.gmra.mxu1 %vm498_vm4, %v3914_v8 }
 0x5e8   : > { %v4033_v35 = vsel %vm605_vm10, %v4027_v18, %v4029_v48  ;;  %4218 = vmatprep.mubr.f32.mxu1 %v7897_v1  ;;  %v4351_v18 = vld [vmem:[#allocation5 + $0x168] sm:$0xff] }
 0x5e9   : > { %v4137_v46 = vpop.permute.xlu1 %4136  ;;  %4072 = vmatprep.subr.mxu0 %v4033_v35 }
 0x5ea   : > { %4073 = vmatpush1.msra.mxu0 %v4032_v52  ;;  %v4142_v12 = vsel %vm731_vm9, %v8321_v31, %v4137_v46 }
 0x5eb   : > { %v4139_v56 = vpop.permute.xlu0 %4138  ;;  %4074 = vmatprep.subr.mxu0 %v4031_v54  ;;  %v4458_v54 = vsel %vm831_vm7, %v9060_v57, %v9068_v45 }
 0x5ec   : > { %4075 = vmatpush1.msra.mxu0 %v4030_v37  ;;  %v4143_v7 = vsel %vm731_vm9, %v4137_v46, %v4139_v56  ;;  %v4444_v46 = vld [vmem:[#allocation5 + $0x170] sm:$0xff]  ;;  %v4558_v37 = vld [vmem:[#allocation5 + $0x180] sm:$0xff] }
 0x5ed   : > { %4182 = vmatprep.subr.mxu1 %v4143_v7  ;;  %v9087_v60 = vpop.permute.xlu1 %4566  ;;  %7549 = vmatmul.mubr.msk.f32.vlgmr.msra.gmra.mxu0 %vm498_vm4, %v3910_v55 }
 0x5ee   : > { %4183 = vmatpush1.msra.mxu1 %v4142_v12  ;;  %4114 = vmatprep.mubr.f32.mxu0 %v7897_v1  ;;  %v4445_v12 = vld [vmem:[#allocation5 + $0x178] sm:$0xff] }
 0x5ef   : > { %v4253_v10 = vpop.permute.xlu0 %4252  ;;  %4184 = vmatprep.subr.mxu1 %v4141_v62 }
 0x5f0   : > { %4185 = vmatpush1.msra.mxu1 %v4140_v3 }
 0x5f1   : > { %7551 = vmatmul.mubr.msk.f32.vlgmr.msra.gmra.mxu1 %vm498_vm4, %v4126_v11  ;;  %4386 = vmatprep.subr.mxu1 %v8958_v26  ;;  %v4251_v28 = vpop.permute.xlu1 %4250  ;;  %v4255_v26 = vsel %vm859_vm8, %v9058_v39, %v4249_v40 }
 0x5f2   : > { %v4256_v42 = vsel %vm859_vm8, %v8323_v32, %v4251_v28  ;;  %7550 = vmatmul.mubr.msk.f32.gmra.mxu0 %vm498_vm4, %v3911_v53  ;;  %4387 = vmatpush1.msra.mxu1 %v8963_v24  ;;  %v4257_v20 = vsel %vm859_vm8, %v4251_v28, %v4253_v10  ;;  %v4254_v24 = vsel %vm859_vm8, %v8323_v32, %v9058_v39 }
 0x5f3   : > { %v4565_v17 = vpop.permute.xlu0 %4564  ;;  %4296 = vmatprep.subr.mxu0 %v4257_v20  ;;  %4388 = vmatprep.subr.mxu1 %v8950_v58 }
 0x5f4   : > { %4224 = vmatprep.mubr.f32.mxu1 %v7897_v1  ;;  %4297 = vmatpush1.msra.mxu0 %v4256_v42  ;;  %v4572_v57 = vsel %vm703_vm6, %v4565_v17, %v9087_v60  ;;  %v4668_v42 = vld [vmem:[#allocation5 + $0x190] sm:$0xff] }
 0x5f5   : > { %4389 = vmatpush1.msra.mxu1 %v8948_v16  ;;  %v4677_v59 = vpop.permute.xlu1 %4676  ;;  %4298 = vmatprep.subr.mxu0 %v4255_v26  ;;  %v4241_v16 = vld [vmem:[#allocation5 + $0x158] sm:$0xff]  ;;  %v4778_v26 = vld [vmem:[#allocation5 + $0x1a0] sm:$0xff] }
 0x5f6   : > { %7552 = vmatmul.mubr.msk.f32.gmra.mxu1 %vm498_vm4, %v4127_v23  ;;  %4299 = vmatpush1.msra.mxu0 %v4254_v24  ;;  %v4681_v56 = vsel %vm1310_vm11, %v4677_v59, %v8362_v6  ;;  %v4779_v24 = vld [vmem:[#allocation5 + $0x1a8] sm:$0xff] }
 0x5f7   : > { %4332 = vmatprep.mubr.f32.mxu0 %v7897_v1  ;;  %v4675_v58 = vpop.permute.xlu0 %4674  ;;  %4422 = vmatprep.mubr.f32.mxu1 %v7897_v1 }
 0x5f8   : > { %7553 = vmatmul.mubr.msk.f32.vlgmr.msra.gmra.mxu0 %vm498_vm4, %v4240_v33  ;;  %v4680_v7 = vsel %vm1310_vm11, %v4675_v58, %v4677_v59  ;;  %v4669_v59 = vld [vmem:[#allocation5 + $0x198] sm:$0xff] }
 0x5f9   : > { %v4457_v40 = vpop.permute.xlu1 %4456  ;;  %4338 = vmatprep.mubr.f32.mxu0 %v7897_v1 }
 0x5fa   : > { %7555 = vmatmul.mubr.msk.f32.vlgmr.msra.gmra.mxu1 %vm498_vm4, %v4350_v19  ;;  %v4460_v39 = vsel %vm831_vm7, %v9065_v27, %v4457_v40  ;;  %v4461_v34 = vsel %vm831_vm7, %v4457_v40, %v8333_v47  ;;  %v4459_v27 = vsel %vm831_vm7, %v9068_v45, %v8333_v47 }
 0x5fb   : > { %v4571_v8 = vpop.permute.xlu0 %4570  ;;  %4500 = vmatprep.subr.mxu0 %v4461_v34  ;;  %4428 = vmatprep.mubr.f32.mxu1 %v7897_v1 }
 0x5fc   : > { %7554 = vmatmul.mubr.msk.f32.gmra.mxu0 %vm498_vm4, %v4241_v16  ;;  %v4575_v48 = vsel %vm703_vm6, %v4571_v8, %v8335_v49  ;;  %v4574_v35 = vsel %vm703_vm6, %v9072_v13, %v4571_v8  ;;  %v4573_v13 = vsel %vm703_vm6, %v9087_v60, %v8335_v49  ;;  %v4559_v60 = vld [vmem:[#allocation5 + $0x188] sm:$0xff] }
 0x5fd   : > { %4501 = vmatpush1.msra.mxu0 %v4460_v39  ;;  %4614 = vmatprep.subr.mxu1 %v4575_v48  ;;  %v4673_v52 = vpop.permute.xlu1 %4672 }
 0x5fe   : > { %7556 = vmatmul.mubr.msk.f32.gmra.mxu1 %vm498_vm4, %v4351_v18  ;;  %4502 = vmatprep.subr.mxu0 %v4459_v27  ;;  %v4679_v11 = vsel %vm1310_vm11, %v4673_v52, %v8362_v6 }
 0x5ff   : > { %4503 = vmatpush1.msra.mxu0 %v4458_v54  ;;  %4536 = vmatprep.mubr.f32.mxu0 %v7897_v1  ;;  %v4789_v55 = vpop.permute.xlu0 %4788 }
 0x600   : > { %4615 = vmatpush1.msra.mxu1 %v4574_v35  ;;  %7557 = vmatmul.mubr.msk.f32.vlgmr.msra.gmra.mxu0 %vm498_vm4, %v4444_v46 }
 0x601   : > { %4616 = vmatprep.subr.mxu1 %v4573_v13  ;;  %4720 = vmatprep.subr.mxu0 %v4681_v56  ;;  %v4671_v45 = vpop.permute.xlu1 %4670 }
 0x602   : > { %4617 = vmatpush1.msra.mxu1 %v4572_v57  ;;  %4650 = vmatprep.mubr.f32.mxu1 %v7897_v1  ;;  %v4678_v62 = vsel %vm1310_vm11, %v4671_v45, %v4673_v52 }
 0x603   : > { %4721 = vmatpush1.msra.mxu0 %v4680_v7  ;;  %7559 = vmatmul.mubr.msk.f32.vlgmr.msra.gmra.mxu1 %vm498_vm4, %v4558_v37  ;;  %v4791_v10 = vpop.permute.xlu0 %4790 }
 0x604   : > { %4722 = vmatprep.subr.mxu0 %v4679_v11  ;;  %4542 = vmatprep.mubr.f32.mxu0 %v7897_v1  ;;  %v4795_v3 = vsel %vm468_vm5, %v4791_v10, %v8404_v44  ;;  %v4794_v53 = vsel %vm468_vm5, %v4789_v55, %v4791_v10 }
 0x605   : > { %7558 = vmatmul.mubr.msk.f32.gmra.mxu0 %vm498_vm4, %v4445_v12  ;;  %4656 = vmatprep.mubr.f32.mxu1 %v7897_v1  ;;  %v4787_v28 = vpop.permute.xlu1 %4786 }
 0x606   : > { %4723 = vmatpush1.msra.mxu0 %v4678_v62  ;;  %4834 = vmatprep.subr.mxu1 %v4795_v3  ;;  %v4793_v20 = vsel %vm468_vm5, %v4787_v28, %v8404_v44 }
 0x607   : > { %7560 = vmatmul.mubr.msk.f32.gmra.mxu1 %vm498_vm4, %v4559_v60  ;;  %4756 = vmatprep.mubr.f32.mxu0 %v7897_v1  ;;  %v4785_v17 = vpop.permute.xlu0 %4784 }
 0x608   : > { %4835 = vmatpush1.msra.mxu1 %v4794_v53  ;;  %v4792_v23 = vsel %vm468_vm5, %v4785_v17, %v4787_v28  ;;  %4870 = vmatprep.mubr.f32.mxu1 %v7897_v1 }
 0x609   : > { %7561 = vmatmul.mubr.msk.f32.vlgmr.msra.gmra.mxu0 %vm498_vm4, %v4668_v42  ;;  %4836 = vmatprep.subr.mxu1 %v4793_v20 }
 0x60a   : > { %4837 = vmatpush1.msra.mxu1 %v4792_v23  ;;  %4762 = vmatprep.mubr.f32.mxu0 %v7897_v1 }
 0x60b   : > { %7563 = vmatmul.mubr.msk.f32.vlgmr.msra.gmra.mxu1 %vm498_vm4, %v4778_v26 }
 0x60c   : > { %4876 = vmatprep.mubr.f32.mxu1 %v7897_v1 }
 0x60d   : > { %7562 = vmatmul.mubr.msk.f32.gmra.mxu0 %vm498_vm4, %v4669_v59 }
 0x60e   : > { %4978 = vmatprep.mubr.f32.mxu0 %v7897_v1 }
 0x60f   : > { %7564 = vmatmul.mubr.msk.f32.gmra.mxu1 %vm498_vm4, %v4779_v24 }
 0x610   : > { %5098 = vmatprep.mubr.f32.mxu1 %v7897_v1 }
 0x621   : > { %v3887_v33 = vpop.f32.mrf.mxu0 }
 0x622   : > { %v9168_v58 = vadd.f32 %v3887_v33, %v8938_v21 }
 0x623   : > { %v3889_v19 = vpop.f32.mrf.mxu0 }
 0x624   : > { %v9171_v40 = vadd.f32 %v3889_v19, %v8941_v25 }
 0x625   : > { %v3893_v16 = vpop.f32.mrf.mxu0 }
 0x626   : > { %v9174_v39 = vadd.f32 %v3893_v16, %v8944_v50 }
 0x627   : > { %v9176_v48 = vpop.f32.mrf.mxu0 }
 0x6a3   : > { %v4007_v34 = vpop.f32.mrf.mxu1 }
 0x6a5   : > { %v4009_v8 = vpop.f32.mrf.mxu1 }
 0x6a7   : > { %v4013_v18 = vpop.f32.mrf.mxu1 }
 0x6a9   : > { %v4015_v52 = vpop.f32.mrf.mxu1 }
 0x6ad   : > { %v4110_v35 = vpop.f32.mrf.mxu0 }
 0x6ae   : > { %v4111_v37 = vadd.f32 %v4110_v35, %v4007_v34 }
 0x6af   : > { %v4112_v27 = vpop.f32.mrf.mxu0 }
 0x6b0   : > { %v4113_v50 = vadd.f32 %v4112_v27, %v4009_v8 }
 0x6b1   : > { %v4220_v46 = vpop.f32.mrf.mxu1 }
 0x6b2   : > { %v4116_v54 = vpop.f32.mrf.mxu0  ;;  %v4231_v7 = vadd.f32 %v4220_v46, %v4111_v37 }
 0x6b3   : > { %v4222_v21 = vpop.f32.mrf.mxu1  ;;  %v4117_v11 = vadd.f32 %v4116_v54, %v4013_v18 }
 0x6b4   : > { %v4118_v55 = vpop.f32.mrf.mxu0  ;;  %v4232_v10 = vadd.f32 %v4222_v21, %v4113_v50 }
 0x6b5   : > { %v4119_v28 = vadd.f32 %v4118_v55, %v4015_v52 }
 0x6b6   : > { %v4226_v13 = vpop.f32.mrf.mxu1 }
 0x6b7   : > { %v4233_v42 = vadd.f32 %v4226_v13, %v4117_v11 }
 0x6b8   : > { %v4228_v56 = vpop.f32.mrf.mxu1  ;;  %v4334_v25 = vpop.f32.mrf.mxu0 }
 0x6b9   : > { %v4345_v60 = vadd.f32 %v4334_v25, %v4231_v7  ;;  %v4234_v26 = vadd.f32 %v4228_v56, %v4119_v28 }
 0x6ba   : > { %v4336_v57 = vpop.f32.mrf.mxu0  ;;  %v4424_v45 = vpop.f32.mrf.mxu1 }
 0x6bb   : > { %v4346_v20 = vadd.f32 %v4336_v57, %v4232_v10  ;;  %v4435_v59 = vadd.f32 %v4424_v45, %v4345_v60 }
 0x6bc   : > { %v4340_v12 = vpop.f32.mrf.mxu0  ;;  %v4426_v62 = vpop.f32.mrf.mxu1 }
 0x6bd   : > { %v4347_v24 = vadd.f32 %v4340_v12, %v4233_v42  ;;  %v4436_v16 = vadd.f32 %v4426_v62, %v4346_v20  ;;  %v4890_v12 = vpop.permute.xlu0 %4889 }
 0x6be   : > { %v4342_v3 = vpop.f32.mrf.mxu0  ;;  %v4430_v53 = vpop.f32.mrf.mxu1 }
 0x6bf   : > { %v4348_v34 = vadd.f32 %v4342_v3, %v4234_v26  ;;  %v4437_v18 = vadd.f32 %v4430_v53, %v4347_v24 }
 0x6c0   : > { %v4432_v17 = vpop.f32.mrf.mxu1  ;;  %v4538_v23 = vpop.f32.mrf.mxu0 }
 0x6c1   : > { %v4549_v8 = vadd.f32 %v4538_v23, %v4435_v59  ;;  %v4438_v25 = vadd.f32 %v4432_v17, %v4348_v34 }
 0x6c2   : > { %v4540_v33 = vpop.f32.mrf.mxu0 }
 0x6c3   : > { %v4652_v19 = vpop.f32.mrf.mxu1  ;;  %v4550_v46 = vadd.f32 %v4540_v33, %v4436_v16  ;;  %v4895_v16 = vpop.permute.xlu1 %4894 }
 0x6c4   : > { %v4663_v52 = vadd.f32 %v4652_v19, %v4549_v8 }
 0x6c5   : > { %v4544_v35 = vpop.f32.mrf.mxu0  ;;  %v4654_v27 = vpop.f32.mrf.mxu1 }
 0x6c6   : > { %v4551_v55 = vadd.f32 %v4544_v35, %v4437_v18  ;;  %v4664_v57 = vadd.f32 %v4654_v27, %v4550_v46 }
 0x6c7   : > { %v4546_v54 = vpop.f32.mrf.mxu0  ;;  %v4658_v21 = vpop.f32.mrf.mxu1 }
 0x6c8   : > { %v4552_v56 = vadd.f32 %v4546_v54, %v4438_v25  ;;  %v4665_v62 = vadd.f32 %v4658_v21, %v4551_v55 }
 0x6c9   : > { %v4660_v13 = vpop.f32.mrf.mxu1  ;;  %v4758_v37 = vpop.f32.mrf.mxu0 }
 0x6ca   : > { %v4769_v45 = vadd.f32 %v4758_v37, %v4663_v52  ;;  %v4666_v53 = vadd.f32 %v4660_v13, %v4552_v56  ;;  %v4906_v52 = vld [vmem:[#allocation7 + $0x30] sm:$0xff]  ;;  %v4907_v37 = vld [vmem:[#allocation7 + $0x38] sm:$0xff] }
 0x6cb   : > { %v4760_v50 = vpop.f32.mrf.mxu0  ;;  %v4872_v7 = vpop.f32.mrf.mxu1 }
 0x6cc   : > { %v4770_v11 = vadd.f32 %v4760_v50, %v4664_v57  ;;  %v4883_v10 = vadd.f32 %v4872_v7, %v4769_v45 }
 0x6cd   : > { %v4764_v60 = vpop.f32.mrf.mxu0  ;;  %v4874_v3 = vpop.f32.mrf.mxu1 }
 0x6ce   : > { %v4897_v28 = vadd.f32 %v4890_v12, %v4883_v10  ;;  %v4771_v42 = vadd.f32 %v4764_v60, %v4665_v62  ;;  %v4884_v20 = vadd.f32 %v4874_v3, %v4770_v11 }
 0x6cf   : > { %v4766_v17 = vpop.f32.mrf.mxu0  ;;  %v4878_v23 = vpop.f32.mrf.mxu1 }
 0x6d0   : > { %v9178_v26 = vmax.f32 %v4897_v28, 0.0  ;;  %v4898_v59 = vadd.f32 %v4890_v12, %v4884_v20  ;;  %v4772_v24 = vadd.f32 %v4766_v17, %v4666_v53  ;;  %v4885_v33 = vadd.f32 %v4878_v23, %v4771_v42 }
 0x6d1   : > { %v4880_v19 = vpop.f32.mrf.mxu1 }
 0x6d2   : > { %v9180_v34 = vmax.f32 %v4898_v59, 0.0  ;;  %v4886_v8 = vadd.f32 %v4880_v19, %v4772_v24  ;;  %5012 = vrot.lane.b32.xlu1 %v9178_v26, %s7898_s3  ;;  %v4899_v35 = vadd.f32 %v4895_v16, %v4885_v33  ;;  %v4998_v18 = vmul.f32 %v9178_v26, %v8227_v61  ;;  %v7568_v33 = vld [vmem:[%s9753_s4 + $0x38] sm:$0xff]  ;;  %v7567_v19 = vld [vmem:[%s9753_s4 + $0x30] sm:$0xff] }
 0x6d3   : > { %v5214_v25 = vmul.f32 %v9178_v26, %v8241_v2  ;;  %v5328_v13 = vmul.f32 %v9178_v26, %v8254_v5  ;;  %v5532_v56 = vmul.f32 %v8152_v29, %v9178_v26  ;;  %v5646_v28 = vmul.f32 %v8166_v36, %v9178_v26 }
 0x6d4   : > { %v4900_v27 = vadd.f32 %v4895_v16, %v4886_v8  ;;  %5014 = vrot.lane.b32.xlu0 %v9180_v34, %s7898_s3  ;;  %v4999_v54 = vmul.f32 %v8172_v38, %v9180_v34  ;;  %v9193_v21 = vmax.f32 %v4899_v35, 0.0  ;;  %v5215_v55 = vmul.f32 %v8185_v43, %v9180_v34 }
 0x6d5   : > { %v5329_v57 = vmul.f32 %v8200_v51, %v9180_v34  ;;  %v5533_v50 = vmul.f32 %v9180_v34, %v8267_v9  ;;  %v5647_v60 = vmul.f32 %v9180_v34, %v8282_v14  ;;  %v5867_v59 = vmul.f32 %v9180_v34, %v8299_v22 }
 0x6d6   : > { %v9188_v46 = vmax.f32 %v4900_v27, 0.0  ;;  %5115 = vrot.lane.b32.xlu1 %v4998_v18, %s7903_s25  ;;  %v5534_v45 = vmul.f32 %v8152_v29, %v9193_v21  ;;  %v5648_v7 = vmul.f32 %v8166_v36, %v9193_v21  ;;  %v5000_v12 = vmul.f32 %v9193_v21, %v8227_v61 }
 0x6d7   : > { %v5216_v11 = vmul.f32 %v9193_v21, %v8241_v2  ;;  %v5330_v53 = vmul.f32 %v9193_v21, %v8254_v5  ;;  %v5868_v17 = vmul.f32 %v8287_v15, %v9193_v21  ;;  %v5866_v24 = vmul.f32 %v8287_v15, %v9178_v26 }
 0x6d8   : > { %4942 = vmatprep.subr.mxu0 %v9188_v46  ;;  %5117 = vrot.lane.b32.xlu0 %v4999_v54, %s7903_s25  ;;  %v5001_v62 = vmul.f32 %v8172_v38, %v9188_v46  ;;  %v5217_v10 = vmul.f32 %v8185_v43, %v9188_v46  ;;  %v5331_v3 = vmul.f32 %v8200_v51, %v9188_v46 }
 0x6d9   : > { %4943 = vmatpush1.msra.mxu0 %v9193_v21  ;;  %v5535_v42 = vmul.f32 %v9188_v46, %v8267_v9  ;;  %v5649_v20 = vmul.f32 %v9188_v46, %v8282_v14  ;;  %v5869_v23 = vmul.f32 %v9188_v46, %v8299_v22 }
 0x6da   : > { %4944 = vmatprep.subr.mxu0 %v9180_v34  ;;  %5225 = vrot.lane.b32.xlu1 %v5214_v25, %s7904_s22 }
 0x6db   : > { %4945 = vmatpush1.msra.mxu0 %v9178_v26 }
 0x6dc   : > { %5227 = vrot.lane.b32.xlu0 %v5215_v55, %s7904_s22  ;;  %7565 = vmatmul.mubr.msk.f32.vlgmr.msra.gmra.mxu0 %vm498_vm4, %v4906_v52 }
 0x6dd   : > { %4984 = vmatprep.mubr.f32.mxu0 %v7897_v1 }
 0x6de   : > { %5339 = vrot.lane.b32.xlu1 %v5328_v13, %s7902_s24 }
 0x6e0   : > { %5341 = vrot.lane.b32.xlu0 %v5329_v57, %s7902_s24  ;;  %7566 = vmatmul.mubr.msk.f32.gmra.mxu0 %vm498_vm4, %v4907_v37 }
 0x6e1   : > { %5201 = vmatprep.mubr.f32.mxu0 %v7897_v1 }
 0x6e2   : > { %5543 = vrot.lane.b32.xlu1 %v5532_v56, %s7900_s21 }
 0x6e4   : > { %5018 = vrot.lane.b32.xlu0 %v9188_v46, %s7898_s3 }
 0x6e6   : > { %5016 = vrot.lane.b32.xlu1 %v9193_v21, %s7898_s3 }
 0x6e8   : > { %5547 = vrot.lane.b32.xlu0 %v5534_v45, %s7900_s21 }
 0x6ea   : > { %5545 = vrot.lane.b32.xlu1 %v5533_v50, %s7900_s21 }
 0x6ec   : > { %5661 = vrot.lane.b32.xlu0 %v5648_v7, %s7901_s18  ;;  %v5006_v7 = vld [vmem:[#allocation5 + $0x1c0] sm:$0xff] }
 0x6ee   : > { %5119 = vrot.lane.b32.xlu1 %v5000_v12, %s7903_s25 }
 0x6f0   : > { %5121 = vrot.lane.b32.xlu0 %v5001_v62, %s7903_s25 }
 0x6f2   : > { %5229 = vrot.lane.b32.xlu1 %v5216_v11, %s7904_s22 }
 0x6f4   : > { %5231 = vrot.lane.b32.xlu0 %v5217_v10, %s7904_s22  ;;  %v5007_v10 = vld [vmem:[#allocation5 + $0x1c8] sm:$0xff] }
 0x6f6   : > { %5659 = vrot.lane.b32.xlu1 %v5647_v60, %s7901_s18 }
 0x6f8   : > { %5345 = vrot.lane.b32.xlu0 %v5331_v3, %s7902_s24 }
 0x6fa   : > { %5343 = vrot.lane.b32.xlu1 %v5330_v53, %s7902_s24 }
 0x6fc   : > { %5657 = vrot.lane.b32.xlu0 %v5646_v28, %s7901_s18 }
 0x6fe   : > { %5769 = vrot.lane.b32.xlu1 %v9188_v46, %s7905_s15 }
 0x700   : > { %5767 = vrot.lane.b32.xlu0 %v9193_v21, %s7905_s15 }
 0x702   : > { %5549 = vrot.lane.b32.xlu1 %v5535_v42, %s7900_s21 }
 0x704   : > { %5663 = vrot.lane.b32.xlu0 %v5649_v20, %s7901_s18 }
 0x706   : > { %5765 = vrot.lane.b32.xlu1 %v9180_v34, %s7905_s15 }
 0x708   : > { %5881 = vrot.lane.b32.xlu0 %v5868_v17, %s7899_s19  ;;  %v5003_v17 = vld [vmem:[#allocation5 + $0x1b0] sm:$0xff] }
 0x70a   : > { %5763 = vrot.lane.b32.xlu1 %v9178_v26, %s7905_s15 }
 0x70c   : > { %5883 = vrot.lane.b32.xlu0 %v5869_v23, %s7899_s19 }
 0x70e   : > { %5879 = vrot.lane.b32.xlu1 %v5867_v59, %s7899_s19 }
 0x710   : > { %5877 = vrot.lane.b32.xlu0 %v5866_v24, %s7899_s19 }
 0x712   : > { %5987 = vperm.xlu1 %7739, %v7568_v33  }
 0x714   : > { %5982 = vperm.xlu0 %7738, %v7567_v19  }
 0x744   : > { %v5013_v16 = vpop.permute.xlu1 %5012 }
 0x745   : > { %v5020_v12 = vsel %vm498_vm4, %v8178_v41, %v5013_v16 }
 0x746   : > { %v5015_v8 = vpop.permute.xlu0 %5014 }
 0x747   : > { %v5021_v50 = vsel %vm498_vm4, %v5013_v16, %v5015_v8  ;;  %v5219_v8 = vld [vmem:[#allocation5 + $0x1d0] sm:$0xff] }
 0x748   : > { %v5116_v35 = vpop.permute.xlu1 %5115 }
 0x749   : > { %v5123_v23 = vsel %vm605_vm10, %v8319_v30, %v5116_v35 }
 0x74a   : > { %v5118_v27 = vpop.permute.xlu0 %5117 }
 0x74b   : > { %v5124_v20 = vsel %vm605_vm10, %v5116_v35, %v5118_v27 }
 0x74c   : > { %v5226_v18 = vpop.permute.xlu1 %5225 }
 0x74d   : > { %v5233_v35 = vsel %vm731_vm9, %v8321_v31, %v5226_v18 }
 0x74e   : > { %v5228_v54 = vpop.permute.xlu0 %5227 }
 0x74f   : > { %v5234_v16 = vsel %vm731_vm9, %v5226_v18, %v5228_v54  ;;  %v5220_v18 = vld [vmem:[#allocation5 + $0x1d8] sm:$0xff] }
 0x750   : > { %v9288_v25 = vpop.permute.xlu1 %5339 }
 0x752   : > { %v5342_v52 = vpop.permute.xlu0 %5341 }
 0x754   : > { %v9290_v55 = vpop.permute.xlu1 %5543 }
 0x756   : > { %v5019_v13 = vpop.permute.xlu0 %5018 }
 0x758   : > { %v5017_v37 = vpop.permute.xlu1 %5016 }
 0x759   : > { %v5022_v57 = vsel %vm498_vm4, %v8178_v41, %v5017_v37  ;;  %v5023_v56 = vsel %vm498_vm4, %v5017_v37, %v5019_v13  ;;  %v5004_v13 = vld [vmem:[#allocation5 + $0x1b8] sm:$0xff] }
 0x75a   : > { %v9295_v45 = vpop.permute.xlu0 %5547  ;;  %5062 = vmatprep.subr.mxu1 %v5023_v56 }
 0x75b   : > { %5063 = vmatpush1.msra.mxu1 %v5022_v57 }
 0x75c   : > { %5064 = vmatprep.subr.mxu1 %v5021_v50  ;;  %v9300_v62 = vpop.permute.xlu1 %5545  ;;  %v5347_v50 = vsel %vm859_vm8, %v8323_v32, %v9288_v25 }
 0x75d   : > { %5065 = vmatpush1.msra.mxu1 %v5020_v12  ;;  %v5443_v12 = vld [vmem:[#allocation5 + $0x1f0] sm:$0xff] }
 0x75e   : > { %v9302_v11 = vpop.permute.xlu0 %5661  ;;  %7569 = vmatmul.mubr.msk.f32.vlgmr.msra.gmra.mxu1 %vm498_vm4, %v5006_v7  ;;  %v5333_v7 = vld [vmem:[#allocation5 + $0x1e0] sm:$0xff] }
 0x75f   : > { %5104 = vmatprep.mubr.f32.mxu1 %v7897_v1 }
 0x760   : > { %v5120_v60 = vpop.permute.xlu1 %5119 }
 0x761   : > { %v5125_v28 = vsel %vm605_vm10, %v8319_v30, %v5120_v60 }
 0x762   : > { %v5122_v3 = vpop.permute.xlu0 %5121  ;;  %7570 = vmatmul.mubr.msk.f32.gmra.mxu1 %vm498_vm4, %v5007_v10 }
 0x763   : > { %v5126_v53 = vsel %vm605_vm10, %v5120_v60, %v5122_v3  ;;  %5311 = vmatprep.mubr.f32.mxu1 %v7897_v1  ;;  %v5444_v3 = vld [vmem:[#allocation5 + $0x1f8] sm:$0xff] }
 0x764   : > { %v5230_v42 = vpop.permute.xlu1 %5229  ;;  %5165 = vmatprep.subr.mxu0 %v5126_v53 }
 0x765   : > { %5166 = vmatpush1.msra.mxu0 %v5125_v28  ;;  %v5235_v33 = vsel %vm731_vm9, %v8321_v31, %v5230_v42 }
 0x766   : > { %v5232_v59 = vpop.permute.xlu0 %5231  ;;  %5167 = vmatprep.subr.mxu0 %v5124_v20  ;;  %v5537_v20 = vld [vmem:[#allocation5 + $0x200] sm:$0xff] }
 0x767   : > { %5168 = vmatpush1.msra.mxu0 %v5123_v23  ;;  %v5236_v24 = vsel %vm731_vm9, %v5230_v42, %v5232_v59 }
 0x768   : > { %5275 = vmatprep.subr.mxu1 %v5236_v24  ;;  %v9317_v19 = vpop.permute.xlu1 %5659  ;;  %7571 = vmatmul.mubr.msk.f32.vlgmr.msra.gmra.mxu0 %vm498_vm4, %v5003_v17  ;;  %v5551_v17 = vsel %vm831_vm7, %v9290_v55, %v9300_v62  ;;  %v5651_v24 = vld [vmem:[#allocation5 + $0x210] sm:$0xff] }
 0x769   : > { %5276 = vmatpush1.msra.mxu1 %v5235_v33  ;;  %5207 = vmatprep.mubr.f32.mxu0 %v7897_v1 }
 0x76a   : > { %v5346_v27 = vpop.permute.xlu0 %5345  ;;  %5277 = vmatprep.subr.mxu1 %v5234_v16  ;;  %v5538_v16 = vld [vmem:[#allocation5 + $0x208] sm:$0xff] }
 0x76b   : > { %5278 = vmatpush1.msra.mxu1 %v5233_v35 }
 0x76c   : > { %7573 = vmatmul.mubr.msk.f32.vlgmr.msra.gmra.mxu1 %vm498_vm4, %v5219_v8  ;;  %5479 = vmatprep.subr.mxu1 %v9188_v46  ;;  %v5344_v37 = vpop.permute.xlu1 %5343  ;;  %v5348_v46 = vsel %vm859_vm8, %v9288_v25, %v5342_v52  ;;  %v5334_v25 = vld [vmem:[#allocation5 + $0x1e8] sm:$0xff] }
 0x76d   : > { %v5349_v57 = vsel %vm859_vm8, %v8323_v32, %v5344_v37  ;;  %7572 = vmatmul.mubr.msk.f32.gmra.mxu0 %vm498_vm4, %v5004_v13  ;;  %5480 = vmatpush1.msra.mxu1 %v9193_v21  ;;  %v5350_v54 = vsel %vm859_vm8, %v5344_v37, %v5346_v27 }
 0x76e   : > { %v5658_v56 = vpop.permute.xlu0 %5657  ;;  %5389 = vmatprep.subr.mxu0 %v5350_v54  ;;  %5481 = vmatprep.subr.mxu1 %v9180_v34  ;;  %v5761_v54 = vld [vmem:[#allocation5 + $0x220] sm:$0xff] }
 0x76f   : > { %5317 = vmatprep.mubr.f32.mxu1 %v7897_v1  ;;  %5390 = vmatpush1.msra.mxu0 %v5349_v57  ;;  %v5665_v55 = vsel %vm703_vm6, %v5658_v56, %v9317_v19 }
 0x770   : > { %5482 = vmatpush1.msra.mxu1 %v9178_v26  ;;  %v5770_v21 = vpop.permute.xlu1 %5769  ;;  %5391 = vmatprep.subr.mxu0 %v5348_v46 }
 0x771   : > { %7574 = vmatmul.mubr.msk.f32.gmra.mxu1 %vm498_vm4, %v5220_v18  ;;  %5392 = vmatpush1.msra.mxu0 %v5347_v50  ;;  %v5774_v59 = vsel %vm1310_vm11, %v5770_v21, %v8362_v6  ;;  %v5871_v50 = vld [vmem:[#allocation5 + $0x230] sm:$0xff] }
 0x772   : > { %5425 = vmatprep.mubr.f32.mxu0 %v7897_v1  ;;  %v5768_v34 = vpop.permute.xlu0 %5767  ;;  %5515 = vmatprep.mubr.f32.mxu1 %v7897_v1 }
 0x773   : > { %7575 = vmatmul.mubr.msk.f32.vlgmr.msra.gmra.mxu0 %vm498_vm4, %v5333_v7  ;;  %v5773_v33 = vsel %vm1310_vm11, %v5768_v34, %v5770_v21  ;;  %v5762_v21 = vld [vmem:[#allocation5 + $0x228] sm:$0xff]  ;;  %v5872_v7 = vld [vmem:[#allocation5 + $0x238] sm:$0xff] }
 0x774   : > { %v5550_v52 = vpop.permute.xlu1 %5549  ;;  %5431 = vmatprep.mubr.f32.mxu0 %v7897_v1 }
 0x775   : > { %7577 = vmatmul.mubr.msk.f32.vlgmr.msra.gmra.mxu1 %vm498_vm4, %v5443_v12  ;;  %v5553_v26 = vsel %vm831_vm7, %v9295_v45, %v5550_v52  ;;  %v5554_v10 = vsel %vm831_vm7, %v5550_v52, %v8333_v47  ;;  %v5552_v45 = vsel %vm831_vm7, %v9300_v62, %v8333_v47 }
 0x776   : > { %v5664_v60 = vpop.permute.xlu0 %5663  ;;  %5593 = vmatprep.subr.mxu0 %v5554_v10  ;;  %5521 = vmatprep.mubr.f32.mxu1 %v7897_v1 }
 0x777   : > { %7576 = vmatmul.mubr.msk.f32.gmra.mxu0 %vm498_vm4, %v5334_v25  ;;  %v5668_v53 = vsel %vm703_vm6, %v5664_v60, %v8335_v49  ;;  %v5667_v28 = vsel %vm703_vm6, %v9302_v11, %v5664_v60  ;;  %v5666_v11 = vsel %vm703_vm6, %v9317_v19, %v8335_v49  ;;  %v5652_v19 = vld [vmem:[#allocation5 + $0x218] sm:$0xff] }
 0x778   : > { %5594 = vmatpush1.msra.mxu0 %v5553_v26  ;;  %5707 = vmatprep.subr.mxu1 %v5668_v53  ;;  %v5766_v42 = vpop.permute.xlu1 %5765 }
 0x779   : > { %7578 = vmatmul.mubr.msk.f32.gmra.mxu1 %vm498_vm4, %v5444_v3  ;;  %5595 = vmatprep.subr.mxu0 %v5552_v45  ;;  %v5772_v35 = vsel %vm1310_vm11, %v5766_v42, %v8362_v6 }
 0x77a   : > { %5596 = vmatpush1.msra.mxu0 %v5551_v17  ;;  %5629 = vmatprep.mubr.f32.mxu0 %v7897_v1  ;;  %v5882_v23 = vpop.permute.xlu0 %5881 }
 0x77b   : > { %5708 = vmatpush1.msra.mxu1 %v5667_v28  ;;  %7579 = vmatmul.mubr.msk.f32.vlgmr.msra.gmra.mxu0 %vm498_vm4, %v5537_v20 }
 0x77c   : > { %5709 = vmatprep.subr.mxu1 %v5666_v11  ;;  %5813 = vmatprep.subr.mxu0 %v5774_v59  ;;  %v5764_v62 = vpop.permute.xlu1 %5763 }
 0x77d   : > { %5710 = vmatpush1.msra.mxu1 %v5665_v55  ;;  %5743 = vmatprep.mubr.f32.mxu1 %v7897_v1  ;;  %v5771_v8 = vsel %vm1310_vm11, %v5764_v62, %v5766_v42 }
 0x77e   : > { %5814 = vmatpush1.msra.mxu0 %v5773_v33  ;;  %7581 = vmatmul.mubr.msk.f32.vlgmr.msra.gmra.mxu1 %vm498_vm4, %v5651_v24  ;;  %v5884_v27 = vpop.permute.xlu0 %5883 }
 0x77f   : > { %5815 = vmatprep.subr.mxu0 %v5772_v35  ;;  %5635 = vmatprep.mubr.f32.mxu0 %v7897_v1  ;;  %v5888_v13 = vsel %vm468_vm5, %v5884_v27, %v8404_v44  ;;  %v5887_v37 = vsel %vm468_vm5, %v5882_v23, %v5884_v27 }
 0x780   : > { %7580 = vmatmul.mubr.msk.f32.gmra.mxu0 %vm498_vm4, %v5538_v16  ;;  %5749 = vmatprep.mubr.f32.mxu1 %v7897_v1  ;;  %v5880_v57 = vpop.permute.xlu1 %5879 }
 0x781   : > { %5816 = vmatpush1.msra.mxu0 %v5771_v8  ;;  %5927 = vmatprep.subr.mxu1 %v5888_v13  ;;  %v5886_v56 = vsel %vm468_vm5, %v5880_v57, %v8404_v44 }
 0x782   : > { %7582 = vmatmul.mubr.msk.f32.gmra.mxu1 %vm498_vm4, %v5652_v19  ;;  %5849 = vmatprep.mubr.f32.mxu0 %v7897_v1  ;;  %v5878_v18 = vpop.permute.xlu0 %5877 }
 0x783   : > { %5928 = vmatpush1.msra.mxu1 %v5887_v37  ;;  %v5885_v46 = vsel %vm468_vm5, %v5878_v18, %v5880_v57  ;;  %5963 = vmatprep.mubr.f32.mxu1 %v7897_v1 }
 0x784   : > { %7583 = vmatmul.mubr.msk.f32.vlgmr.msra.gmra.mxu0 %vm498_vm4, %v5761_v54  ;;  %5929 = vmatprep.subr.mxu1 %v5886_v56 }
 0x785   : > { %5930 = vmatpush1.msra.mxu1 %v5885_v46  ;;  %5855 = vmatprep.mubr.f32.mxu0 %v7897_v1 }
 0x786   : > { %7585 = vmatmul.mubr.msk.f32.vlgmr.msra.gmra.mxu1 %vm498_vm4, %v5871_v50 }
 0x787   : > { %5969 = vmatprep.mubr.f32.mxu1 %v7897_v1 }
 0x788   : > { %7584 = vmatmul.mubr.msk.f32.gmra.mxu0 %vm498_vm4, %v5762_v21 }
 0x789   : > { %6071 = vmatprep.mubr.f32.mxu0 %v7897_v1 }
 0x78a   : > { %7586 = vmatmul.mubr.msk.f32.gmra.mxu1 %vm498_vm4, %v5872_v7 }
 0x78b   : > { %6191 = vmatprep.mubr.f32.mxu1 %v7897_v1 }
 0x79c   : > { %v4980_v34 = vpop.f32.mrf.mxu0 }
 0x79d   : > { %v9398_v12 = vadd.f32 %v4980_v34, %v9168_v58 }
 0x79e   : > { %v4982_v52 = vpop.f32.mrf.mxu0 }
 0x79f   : > { %v9401_v25 = vadd.f32 %v4982_v52, %v9171_v40 }
 0x7a0   : > { %v4986_v26 = vpop.f32.mrf.mxu0 }
 0x7a1   : > { %v9404_v10 = vadd.f32 %v4986_v26, %v9174_v39 }
 0x7a2   : > { %v9406_v28 = vpop.f32.mrf.mxu0 }
 0x81e   : > { %v5100_v60 = vpop.f32.mrf.mxu1 }
 0x820   : > { %v5102_v3 = vpop.f32.mrf.mxu1 }
 0x822   : > { %v5106_v53 = vpop.f32.mrf.mxu1 }
 0x824   : > { %v5108_v45 = vpop.f32.mrf.mxu1 }
 0x828   : > { %v5203_v42 = vpop.f32.mrf.mxu0 }
 0x829   : > { %v5204_v55 = vadd.f32 %v5203_v42, %v5100_v60 }
 0x82a   : > { %v5205_v20 = vpop.f32.mrf.mxu0 }
 0x82b   : > { %v5206_v39 = vadd.f32 %v5205_v20, %v5102_v3 }
 0x82c   : > { %v5313_v17 = vpop.f32.mrf.mxu1 }
 0x82d   : > { %v5209_v23 = vpop.f32.mrf.mxu0  ;;  %v5324_v16 = vadd.f32 %v5313_v17, %v5204_v55 }
 0x82e   : > { %v5315_v58 = vpop.f32.mrf.mxu1  ;;  %v5210_v27 = vadd.f32 %v5209_v23, %v5106_v53 }
 0x82f   : > { %v5211_v11 = vpop.f32.mrf.mxu0  ;;  %v5325_v19 = vadd.f32 %v5315_v58, %v5206_v39 }
 0x830   : > { %v5212_v54 = vadd.f32 %v5211_v11, %v5108_v45 }
 0x831   : > { %v5319_v59 = vpop.f32.mrf.mxu1 }
 0x832   : > { %v5326_v56 = vadd.f32 %v5319_v59, %v5210_v27  ;;  %v5983_v27 = vpop.permute.xlu0 %5982 }
 0x833   : > { %v5321_v24 = vpop.f32.mrf.mxu1  ;;  %v5427_v40 = vpop.f32.mrf.mxu0 }
 0x834   : > { %v5438_v13 = vadd.f32 %v5427_v40, %v5324_v16  ;;  %v5327_v21 = vadd.f32 %v5321_v24, %v5212_v54 }
 0x835   : > { %v5429_v62 = vpop.f32.mrf.mxu0  ;;  %v5517_v33 = vpop.f32.mrf.mxu1 }
 0x836   : > { %v5439_v18 = vadd.f32 %v5429_v62, %v5325_v19  ;;  %v5528_v7 = vadd.f32 %v5517_v33, %v5438_v13 }
 0x837   : > { %v5433_v8 = vpop.f32.mrf.mxu0  ;;  %v5519_v35 = vpop.f32.mrf.mxu1 }
 0x838   : > { %v5440_v34 = vadd.f32 %v5433_v8, %v5326_v56  ;;  %v5529_v60 = vadd.f32 %v5519_v35, %v5439_v18 }
 0x839   : > { %v5435_v37 = vpop.f32.mrf.mxu0  ;;  %v5523_v57 = vpop.f32.mrf.mxu1 }
 0x83a   : > { %v5441_v3 = vadd.f32 %v5435_v37, %v5327_v21  ;;  %v5530_v53 = vadd.f32 %v5523_v57, %v5440_v34 }
 0x83b   : > { %v5525_v46 = vpop.f32.mrf.mxu1  ;;  %v5631_v50 = vpop.f32.mrf.mxu0 }
 0x83c   : > { %v5642_v42 = vadd.f32 %v5631_v50, %v5528_v7  ;;  %v5531_v55 = vadd.f32 %v5525_v46, %v5441_v3  ;;  %v5988_v3 = vpop.permute.xlu1 %5987 }
 0x83d   : > { %v5633_v52 = vpop.f32.mrf.mxu0 }
 0x83e   : > { %v5745_v26 = vpop.f32.mrf.mxu1  ;;  %v5643_v23 = vadd.f32 %v5633_v52, %v5529_v60 }
 0x83f   : > { %v5756_v45 = vadd.f32 %v5745_v26, %v5642_v42 }
 0x840   : > { %v5637_v20 = vpop.f32.mrf.mxu0  ;;  %v5747_v17 = vpop.f32.mrf.mxu1 }
 0x841   : > { %v5644_v11 = vadd.f32 %v5637_v20, %v5530_v53  ;;  %v5757_v39 = vadd.f32 %v5747_v17, %v5643_v23 }
 0x842   : > { %v5639_v58 = vpop.f32.mrf.mxu0  ;;  %v5751_v40 = vpop.f32.mrf.mxu1 }
 0x843   : > { %v5645_v24 = vadd.f32 %v5639_v58, %v5531_v55  ;;  %v5758_v35 = vadd.f32 %v5751_v40, %v5644_v11  ;;  %v5999_v11 = vld [vmem:[#allocation7 + $0x40] sm:$0xff] }
 0x844   : > { %v5753_v59 = vpop.f32.mrf.mxu1  ;;  %v5851_v62 = vpop.f32.mrf.mxu0 }
 0x845   : > { %v5862_v33 = vadd.f32 %v5851_v62, %v5756_v45  ;;  %v5759_v57 = vadd.f32 %v5753_v59, %v5645_v24 }
 0x846   : > { %v5853_v16 = vpop.f32.mrf.mxu0  ;;  %v5965_v8 = vpop.f32.mrf.mxu1 }
 0x847   : > { %v5863_v19 = vadd.f32 %v5853_v16, %v5757_v39  ;;  %v5976_v13 = vadd.f32 %v5965_v8, %v5862_v33  ;;  %v6000_v39 = vld [vmem:[#allocation7 + $0x48] sm:$0xff] }
 0x848   : > { %v5857_v37 = vpop.f32.mrf.mxu0  ;;  %v5967_v54 = vpop.f32.mrf.mxu1 }
 0x849   : > { %v5990_v56 = vadd.f32 %v5983_v27, %v5976_v13  ;;  %v5864_v18 = vadd.f32 %v5857_v37, %v5758_v35  ;;  %v5977_v50 = vadd.f32 %v5967_v54, %v5863_v19  ;;  %v7590_v54 = vld [vmem:[%s9753_s4 + $0x48] sm:$0xff] }
 0x84a   : > { %v5859_v46 = vpop.f32.mrf.mxu0  ;;  %v5971_v21 = vpop.f32.mrf.mxu1 }
 0x84b   : > { %v9408_v7 = vmax.f32 %v5990_v56, 0.0  ;;  %v5991_v34 = vadd.f32 %v5983_v27, %v5977_v50  ;;  %v5865_v52 = vadd.f32 %v5859_v46, %v5759_v57  ;;  %v5978_v26 = vadd.f32 %v5971_v21, %v5864_v18  ;;  %v7589_v57 = vld [vmem:[%s9753_s4 + $0x40] sm:$0xff]  ;;  %v7206_v18 = vld [vmem:[%s9758_s9 + $0x8] sm:$0xff]  ;;  %v7207_v50 = vld [vmem:[%s9758_s9 + $0x10] sm:$0xff] }
 0x84c   : > { %v5973_v60 = vpop.f32.mrf.mxu1  ;;  %v7205_v56 = vld [vmem:[%s9758_s9] sm:$0xff]  ;;  %v7208_v46 = vld [vmem:[%s9758_s9 + $0x18] sm:$0xff] }
 0x84d   : > { %v9410_v42 = vmax.f32 %v5991_v34, 0.0  ;;  %v5979_v20 = vadd.f32 %v5973_v60, %v5865_v52  ;;  %6105 = vrot.lane.b32.xlu1 %v9408_v7, %s7898_s3  ;;  %v5992_v17 = vadd.f32 %v5988_v3, %v5978_v26  ;;  %v6091_v23 = vmul.f32 %v9408_v7, %v8227_v61 }
 0x84e   : > { %v6307_v45 = vmul.f32 %v9408_v7, %v8241_v2  ;;  %v6421_v62 = vmul.f32 %v9408_v7, %v8254_v5  ;;  %v6625_v33 = vmul.f32 %v8152_v29, %v9408_v7  ;;  %v6959_v37 = vmul.f32 %v8287_v15, %v9408_v7 }
 0x84f   : > { %v5993_v53 = vadd.f32 %v5988_v3, %v5979_v20  ;;  %6107 = vrot.lane.b32.xlu0 %v9410_v42, %s7898_s3  ;;  %v6092_v40 = vmul.f32 %v8172_v38, %v9410_v42  ;;  %v9423_v55 = vmax.f32 %v5992_v17, 0.0  ;;  %v6308_v59 = vmul.f32 %v8185_v43, %v9410_v42 }
 0x850   : > { %v6422_v24 = vmul.f32 %v8200_v51, %v9410_v42  ;;  %v6626_v8 = vmul.f32 %v9410_v42, %v8267_v9 }
 0x851   : > { %v9418_v58 = vmax.f32 %v5993_v53, 0.0  ;;  %6208 = vrot.lane.b32.xlu1 %v6091_v23, %s7903_s25  ;;  %v6627_v16 = vmul.f32 %v8152_v29, %v9423_v55  ;;  %v6741_v27 = vmul.f32 %v8166_v36, %v9423_v55  ;;  %v6093_v35 = vmul.f32 %v9423_v55, %v8227_v61 }
 0x852   : > { %v6309_v19 = vmul.f32 %v9423_v55, %v8241_v2  ;;  %v6740_v61 = vmul.f32 %v9410_v42, %v8282_v14  ;;  %v6423_v2 = vmul.f32 %v9423_v55, %v8254_v5 }
 0x853   : > { %6035 = vmatprep.subr.mxu0 %v9418_v58  ;;  %6210 = vrot.lane.b32.xlu0 %v6092_v40, %s7903_s25  ;;  %v6094_v29 = vmul.f32 %v8172_v38, %v9418_v58  ;;  %v6310_v13 = vmul.f32 %v8185_v43, %v9418_v58  ;;  %v6424_v38 = vmul.f32 %v8200_v51, %v9418_v58 }
 0x854   : > { %6036 = vmatpush1.msra.mxu0 %v9423_v55  ;;  %v6739_v43 = vmul.f32 %v8166_v36, %v9408_v7  ;;  %v6628_v51 = vmul.f32 %v9418_v58, %v8267_v9  ;;  %v6742_v5 = vmul.f32 %v9418_v58, %v8282_v14  ;;  %v6961_v36 = vmul.f32 %v8287_v15, %v9423_v55  ;;  %v7181_v15 = vld [vmem:[%s9756_s7] sm:$0xff] }
 0x855   : > { %6037 = vmatprep.subr.mxu0 %v9410_v42  ;;  %6318 = vrot.lane.b32.xlu1 %v6307_v45, %s7904_s22  ;;  %v6962_v9 = vmul.f32 %v9418_v58, %v8299_v22  ;;  %v6960_v14 = vmul.f32 %v9410_v42, %v8299_v22  ;;  %v7182_v22 = vld [vmem:[%s9756_s7 + $0x8] sm:$0xff] }
 0x856   : > { %6038 = vmatpush1.msra.mxu0 %v9408_v7 }
 0x857   : > { %6320 = vrot.lane.b32.xlu0 %v6308_v59, %s7904_s22  ;;  %7587 = vmatmul.mubr.msk.f32.vlgmr.msra.gmra.mxu0 %vm498_vm4, %v5999_v11 }
 0x858   : > { %6077 = vmatprep.mubr.f32.mxu0 %v7897_v1 }
 0x859   : > { %6432 = vrot.lane.b32.xlu1 %v6421_v62, %s7902_s24 }
 0x85b   : > { %6434 = vrot.lane.b32.xlu0 %v6422_v24, %s7902_s24  ;;  %7588 = vmatmul.mubr.msk.f32.gmra.mxu0 %vm498_vm4, %v6000_v39  ;;  %v6099_v39 = vld [vmem:[#allocation5 + $0x250] sm:$0xff] }
 0x85c   : > { %6294 = vmatprep.mubr.f32.mxu0 %v7897_v1 }
 0x85d   : > { %6636 = vrot.lane.b32.xlu1 %v6625_v33, %s7900_s21 }
 0x85f   : > { %6111 = vrot.lane.b32.xlu0 %v9418_v58, %s7898_s3 }
 0x861   : > { %6109 = vrot.lane.b32.xlu1 %v9423_v55, %s7898_s3 }
 0x863   : > { %6640 = vrot.lane.b32.xlu0 %v6627_v16, %s7900_s21 }
 0x865   : > { %6638 = vrot.lane.b32.xlu1 %v6626_v8, %s7900_s21  ;;  %v6100_v8 = vld [vmem:[#allocation5 + $0x258] sm:$0xff] }
 0x867   : > { %6754 = vrot.lane.b32.xlu0 %v6741_v27, %s7901_s18 }
 0x869   : > { %6212 = vrot.lane.b32.xlu1 %v6093_v35, %s7903_s25 }
 0x86b   : > { %6214 = vrot.lane.b32.xlu0 %v6094_v29, %s7903_s25 }
 0x86d   : > { %6322 = vrot.lane.b32.xlu1 %v6309_v19, %s7904_s22 }
 0x86f   : > { %6324 = vrot.lane.b32.xlu0 %v6310_v13, %s7904_s22 }
 0x871   : > { %6752 = vrot.lane.b32.xlu1 %v6740_v61, %s7901_s18  ;;  %v6096_v61 = vld [vmem:[#allocation5 + $0x240] sm:$0xff] }
 0x873   : > { %6438 = vrot.lane.b32.xlu0 %v6424_v38, %s7902_s24 }
 0x875   : > { %6436 = vrot.lane.b32.xlu1 %v6423_v2, %s7902_s24 }
 0x877   : > { %6750 = vrot.lane.b32.xlu0 %v6739_v43, %s7901_s18 }
 0x879   : > { %6862 = vrot.lane.b32.xlu1 %v9418_v58, %s7905_s15 }
 0x87b   : > { %6860 = vrot.lane.b32.xlu0 %v9423_v55, %s7905_s15 }
 0x87d   : > { %6642 = vrot.lane.b32.xlu1 %v6628_v51, %s7900_s21  ;;  %s7360_s21 = sshll.u32 %s9688_s29, 4  ;;  %s9698_s21 = int_to_ptr.vmem [resolvable:$true] %s7360_s21 }
 0x87e   : > { %s7820_s11 = scalar_lea.vmem %s9698_s21, 1024 }
 0x87f   : > { %6756 = vrot.lane.b32.xlu0 %v6742_v5, %s7901_s18  ;;  %s7621_s18 = sshll.u32 %s7985_s17, 10  ;;  %p7821_p11 = scmp.ne.s32.totalorder %s9698_s21, %s7820_s11 }
 0x880   : > { %s9704_s22 = scalar_lea.hbm %s9759_s10, %s7621_s18  ;;  %s7907_s17 = smov [#allocation8]  }
 0x881   : > { %6858 = vrot.lane.b32.xlu1 %v9410_v42, %s7905_s15  ;;  %p7822_p1 = pnand %p7821_p11, %p9782_p10  ;;  %s7824_s26 = sshll.u32 %s7907_s17, 4  ;;  %s7825_s26 = int_to_ptr.vmem [resolvable:$false] %s7824_s26 }
 0x882   : > { %s7826_s6 = scalar_lea.vmem %s7825_s26, 2048  ;;  %p7827_p6 = scmp.lt.s32.totalorder %s9698_s21, %s7825_s26 }
 0x883   : > { %6974 = vrot.lane.b32.xlu0 %v6961_v36, %s7899_s19  ;;  %p7823_p2 = pneg %p7822_p1  ;;  %p7828_p12 = scmp.lt.s32.totalorder %s7826_s6, %s7820_s11 }
 0x885   : > { %6856 = vrot.lane.b32.xlu1 %v9408_v7, %s7905_s15  ;;  %s7347_s15 = scalar_lea.sflag [#allocation4], %s8091_s30  ;;  %p7829_p7 = por %p7828_p12, %p7827_p6 }
 0x887   : > { %6976 = vrot.lane.b32.xlu0 %v6962_v9, %s7899_s19  ;;  %v6312_v9 = vld [vmem:[#allocation5 + $0x260] sm:$0xff]  ;;  %p7830_p9 = pnand %p7829_p7, %p7823_p2 }
 0x889   : > { %6972 = vrot.lane.b32.xlu1 %v6960_v14, %s7899_s19 }
 0x88b   : > { %6970 = vrot.lane.b32.xlu0 %v6959_v37, %s7899_s19  ;;  %v6097_v37 = vld [vmem:[#allocation5 + $0x248] sm:$0xff] }
 0x88d   : > { %7080 = vperm.xlu1 %7739, %v7590_v54  }
 0x88f   : > { %7075 = vperm.xlu0 %7738, %v7589_v57  }
 0x891   : > { %7190 = vperm.xlu1 %7739, %v7182_v22  }
 0x893   : > { %7185 = vperm.xlu0 %7738, %v7181_v15  }
 0x895   : > { %7211 = vperm.xlu1 %7739, %v7205_v56  }
 0x897   : > { %7216 = vperm.xlu0 %7738, %v7206_v18   ;;  %v6426_v18 = vld [vmem:[#allocation5 + $0x270] sm:$0xff] }
 0x899   : > { %7221 = vperm.xlu1 %7739, %v7207_v50   ;;  %v6536_v50 = vld [vmem:[#allocation5 + $0x280] sm:$0xff] }
 0x89b   : > { %7226 = vperm.xlu0 %7738, %v7208_v46  }
 0x8bf   : > { %v6106_v21 = vpop.permute.xlu1 %6105 }
 0x8c0   : > { %v6113_v24 = vsel %vm498_vm4, %v8178_v41, %v6106_v21 }
 0x8c1   : > { %v6108_v34 = vpop.permute.xlu0 %6107 }
 0x8c2   : > { %v6114_v62 = vsel %vm498_vm4, %v6106_v21, %v6108_v34 }
 0x8c3   : > { %v6209_v52 = vpop.permute.xlu1 %6208 }
 0x8c4   : > { %v6216_v38 = vsel %vm605_vm10, %v8319_v30, %v6209_v52 }
 0x8c5   : > { %v6211_v26 = vpop.permute.xlu0 %6210 }
 0x8c6   : > { %v6217_v13 = vsel %vm605_vm10, %v6209_v52, %v6211_v26  ;;  %v6537_v52 = vld [vmem:[#allocation5 + $0x288] sm:$0xff] }
 0x8c7   : > { %v6319_v60 = vpop.permute.xlu1 %6318 }
 0x8c9   : > { %v6321_v3 = vpop.permute.xlu0 %6320 }
 0x8ca   : > { %v6327_v36 = vsel %vm731_vm9, %v6319_v60, %v6321_v3 }
 0x8cb   : > { %v9536_v20 = vpop.permute.xlu1 %6432 }
 0x8cc   : > { %v6440_v56 = vsel %vm859_vm8, %v8323_v32, %v9536_v20 }
 0x8cd   : > { %v6435_v17 = vpop.permute.xlu0 %6434 }
 0x8cf   : > { %v9538_v53 = vpop.permute.xlu1 %6636 }
 0x8d1   : > { %v6112_v23 = vpop.permute.xlu0 %6111 }
 0x8d3   : > { %v6110_v40 = vpop.permute.xlu1 %6109 }
 0x8d4   : > { %v6115_v45 = vsel %vm498_vm4, %v8178_v41, %v6110_v40  ;;  %v6116_v11 = vsel %vm498_vm4, %v6110_v40, %v6112_v23 }
 0x8d5   : > { %v9543_v59 = vpop.permute.xlu0 %6640  ;;  %6155 = vmatprep.subr.mxu1 %v6116_v11  ;;  %v6744_v11 = vld [vmem:[#allocation5 + $0x2a0] sm:$0xff] }
 0x8d6   : > { %6156 = vmatpush1.msra.mxu1 %v6115_v45 }
 0x8d7   : > { %6157 = vmatprep.subr.mxu1 %v6114_v62  ;;  %v9548_v33 = vpop.permute.xlu1 %6638 }
 0x8d8   : > { %6158 = vmatpush1.msra.mxu1 %v6113_v24  ;;  %v6644_v23 = vsel %vm831_vm7, %v9538_v53, %v9548_v33 }
 0x8d9   : > { %v9550_v16 = vpop.permute.xlu0 %6754  ;;  %7591 = vmatmul.mubr.msk.f32.vlgmr.msra.gmra.mxu1 %vm498_vm4, %v6099_v39  ;;  %v6631_v39 = vld [vmem:[#allocation5 + $0x298] sm:$0xff] }
 0x8da   : > { %6197 = vmatprep.mubr.f32.mxu1 %v7897_v1 }
 0x8db   : > { %v6213_v27 = vpop.permute.xlu1 %6212 }
 0x8dc   : > { %v6218_v41 = vsel %vm605_vm10, %v8319_v30, %v6213_v27  ;;  %v6326_v30 = vsel %vm731_vm9, %v8321_v31, %v6319_v60 }
 0x8dd   : > { %v6215_v35 = vpop.permute.xlu0 %6214  ;;  %7592 = vmatmul.mubr.msk.f32.gmra.mxu1 %vm498_vm4, %v6100_v8 }
 0x8de   : > { %v6219_v29 = vsel %vm605_vm10, %v6213_v27, %v6215_v35  ;;  %6404 = vmatprep.mubr.f32.mxu1 %v7897_v1 }
 0x8df   : > { %v6323_v19 = vpop.permute.xlu1 %6322  ;;  %6258 = vmatprep.subr.mxu0 %v6219_v29  ;;  %v6854_v29 = vld [vmem:[#allocation5 + $0x2b0] sm:$0xff] }
 0x8e0   : > { %6259 = vmatpush1.msra.mxu0 %v6218_v41  ;;  %v6328_v51 = vsel %vm731_vm9, %v8321_v31, %v6323_v19  ;;  %v6313_v31 = vld [vmem:[#allocation5 + $0x268] sm:$0xff] }
 0x8e1   : > { %v6325_v2 = vpop.permute.xlu0 %6324  ;;  %6260 = vmatprep.subr.mxu0 %v6217_v13  ;;  %v6964_v13 = vld [vmem:[#allocation5 + $0x2c0] sm:$0xff] }
 0x8e2   : > { %6261 = vmatpush1.msra.mxu0 %v6216_v38  ;;  %v6329_v43 = vsel %vm731_vm9, %v6323_v19, %v6325_v2 }
 0x8e3   : > { %6368 = vmatprep.subr.mxu1 %v6329_v43  ;;  %v9565_v5 = vpop.permute.xlu1 %6752  ;;  %7593 = vmatmul.mubr.msk.f32.vlgmr.msra.gmra.mxu0 %vm498_vm4, %v6096_v61  ;;  %v6855_v61 = vld [vmem:[#allocation5 + $0x2b8] sm:$0xff] }
 0x8e4   : > { %6369 = vmatpush1.msra.mxu1 %v6328_v51  ;;  %6300 = vmatprep.mubr.f32.mxu0 %v7897_v1  ;;  %v6759_v45 = vsel %vm703_vm6, %v9565_v5, %v8335_v49 }
 0x8e5   : > { %v6439_v14 = vpop.permute.xlu0 %6438  ;;  %6370 = vmatprep.subr.mxu1 %v6327_v36 }
 0x8e6   : > { %6371 = vmatpush1.msra.mxu1 %v6326_v30 }
 0x8e7   : > { %7595 = vmatmul.mubr.msk.f32.vlgmr.msra.gmra.mxu1 %vm498_vm4, %v6312_v9  ;;  %6572 = vmatprep.subr.mxu1 %v9418_v58  ;;  %v6437_v54 = vpop.permute.xlu1 %6436  ;;  %v6441_v58 = vsel %vm859_vm8, %v9536_v20, %v6435_v17  ;;  %v6645_v20 = vsel %vm831_vm7, %v9548_v33, %v8333_v47  ;;  %v6630_v17 = vld [vmem:[#allocation5 + $0x290] sm:$0xff] }
 0x8e8   : > { %v6442_v57 = vsel %vm859_vm8, %v8323_v32, %v6437_v54  ;;  %7594 = vmatmul.mubr.msk.f32.gmra.mxu0 %vm498_vm4, %v6097_v37  ;;  %6573 = vmatpush1.msra.mxu1 %v9423_v55  ;;  %v6443_v22 = vsel %vm859_vm8, %v6437_v54, %v6439_v14  ;;  %v6427_v32 = vld [vmem:[#allocation5 + $0x278] sm:$0xff] }
 0x8e9   : > { %v6751_v15 = vpop.permute.xlu0 %6750  ;;  %6482 = vmatprep.subr.mxu0 %v6443_v22  ;;  %6574 = vmatprep.subr.mxu1 %v9410_v42 }
 0x8ea   : > { %6410 = vmatprep.mubr.f32.mxu1 %v7897_v1  ;;  %6483 = vmatpush1.msra.mxu0 %v6442_v57  ;;  %v6758_v53 = vsel %vm703_vm6, %v6751_v15, %v9565_v5 }
 0x8eb   : > { %6575 = vmatpush1.msra.mxu1 %v9408_v7  ;;  %v6863_v55 = vpop.permute.xlu1 %6862  ;;  %6484 = vmatprep.subr.mxu0 %v6441_v58 }
 0x8ec   : > { %7596 = vmatmul.mubr.msk.f32.gmra.mxu1 %vm498_vm4, %v6313_v31  ;;  %6485 = vmatpush1.msra.mxu0 %v6440_v56 }
 0x8ed   : > { %6518 = vmatprep.mubr.f32.mxu0 %v7897_v1  ;;  %v6861_v42 = vpop.permute.xlu0 %6860  ;;  %6608 = vmatprep.mubr.f32.mxu1 %v7897_v1 }
 0x8ee   : > { %7597 = vmatmul.mubr.msk.f32.vlgmr.msra.gmra.mxu0 %vm498_vm4, %v6426_v18  ;;  %v6866_v62 = vsel %vm1310_vm11, %v6861_v42, %v6863_v55 }
 0x8ef   : > { %v6643_v46 = vpop.permute.xlu1 %6642  ;;  %6524 = vmatprep.mubr.f32.mxu0 %v7897_v1 }
 0x8f0   : > { %7599 = vmatmul.mubr.msk.f32.vlgmr.msra.gmra.mxu1 %vm498_vm4, %v6536_v50  ;;  %v6646_v7 = vsel %vm831_vm7, %v9543_v59, %v6643_v46  ;;  %v6647_v21 = vsel %vm831_vm7, %v6643_v46, %v8333_v47  ;;  %v6867_v47 = vsel %vm1310_vm11, %v6863_v55, %v8362_v6 }
 0x8f1   : > { %v6757_v34 = vpop.permute.xlu0 %6756  ;;  %6686 = vmatprep.subr.mxu0 %v6647_v21  ;;  %6614 = vmatprep.mubr.f32.mxu1 %v7897_v1 }
 0x8f2   : > { %7598 = vmatmul.mubr.msk.f32.gmra.mxu0 %vm498_vm4, %v6427_v32  ;;  %v6761_v26 = vsel %vm703_vm6, %v6757_v34, %v8335_v49  ;;  %v6760_v60 = vsel %vm703_vm6, %v9550_v16, %v6757_v34  ;;  %v6745_v16 = vld [vmem:[#allocation5 + $0x2a8] sm:$0xff] }
 0x8f3   : > { %6687 = vmatpush1.msra.mxu0 %v6646_v7  ;;  %6800 = vmatprep.subr.mxu1 %v6761_v26  ;;  %v6859_v3 = vpop.permute.xlu1 %6858 }
 0x8f4   : > { %7600 = vmatmul.mubr.msk.f32.gmra.mxu1 %vm498_vm4, %v6537_v52  ;;  %6688 = vmatprep.subr.mxu0 %v6645_v20  ;;  %v6865_v24 = vsel %vm1310_vm11, %v6859_v3, %v8362_v6 }
 0x8f5   : > { %6689 = vmatpush1.msra.mxu0 %v6644_v23  ;;  %6722 = vmatprep.mubr.f32.mxu0 %v7897_v1  ;;  %v6975_v40 = vpop.permute.xlu0 %6974 }
 0x8f6   : > { %6801 = vmatpush1.msra.mxu1 %v6760_v60  ;;  %7601 = vmatmul.mubr.msk.f32.vlgmr.msra.gmra.mxu0 %vm498_vm4, %v6630_v17 }
 0x8f7   : > { %6802 = vmatprep.subr.mxu1 %v6759_v45  ;;  %6906 = vmatprep.subr.mxu0 %v6867_v47  ;;  %v6857_v59 = vpop.permute.xlu1 %6856 }
 0x8f8   : > { %6803 = vmatpush1.msra.mxu1 %v6758_v53  ;;  %6836 = vmatprep.mubr.f32.mxu1 %v7897_v1  ;;  %v6864_v49 = vsel %vm1310_vm11, %v6857_v59, %v6859_v3 }
 0x8f9   : > { %6907 = vmatpush1.msra.mxu0 %v6866_v62  ;;  %7603 = vmatmul.mubr.msk.f32.vlgmr.msra.gmra.mxu1 %vm498_vm4, %v6744_v11  ;;  %v6977_v33 = vpop.permute.xlu0 %6976 }
 0x8fa   : > { %6908 = vmatprep.subr.mxu0 %v6865_v24  ;;  %6728 = vmatprep.mubr.f32.mxu0 %v7897_v1  ;;  %v6981_v8 = vsel %vm468_vm5, %v6977_v33, %v8404_v44  ;;  %v6980_v27 = vsel %vm468_vm5, %v6975_v40, %v6977_v33 }
 0x8fb   : > { %7602 = vmatmul.mubr.msk.f32.gmra.mxu0 %vm498_vm4, %v6631_v39  ;;  %6842 = vmatprep.mubr.f32.mxu1 %v7897_v1  ;;  %v6973_v35 = vpop.permute.xlu1 %6972 }
 0x8fc   : > { %6909 = vmatpush1.msra.mxu0 %v6864_v49  ;;  %7020 = vmatprep.subr.mxu1 %v6981_v8  ;;  %v6979_v6 = vsel %vm468_vm5, %v6973_v35, %v8404_v44  ;;  %v6965_v44 = vld [vmem:[#allocation5 + $0x2c8] sm:$0xff] }
 0x8fd   : > { %7604 = vmatmul.mubr.msk.f32.gmra.mxu1 %vm498_vm4, %v6745_v16  ;;  %6942 = vmatprep.mubr.f32.mxu0 %v7897_v1  ;;  %v6971_v41 = vpop.permute.xlu0 %6970 }
 0x8fe   : > { %7021 = vmatpush1.msra.mxu1 %v6980_v27  ;;  %v6978_v19 = vsel %vm468_vm5, %v6971_v41, %v6973_v35  ;;  %7056 = vmatprep.mubr.f32.mxu1 %v7897_v1 }
 0x8ff   : > { %7605 = vmatmul.mubr.msk.f32.vlgmr.msra.gmra.mxu0 %vm498_vm4, %v6854_v29  ;;  %7022 = vmatprep.subr.mxu1 %v6979_v6 }
 0x900   : > { %7023 = vmatpush1.msra.mxu1 %v6978_v19  ;;  %6948 = vmatprep.mubr.f32.mxu0 %v7897_v1 }
 0x901   : > { %7607 = vmatmul.mubr.msk.f32.vlgmr.msra.gmra.mxu1 %vm498_vm4, %v6964_v13 }
 0x902   : > { %7062 = vmatprep.mubr.f32.mxu1 %v7897_v1 }
 0x903   : > { %7606 = vmatmul.mubr.msk.f32.gmra.mxu0 %vm498_vm4, %v6855_v61 }
 0x904   : > { %7164 = vmatprep.mubr.f32.mxu0 %v7897_v1 }
 0x905   : > { %7608 = vmatmul.mubr.msk.f32.gmra.mxu1 %vm498_vm4, %v6965_v44 }
 0x906   : > { %7305 = vmatprep.mubr.f32.mxu1 %v7897_v1 }
 0x917   : > { %v6073_v38 = vpop.f32.mrf.mxu0 }
 0x918   : > { %v9646_v2 = vadd.f32 %v6073_v38, %v9398_v12 }
 0x919   : > { %v6075_v43 = vpop.f32.mrf.mxu0 }
 0x91a   : > { %v9649_v51 = vadd.f32 %v6075_v43, %v9401_v25 }
 0x91b   : > { %v6079_v5 = vpop.f32.mrf.mxu0 }
 0x91c   : > { %v9652_v36 = vadd.f32 %v6079_v5, %v9404_v10 }
 0x91d   : > { %v9654_v37 = vpop.f32.mrf.mxu0 }
 0x999   : > { %v6193_v9 = vpop.f32.mrf.mxu1 }
 0x99b   : > { %v6195_v30 = vpop.f32.mrf.mxu1 }
 0x99d   : > { %v6199_v14 = vpop.f32.mrf.mxu1 }
 0x99f   : > { %v6201_v57 = vpop.f32.mrf.mxu1 }
 0x9a3   : > { %v6296_v54 = vpop.f32.mrf.mxu0 }
 0x9a4   : > { %v6297_v32 = vadd.f32 %v6296_v54, %v6193_v9 }
 0x9a5   : > { %v6298_v22 = vpop.f32.mrf.mxu0 }
 0x9a6   : > { %v6299_v50 = vadd.f32 %v6298_v22, %v6195_v30 }
 0x9a7   : > { %v6406_v15 = vpop.f32.mrf.mxu1 }
 0x9a8   : > { %v6302_v31 = vpop.f32.mrf.mxu0  ;;  %v6417_v26 = vadd.f32 %v6406_v15, %v6297_v32 }
 0x9a9   : > { %v6408_v12 = vpop.f32.mrf.mxu1  ;;  %v6303_v7 = vadd.f32 %v6302_v31, %v6199_v14 }
 0x9aa   : > { %v6304_v58 = vpop.f32.mrf.mxu0  ;;  %v6418_v21 = vadd.f32 %v6408_v12, %v6299_v50  ;;  %v7076_v50 = vpop.permute.xlu0 %7075 }
 0x9ab   : > { %v6305_v60 = vadd.f32 %v6304_v58, %v6201_v57 }
 0x9ac   : > { %v6412_v56 = vpop.f32.mrf.mxu1 }
 0x9ad   : > { %v6419_v3 = vadd.f32 %v6412_v56, %v6303_v7 }
 0x9ae   : > { %v6414_v55 = vpop.f32.mrf.mxu1  ;;  %v6520_v25 = vpop.f32.mrf.mxu0 }
 0x9af   : > { %v6531_v40 = vadd.f32 %v6520_v25, %v6417_v26  ;;  %v6420_v45 = vadd.f32 %v6414_v55, %v6305_v60  ;;  %v7092_v60 = vld [vmem:[#allocation7 + $0x50] sm:$0xff] }
 0x9b0   : > { %v6522_v18 = vpop.f32.mrf.mxu0  ;;  %v6610_v42 = vpop.f32.mrf.mxu1 }
 0x9b1   : > { %v6532_v20 = vadd.f32 %v6522_v18, %v6418_v21  ;;  %v6621_v39 = vadd.f32 %v6610_v42, %v6531_v40  ;;  %v7081_v18 = vpop.permute.xlu1 %7080 }
 0x9b2   : > { %v6526_v10 = vpop.f32.mrf.mxu0  ;;  %v6612_v46 = vpop.f32.mrf.mxu1 }
 0x9b3   : > { %v6533_v47 = vadd.f32 %v6526_v10, %v6419_v3  ;;  %v6622_v59 = vadd.f32 %v6612_v46, %v6532_v20  ;;  %v7093_v3 = vld [vmem:[#allocation7 + $0x58] sm:$0xff]  ;;  %v1716_v20 = vadd.f32 %v8716_v4, %v8714_v63  ;;  %v7186_v4 = vpop.permute.xlu0 %7185 }
 0x9b4   : > { %v6528_v34 = vpop.f32.mrf.mxu0  ;;  %v6616_v52 = vpop.f32.mrf.mxu1 }
 0x9b5   : > { %v6534_v62 = vadd.f32 %v6528_v34, %v6420_v45  ;;  %v6623_v33 = vadd.f32 %v6616_v52, %v6533_v47 }
 0x9b6   : > { %v6618_v17 = vpop.f32.mrf.mxu1  ;;  %v6724_v23 = vpop.f32.mrf.mxu0 }
 0x9b7   : > { %v6735_v8 = vadd.f32 %v6724_v23, %v6621_v39  ;;  %v6624_v29 = vadd.f32 %v6618_v17, %v6534_v62  ;;  %v2808_v17 = vadd.f32 %v8946_v0, %v1716_v20 }
 0x9b8   : > { %v6726_v11 = vpop.f32.mrf.mxu0 }
 0x9b9   : > { %v6838_v53 = vpop.f32.mrf.mxu1  ;;  %v6736_v16 = vadd.f32 %v6726_v11, %v6622_v59  ;;  %v3901_v40 = vadd.f32 %v9176_v48, %v2808_v17 }
 0x9ba   : > { %v6849_v44 = vadd.f32 %v6838_v53, %v6735_v8 }
 0x9bb   : > { %v6730_v49 = vpop.f32.mrf.mxu0  ;;  %v6840_v24 = vpop.f32.mrf.mxu1  ;;  %v4994_v47 = vadd.f32 %v9406_v28, %v3901_v40 }
 0x9bc   : > { %v6737_v6 = vadd.f32 %v6730_v49, %v6623_v33  ;;  %v6850_v13 = vadd.f32 %v6840_v24, %v6736_v16  ;;  %v7191_v24 = vpop.permute.xlu1 %7190 }
 0x9bd   : > { %v6732_v27 = vpop.f32.mrf.mxu0  ;;  %v6844_v35 = vpop.f32.mrf.mxu1  ;;  %v6087_v53 = vadd.f32 %v9654_v37, %v4994_v47 }
 0x9be   : > { %v6738_v61 = vadd.f32 %v6732_v27, %v6624_v29  ;;  %v6851_v5 = vadd.f32 %v6844_v35, %v6737_v6  ;;  %v7204_v35 = vld [vmem:[%s9757_s8 + $0x18] sm:$0xff] }
 0x9bf   : > { %v6846_v41 = vpop.f32.mrf.mxu1  ;;  %v6944_v19 = vpop.f32.mrf.mxu0 }
 0x9c0   : > { %v6955_v30 = vadd.f32 %v6944_v19, %v6849_v44  ;;  %v6852_v57 = vadd.f32 %v6846_v41, %v6738_v61  ;;  %v7212_v29 = vpop.permute.xlu1 %7211  ;;  %v7217_v44 = vpop.permute.xlu0 %7216 }
 0x9c1   : > { %v6946_v38 = vpop.f32.mrf.mxu0  ;;  %v7058_v43 = vpop.f32.mrf.mxu1 }
 0x9c2   : > { %v6956_v9 = vadd.f32 %v6946_v38, %v6850_v13  ;;  %v7069_v55 = vadd.f32 %v7058_v43, %v6955_v30 }
 0x9c3   : > { %v6950_v14 = vpop.f32.mrf.mxu0  ;;  %v7060_v54 = vpop.f32.mrf.mxu1 }
 0x9c4   : > { %v6957_v22 = vadd.f32 %v6950_v14, %v6851_v5  ;;  %v7070_v12 = vadd.f32 %v7060_v54, %v6956_v9  ;;  %v7083_v7 = vadd.f32 %v7076_v50, %v7069_v55  ;;  %v7222_v14 = vpop.permute.xlu1 %7221 }
 0x9c5   : > { %v6952_v15 = vpop.f32.mrf.mxu0  ;;  %v7064_v31 = vpop.f32.mrf.mxu1 }
 0x9c6   : > { %v6958_v58 = vadd.f32 %v6952_v15, %v6852_v57  ;;  %v7071_v56 = vadd.f32 %v7064_v31, %v6957_v22  ;;  %v7084_v46 = vadd.f32 %v7076_v50, %v7070_v12  ;;  %v7087_v26 = vmax.f32 %v7083_v7, 0.0 }
 0x9c7   : > { %v7066_v25 = vpop.f32.mrf.mxu1 }
 0x9c8   : > { %v7072_v42 = vadd.f32 %v7066_v25, %v6958_v58  ;;  %v7085_v10 = vadd.f32 %v7081_v18, %v7071_v56  ;;  %v7088_v52 = vmax.f32 %v7084_v46, 0.0  ;;  %v7227_v58 = vpop.permute.xlu0 %7226 }
 0x9ca   : > { %v7086_v32 = vadd.f32 %v7081_v18, %v7072_v42  ;;  %v7089_v34 = vmax.f32 %v7085_v10, 0.0 }
 0x9cc   : > { %v7090_v21 = vmax.f32 %v7086_v32, 0.0 }
 0x9ce   : > { %7128 = vmatprep.subr.mxu0 %v7090_v21 }
 0x9cf   : > { %7129 = vmatpush1.msra.mxu0 %v7089_v34 }
 0x9d0   : > { %7130 = vmatprep.subr.mxu0 %v7088_v52 }
 0x9d1   : > { %7131 = vmatpush1.msra.mxu0 %v7087_v26 }
 0x9d2   : > { %7609 = vmatmul.mubr.msk.f32.vlgmr.msra.gmra.mxu0 %vm498_vm4, %v7092_v60 }
 0x9d3   : > { %7170 = vmatprep.mubr.f32.mxu0 %v7897_v1 }
 0x9d6   : > { %7610 = vmatmul.mubr.msk.f32.gmra.mxu0 %vm498_vm4, %v7093_v3 }
 0xa92   : > { %v7166_v23 = vpop.f32.mrf.mxu0 }
 0xa93   : > { %v7177_v39 = vadd.f32 %v7166_v23, %v9646_v2  ;;  %v7202_v2 = vld [vmem:[%s9757_s8 + $0x8] sm:$0xff] }
 0xa94   : > { %v7168_v45 = vpop.f32.mrf.mxu0 }
 0xa95   : > { %v7178_v59 = vadd.f32 %v7168_v45, %v9649_v51  ;;  %v7193_v48 = vadd.f32 %v7186_v4, %v7177_v39  ;;  %v7201_v51 = vld [vmem:[%s9757_s8] sm:$0xff] }
 0xa96   : > { %v7172_v11 = vpop.f32.mrf.mxu0 }
 0xa97   : > { %v7179_v62 = vadd.f32 %v7172_v11, %v9652_v36  ;;  %v7194_v33 = vadd.f32 %v7186_v4, %v7178_v59  ;;  %v7197_v37 = vmax.f32 %v7193_v48, 0.0  ;;  %v7203_v36 = vld [vmem:[%s9757_s8 + $0x10] sm:$0xff] }
 0xa98   : > { %v7174_v49 = vpop.f32.mrf.mxu0 }
 0xa99   : > { %v7180_v63 = vadd.f32 %v7174_v49, %v6087_v53  ;;  %v7195_v0 = vadd.f32 %v7191_v24, %v7179_v62  ;;  %v7198_v28 = vmax.f32 %v7194_v33, 0.0 }
 0xa9b   : > { %v7196_v16 = vadd.f32 %v7191_v24, %v7180_v63  ;;  %v7199_v27 = vmax.f32 %v7195_v0, 0.0 }
 0xa9d   : > { %v7200_v8 = vmax.f32 %v7196_v16, 0.0 }
 0xa9f   : > { %7269 = vmatprep.subr.mxu1 %v7200_v8 }
 0xaa0   : > { %7270 = vmatpush1.msra.mxu1 %v7199_v27 }
 0xaa1   : > { %7271 = vmatprep.subr.mxu1 %v7198_v28 }
 0xaa2   : > { %7272 = vmatpush1.msra.mxu1 %v7197_v37 }
 0xaa3   : > { %7611 = vmatmul.mubr.msk.f32.vlgmr.msra.gmra.mxu1 %vm498_vm4, %v7201_v51 }
 0xaa4   : > { %7311 = vmatprep.mubr.f32.mxu1 %v7897_v1 }
 0xaa7   : > { %7612 = vmatmul.mubr.msk.f32.gmra.mxu1 %vm498_vm4, %v7202_v2 }
 0xaa8   : > { %7317 = vmatprep.mubr.f32.mxu1 %v7897_v1 }
 0xaab   : > { %7613 = vmatmul.mubr.msk.f32.gmra.mxu1 %vm498_vm4, %v7203_v36 }
 0xaac   : > { %7323 = vmatprep.mubr.f32.mxu1 %v7897_v1 }
 0xaaf   : > { %7614 = vmatmul.mubr.msk.f32.gmra.mxu1 %vm498_vm4, %v7204_v35 }
 0xb63   : > { %v7307_v6 = vpop.f32.mrf.mxu1 }
 0xb64   : > { %v7308_v41 = vadd.f32 %v7307_v6, %v7212_v29 }
 0xb65   : > { %v7309_v19 = vpop.f32.mrf.mxu1 }
 0xb66   : > { %v7330_v13 = vmax.f32 %v7308_v41, 0.0  ;;  %v7310_v61 = vadd.f32 %v7309_v19, %v7212_v29 }
 0xb67   : > { %v7313_v38 = vpop.f32.mrf.mxu1 }
 0xb68   : > { %7338 = vst [vmem:[%s9688_s29] sm:$0xff] %v7330_v13  ;;  %v7331_v1 = vmax.f32 %v7310_v61, 0.0  ;;  %v7314_v43 = vadd.f32 %v7313_v38, %v7217_v44 }
 0xb69   : > { %v7315_v5 = vpop.f32.mrf.mxu1 }
 0xb6a   : > { %7339 = vst [vmem:[%s9688_s29 + $0x8] sm:$0xff] %v7331_v1  ;;  %v7332_v9 = vmax.f32 %v7314_v43, 0.0  ;;  %v7316_v30 = vadd.f32 %v7315_v5, %v7217_v44 }
 0xb6b   : > { %v7319_v54 = vpop.f32.mrf.mxu1 }
 0xb6c   : > { %7340 = vst [vmem:[%s9688_s29 + $0x10] sm:$0xff] %v7332_v9  ;;  %v7333_v57 = vmax.f32 %v7316_v30, 0.0  ;;  %v7320_v22 = vadd.f32 %v7319_v54, %v7222_v14 }
 0xb6d   : > { %v7321_v15 = vpop.f32.mrf.mxu1 }
 0xb6e   : > { %7341 = vst [vmem:[%s9688_s29 + $0x18] sm:$0xff] %v7333_v57  ;;  %v7334_v31 = vmax.f32 %v7320_v22, 0.0  ;;  %v7322_v12 = vadd.f32 %v7321_v15, %v7222_v14 }
 0xb6f   : > { %v7325_v56 = vpop.f32.mrf.mxu1 }
 0xb70   : > { %7342 = vst [vmem:[%s9688_s29 + $0x20] sm:$0xff] %v7334_v31  ;;  %v7335_v55 = vmax.f32 %v7322_v12, 0.0  ;;  %v7326_v25 = vadd.f32 %v7325_v56, %v7227_v58 }
 0xb71   : > { %v7327_v18 = vpop.f32.mrf.mxu1 }
 0xb72   : > { %7343 = vst [vmem:[%s9688_s29 + $0x28] sm:$0xff] %v7335_v55  ;;  %v7336_v42 = vmax.f32 %v7326_v25, 0.0  ;;  %v7328_v50 = vadd.f32 %v7327_v18, %v7227_v58 }
 0xb74   : > { %7344 = vst [vmem:[%s9688_s29 + $0x30] sm:$0xff] %v7336_v42  ;;  %v7337_v10 = vmax.f32 %v7328_v50, 0.0 }
 0xb76   : > { %7345 = vst [vmem:[%s9688_s29 + $0x38] sm:$0xff] %v7337_v10 }
 0xb77   : > { %7833 = shalt.err (!%p7830_p9)
}
 0xb78   : > { %s7834_s28 = scalar_lea.hbm %s9704_s22, 1024  ;;  %s7838_s29 = scalar_lea.hbm %s9759_s10, 2048 }
 0xb79   : > { %p7835_p13 = scmp.ne.s32.totalorder %s9704_s22, %s7834_s28  ;;  %p7839_p4 = scmp.lt.s32.totalorder %s9704_s22, %s9759_s10 }
 0xb7a   : > { %p7840_p8 = scmp.lt.s32.totalorder %s7838_s29, %s7834_s28 }
 0xb7b   : > { %p7836_p5 = pnand %p7835_p13, %p9782_p10 }
 0xb7c   : > { %p7841_p3 = por %p7840_p8, %p7839_p4 }
 0xb7d   : > { %p7837_p0 = pneg %p7836_p5 }
 0xb7f   : > { %p7842_p11 = pnand %p7841_p3, %p7837_p0 }
 0xb81   : > { %7845 = shalt.err (!%p7842_p11)
}
 0xb82   : > { %s7908_s25 = smov 256  }
 0xb83   : > { %7636 = dma.vmem_to_hbm [thread:$0]  (%p9782_p10), %s9698_s21, 1024, %s9704_s22, %s7347_s15, %s7908_s25, %s7908_s25, %s7898_s3  }
 0xb84 PF: > { %s7375_s11 = sand.u32 1, %s7876_s13   ;;  %p9783_p1 = scmp.ne.s32.totalorder %s9769_s20, 0 }
 0xb85   : > { %p9784_p2 = scmp.ge.s32.totalorder %s7888_s16, 2  ;;  %s7376_s17 = scalar_lea.sflag [#allocation4], %s7375_s11 }
 0xb87   : > { %p7650_p6 = pnand %p9784_p2, %p9783_p1 }
 0xb89   : > { %p7651_p12 = pneg %p7650_p6 }
 0xb8b   : > { %7871 = dma.done.wait (%p7651_p12), %s7376_s17, 1024  }
 0xb8c   : > { %7873 = vsyncadd (%p7651_p12), %s7376_s17, 4294966272  ;;  %s9785_s27 = sld [smem:[#allocation12_spill]]  ;;  %p24_p7 = scmp.ge.s32.totalorder %s8036_s23, 4  }
 0xb8d   : > { %s9786_s15 = sld [smem:[#allocation13_spill]]  ;;  %s9787_s13 = smov %s7880_s14 }
 0xb8e   : > { %s9789_s16 = smov %s8036_s23  ;;  %26 = sbr.rel (!%p24_p7) target bundleno = 9 (0x9), region = 174 }
 0xb92   : > { %s9788_s14 = smov %s9785_s27 }
 0xb93   :  { %7381 = vsyncpa [#allocation3], 1 }
 0xb94   :  { %7383 = vsyncpa [#allocation3 + $0x1], 1 }
 0xb95   :  { %7384 = vsyncpa [#allocation6], 1 }
 0xb96   :  { %7385 = vsyncpa [#allocation4], 1 }
 0xb97   :  { %7387 = vsyncpa [#allocation4 + $0x1], 1 }

</bundles_post_ra>
